<compile_context>
chip_gen: v7x
topology: tpu7x:2x2x1
jax: 0.10.0
libtpu: 0.0.40
codegen_flags: <defaults>
</compile_context>

<pallas_src>
import math
import functools

import jax
import jax.numpy as jnp
from jax.experimental import pallas as pl
from jax.experimental.pallas import tpu as pltpu


def _round_up(x, m):
    return (x + m - 1) // m * m


def _pad_last2(x, r, c):
    """Zero-pad the last two dims of x up to (r, c)."""
    pad = [(0, 0)] * (x.ndim - 2) + [(0, r - x.shape[-2]), (0, c - x.shape[-1])]
    return jnp.pad(x, pad)


# ---------------------------------------------------------------------------
# Pallas kernel
# ---------------------------------------------------------------------------
def _encoder_kernel(num_layers, num_heads, e_real,
                    x_ref, pad_ref,
                    pre_w_ref, pre_b_ref,
                    wq_ref, bq_ref, wk_ref, bk_ref, wv_ref, bv_ref,
                    wo_ref, ob_ref,
                    l1_w_ref, l1_b_ref, l2_w_ref, l2_b_ref,
                    n1_w_ref, n1_b_ref, n2_w_ref, n2_b_ref,
                    fin_w_ref, fin_b_ref, fc_w_ref, fc_b_ref,
                    o_ref):
    f32 = jnp.float32
    Bt, S, Ep = x_ref.shape               # batch tile, seq, padded embed (lane-dense)
    H = num_heads
    BH = Bt * H
    N = Bt * S
    inv_e = 1.0 / float(e_real)

    # Column mask selecting the real embedding columns (the rest is zero padding
    # added only to make the lane dimension 128-wide).
    emask = (jax.lax.broadcasted_iota(jnp.int32, (1, Ep), 1) < e_real).astype(f32)

    def layer_norm(x, w, b, eps=1e-5):
        xm = x * emask
        mu = jnp.sum(xm, axis=-1, keepdims=True) * inv_e
        d = (x - mu) * emask
        var = jnp.sum(d * d, axis=-1, keepdims=True) * inv_e
        return d * jax.lax.rsqrt(var + eps) * w + b

    # Attention bias: causal mask OR key-padding mask -> large negative.
    # (Softmax/bias stay f32 even if matmul inputs are cast to bf16.)
    row = jax.lax.broadcasted_iota(jnp.int32, (S, S), 0)
    col = jax.lax.broadcasted_iota(jnp.int32, (S, S), 1)
    keypad = pad_ref[...] > 0.5                                  # (Bt, 1, S)
    masked = jnp.logical_or((col > row)[None, :, :], keypad)     # (Bt, S, S)
    bias_b = jnp.where(masked, -1e30, 0.0).astype(f32)

    def rep_heads_act(x2d):
        # (N, Ep) -> (Bt*H, S, Ep): replicate activations across heads so every
        # attention matmul is ONE leading-batch-dim batched dot_general.
        if Bt == 1:
            return jnp.broadcast_to(x2d[None], (H, S, Ep))
        x4 = x2d.reshape(Bt, 1, S, Ep)
        return jnp.broadcast_to(x4, (Bt, H, S, Ep)).reshape(BH, S, Ep)

    def rep_batch_w(w3):
        # (H, A, B) -> (Bt*H, A, B): tile per-head weights across the batch tile.
        if Bt == 1:
            return w3
        return jnp.broadcast_to(w3[None], (Bt,) + w3.shape).reshape((BH,) + w3.shape[1:])

    if Bt == 1:
        bias_bh = bias_b                                         # (1,S,S) broadcasts over heads
    else:
        bias_bh = jnp.broadcast_to(bias_b[:, None], (Bt, H, S, S)).reshape(BH, S, S)

    # Flatten the batch tile: all dense matmuls / layernorms run on (Bt*S, Ep).
    h = x_ref[...].reshape(N, Ep)
    # self.layer_norm right after the (identity) dropout
    h = layer_norm(h, pre_w_ref[...], pre_b_ref[...])

    # TODO(synk): for realistic depth/width, switch this unrolled loop to a grid
    # axis (or lax.fori_loop) with per-layer weight streaming and a tiled vocab
    # projection so the resident working set stays inside v7x's 64 MiB VMEM.
    for l in range(num_layers):
        # ---- multi-head self attention (all heads batched on the leading dim) ----
        hb = rep_heads_act(h)                                               # (BH, S, Ep)
        q = jnp.einsum("bse,bed->bsd", hb, rep_batch_w(wq_ref[l]),
                       preferred_element_type=f32) + rep_batch_w(bq_ref[l])  # 1/sqrt(Dh) folded in
        k = jnp.einsum("bse,bed->bsd", hb, rep_batch_w(wk_ref[l]),
                       preferred_element_type=f32) + rep_batch_w(bk_ref[l])
        v = jnp.einsum("bse,bed->bsd", hb, rep_batch_w(wv_ref[l]),
                       preferred_element_type=f32) + rep_batch_w(bv_ref[l])
        s = jnp.einsum("bqd,bkd->bqk", q, k, preferred_element_type=f32) + bias_bh
        s = s - jnp.max(s, axis=-1, keepdims=True)
        p = jnp.exp(s)
        p = p * pl.reciprocal(jnp.sum(p, axis=-1, keepdims=True), approx=True)
        o = jnp.einsum("bqk,bkd->bqd", p, v, preferred_element_type=f32)     # (BH, S, Dp)
        o = jnp.einsum("bsd,bde->bse", o, rep_batch_w(wo_ref[l]),
                       preferred_element_type=f32)                            # (BH, S, Ep)
        if Bt == 1:
            attn = jnp.sum(o, axis=0)                                         # (N, Ep)
        else:
            attn = jnp.sum(o.reshape(Bt, H, S, Ep), axis=1).reshape(N, Ep)
        attn = attn + ob_ref[l]
        h = layer_norm(h + attn, n1_w_ref[l], n1_b_ref[l])

        # ---- feed forward (dim_feedforward == embed_size, ReLU) ----
        ff = jnp.dot(h, l1_w_ref[l], preferred_element_type=f32) + l1_b_ref[l]
        ff = jnp.maximum(ff, 0.0)
        ff = jnp.dot(ff, l2_w_ref[l], preferred_element_type=f32) + l2_b_ref[l]
        h = layer_norm(h + ff, n2_w_ref[l], n2_b_ref[l])

    # final encoder norm + vocab projection (lane-dense padded vocab)
    h = layer_norm(h, fin_w_ref[...], fin_b_ref[...])
    logits = jnp.dot(h, fc_w_ref[...], preferred_element_type=f32) + fc_b_ref[...]
    o_ref[...] = logits.reshape(Bt, S, o_ref.shape[2]).astype(o_ref.dtype)


# ---------------------------------------------------------------------------
# Parameters (PyTorch-equivalent layout, unpadded) and kernel-side packing
# ---------------------------------------------------------------------------
def init_params(key, vocab, max_seq, E, L):
    keys = jax.random.split(key, 12)

    def nrm(k, shape, s=0.02):
        return (jax.random.normal(k, shape) * s).astype(jnp.float32)

    p = {}
    p["tok_emb"] = nrm(keys[0], (vocab, E))
    p["pos_emb"] = nrm(keys[1], (max_seq, E))
    p["pre_w"] = jnp.ones((1, E), jnp.float32)
    p["pre_b"] = jnp.zeros((1, E), jnp.float32)
    # all linear weights stored pre-transposed: (in, out)
    p["qkv_w"] = nrm(keys[2], (L, E, 3 * E))
    p["qkv_b"] = nrm(keys[3], (L, 1, 3 * E))
    p["out_w"] = nrm(keys[4], (L, E, E))
    p["out_b"] = nrm(keys[5], (L, 1, E))
    p["l1_w"] = nrm(keys[6], (L, E, E))
    p["l1_b"] = nrm(keys[7], (L, 1, E))
    p["l2_w"] = nrm(keys[8], (L, E, E))
    p["l2_b"] = nrm(keys[9], (L, 1, E))
    p["n1_w"] = jnp.ones((L, 1, E), jnp.float32)
    p["n1_b"] = jnp.zeros((L, 1, E), jnp.float32)
    p["n2_w"] = jnp.ones((L, 1, E), jnp.float32)
    p["n2_b"] = jnp.zeros((L, 1, E), jnp.float32)
    p["fin_w"] = jnp.ones((1, E), jnp.float32)
    p["fin_b"] = jnp.zeros((1, E), jnp.float32)
    p["fc_w"] = nrm(keys[10], (E, vocab))
    p["fc_b"] = nrm(keys[11], (1, vocab))
    return p


def pack_kernel_weights(params, num_heads):
    """Zero-pad lane dims to 128 and split QKV/out-proj into per-head tensors.

    Padded columns/rows are zero, so the padded math is exactly the unpadded
    math (layernorm uses masked statistics in the kernel). The 1/sqrt(Dh)
    attention scale is folded into Wq / bq here.
    """
    E = params["tok_emb"].shape[1]
    V = params["fc_w"].shape[1]
    L = params["qkv_w"].shape[0]
    H = num_heads
    Dh = E // H
    Ep = _round_up(E, 128)
    Dp = _round_up(Dh, 128)
    Vp = _round_up(V, 128)
    scale = 1.0 / math.sqrt(Dh)

    qkv_w = params["qkv_w"]                 # (L, E, 3E)
    qkv_b = params["qkv_b"][:, 0, :]        # (L, 3E)

    def split_heads_w(w):                   # (L, E, E) -> (L, H, Ep, Dp)
        w = w.reshape(L, E, H, Dh).transpose(0, 2, 1, 3)
        return _pad_last2(w, Ep, Dp)

    def split_heads_b(b):                   # (L, E) -> (L, H, 1, Dp)
        return _pad_last2(b.reshape(L, H, 1, Dh), 1, Dp)

    wq = split_heads_w(qkv_w[:, :, 0 * E:1 * E]) * scale
    wk = split_heads_w(qkv_w[:, :, 1 * E:2 * E])
    wv = split_heads_w(qkv_w[:, :, 2 * E:3 * E])
    bq = split_heads_b(qkv_b[:, 0 * E:1 * E]) * scale
    bk = split_heads_b(qkv_b[:, 1 * E:2 * E])
    bv = split_heads_b(qkv_b[:, 2 * E:3 * E])

    wo = _pad_last2(params["out_w"].reshape(L, H, Dh, E), Dp, Ep)
    ob = _pad_last2(params["out_b"], 1, Ep)

    packed = dict(
        pre_w=_pad_last2(params["pre_w"], 1, Ep),
        pre_b=_pad_last2(params["pre_b"], 1, Ep),
        wq=wq, bq=bq, wk=wk, bk=bk, wv=wv, bv=bv,
        wo=wo, ob=ob,
        l1_w=_pad_last2(params["l1_w"], Ep, Ep),
        l1_b=_pad_last2(params["l1_b"], 1, Ep),
        l2_w=_pad_last2(params["l2_w"], Ep, Ep),
        l2_b=_pad_last2(params["l2_b"], 1, Ep),
        n1_w=_pad_last2(params["n1_w"], 1, Ep),
        n1_b=_pad_last2(params["n1_b"], 1, Ep),
        n2_w=_pad_last2(params["n2_w"], 1, Ep),
        n2_b=_pad_last2(params["n2_b"], 1, Ep),
        fin_w=_pad_last2(params["fin_w"], 1, Ep),
        fin_b=_pad_last2(params["fin_b"], 1, Ep),
        fc_w=_pad_last2(params["fc_w"], Ep, Vp),
        fc_b=_pad_last2(params["fc_b"], 1, Vp),
        tok_emb=_pad_last2(params["tok_emb"], params["tok_emb"].shape[0], Ep),
        pos_emb=_pad_last2(params["pos_emb"], params["pos_emb"].shape[0], Ep),
    )
    dims = dict(E=E, V=V, Ep=Ep, Dp=Dp, Vp=Vp)
    return packed, dims


# ---------------------------------------------------------------------------
# Wrapper
# ---------------------------------------------------------------------------
def transformer_forward(tokens, params, num_heads, num_layers, block_b=None):
    B, S = tokens.shape
    packed, dims = pack_kernel_weights(params, num_heads)
    E, V, Ep, Vp = dims["E"], dims["V"], dims["Ep"], dims["Vp"]

    # glue in plain JAX: embedding gathers + scale + positions, key-padding mask
    emb = (packed["tok_emb"][tokens] * math.sqrt(E)
           + packed["pos_emb"][jnp.arange(S)][None]).astype(jnp.float32)   # (B, S, Ep)
    pad = (tokens == 0).astype(jnp.float32).reshape(B, 1, S)

    # Batch tile per grid step: bigger blocks reduce serial step overhead while
    # keeping >=2 parallel steps (v7x megacore) whenever B >= 2.
    if block_b is None:
        block_b = max(1, B // 2)
        while B % block_b:
            block_b -= 1
    Bt = block_b
    grid = (B // Bt,)

    kernel = functools.partial(_encoder_kernel, num_layers, num_heads, E)

    weight_names = ["pre_w", "pre_b", "wq", "bq", "wk", "bk", "wv", "bv",
                    "wo", "ob", "l1_w", "l1_b", "l2_w", "l2_b",
                    "n1_w", "n1_b", "n2_w", "n2_b",
                    "fin_w", "fin_b", "fc_w", "fc_b"]
    weights = [packed[n] for n in weight_names]

    def full_spec(arr):
        nd = arr.ndim
        return pl.BlockSpec(arr.shape, lambda b, _nd=nd: (0,) * _nd)

    in_specs = ([pl.BlockSpec((Bt, S, Ep), lambda b: (b, 0, 0)),
                 pl.BlockSpec((Bt, 1, S), lambda b: (b, 0, 0))]
                + [full_spec(w) for w in weights])
    out_specs = pl.BlockSpec((Bt, S, Vp), lambda b: (b, 0, 0))

    logits_padded = pl.pallas_call(
        kernel,
        out_shape=jax.ShapeDtypeStruct((B, S, Vp), jnp.float32),
        grid_spec=pltpu.PrefetchScalarGridSpec(
            num_scalar_prefetch=0,
            grid=grid,
            in_specs=in_specs,
            out_specs=out_specs),
        compiler_params=pltpu.CompilerParams(
            dimension_semantics=("parallel",)),
    )(emb, pad, *weights)

    return logits_padded[:, :, :V]     # drop vocab lane padding


# ---------------------------------------------------------------------------
# Plain-JAX reference (mirror of the PyTorch forward in eval mode)
# ---------------------------------------------------------------------------
def reference_forward(tokens, params, num_heads, num_layers):
    B, S = tokens.shape
    E = params["tok_emb"].shape[1]
    Dh = E // num_heads

    def ln(x, w, b):
        mu = x.mean(-1, keepdims=True)
        var = ((x - mu) ** 2).mean(-1, keepdims=True)
        return (x - mu) / jnp.sqrt(var + 1e-5) * w + b

    x = params["tok_emb"][tokens] * math.sqrt(E) + params["pos_emb"][jnp.arange(S)][None]
    x = ln(x, params["pre_w"][0], params["pre_b"][0])

    causal = jnp.triu(jnp.ones((S, S), bool), 1)
    keypad = (tokens == 0)[:, None, None, :]
    mask = causal[None, None] | keypad
    bias = jnp.where(mask, -1e30, 0.0)

    for l in range(num_layers):
        qkv = x @ params["qkv_w"][l] + params["qkv_b"][l]
        q, k, v = jnp.split(qkv, 3, axis=-1)
        heads = lambda t: t.reshape(B, S, num_heads, Dh).transpose(0, 2, 1, 3)
        qh, kh, vh = heads(q), heads(k), heads(v)
        s = jnp.einsum("bhqd,bhkd->bhqk", qh, kh) / math.sqrt(Dh) + bias
        p = jax.nn.softmax(s, axis=-1)
        o = jnp.einsum("bhqk,bhkd->bhqd", p, vh).transpose(0, 2, 1, 3).reshape(B, S, E)
        o = o @ params["out_w"][l] + params["out_b"][l]
        x = ln(x + o, params["n1_w"][l], params["n1_b"][l])
        ff = jax.nn.relu(x @ params["l1_w"][l] + params["l1_b"][l])
        ff = ff @ params["l2_w"][l] + params["l2_b"][l]
        x = ln(x + ff, params["n2_w"][l], params["n2_b"][l])

    x = ln(x, params["fin_w"][0], params["fin_b"][0])
    return x @ params["fc_w"] + params["fc_b"]


if __name__ == "__main__":
    vocab_size, max_seq_length, embed_size, num_heads, num_layers = 50, 16, 32, 4, 2
    B, S = 2, 8

    key = jax.random.PRNGKey(0)
    pkey, tkey = jax.random.split(key)
    params = init_params(pkey, vocab_size, max_seq_length, embed_size, num_layers)

    tokens = jax.random.randint(tkey, (B, S), 1, vocab_size, dtype=jnp.int32)
    tokens = tokens.at[1, -2:].set(0)   # trailing padding tokens in sequence 1

    out = transformer_forward(tokens, params, num_heads, num_layers)
    out = jax.block_until_ready(out)

    ref = reference_forward(tokens, params, num_heads, num_layers)
    assert out.shape == (B, S, vocab_size)
    assert bool(jnp.allclose(out, ref, rtol=2e-3, atol=2e-3)), "kernel/reference mismatch"
    print("KERNEL_OK")
</pallas_src>

<mosaic_0001>
module attributes {stable_mosaic.version = 11 : i64} {
  func.func @_encoder_kernel(%arg0: i32, %arg1: memref<1x8x128xf32, #tpu.memory_space<vmem>>, %arg2: memref<1x1x8xf32, #tpu.memory_space<vmem>>, %arg3: memref<1x128xf32, #tpu.memory_space<vmem>>, %arg4: memref<1x128xf32, #tpu.memory_space<vmem>>, %arg5: memref<2x4x128x128xf32, #tpu.memory_space<vmem>>, %arg6: memref<2x4x1x128xf32, #tpu.memory_space<vmem>>, %arg7: memref<2x4x128x128xf32, #tpu.memory_space<vmem>>, %arg8: memref<2x4x1x128xf32, #tpu.memory_space<vmem>>, %arg9: memref<2x4x128x128xf32, #tpu.memory_space<vmem>>, %arg10: memref<2x4x1x128xf32, #tpu.memory_space<vmem>>, %arg11: memref<2x4x128x128xf32, #tpu.memory_space<vmem>>, %arg12: memref<2x1x128xf32, #tpu.memory_space<vmem>>, %arg13: memref<2x128x128xf32, #tpu.memory_space<vmem>>, %arg14: memref<2x1x128xf32, #tpu.memory_space<vmem>>, %arg15: memref<2x128x128xf32, #tpu.memory_space<vmem>>, %arg16: memref<2x1x128xf32, #tpu.memory_space<vmem>>, %arg17: memref<2x1x128xf32, #tpu.memory_space<vmem>>, %arg18: memref<2x1x128xf32, #tpu.memory_space<vmem>>, %arg19: memref<2x1x128xf32, #tpu.memory_space<vmem>>, %arg20: memref<2x1x128xf32, #tpu.memory_space<vmem>>, %arg21: memref<1x128xf32, #tpu.memory_space<vmem>>, %arg22: memref<1x128xf32, #tpu.memory_space<vmem>>, %arg23: memref<128x128xf32, #tpu.memory_space<vmem>>, %arg24: memref<1x128xf32, #tpu.memory_space<vmem>>, %arg25: memref<1x8x128xf32, #tpu.memory_space<vmem>>) attributes {dimension_semantics = [#tpu.dimension_semantics<parallel>], iteration_bounds = array<i64: 2>, scalar_prefetch = 0 : i64, scratch_operands = 0 : i64, tpu.core_type = #tpu.core_type<tc>, window_params = [{transform_indices = @transform_0, window_bounds = array<i64: 1, 8, 128>}, {transform_indices = @transform_1, window_bounds = array<i64: 1, 1, 8>}, {pipeline_mode = #tpu.pipeline_mode<synchronous>, transform_indices = @transform_2, window_bounds = array<i64: 1, 128>}, {pipeline_mode = #tpu.pipeline_mode<synchronous>, transform_indices = @transform_3, window_bounds = array<i64: 1, 128>}, {pipeline_mode = #tpu.pipeline_mode<synchronous>, transform_indices = @transform_4, window_bounds = array<i64: 2, 4, 128, 128>}, {pipeline_mode = #tpu.pipeline_mode<synchronous>, transform_indices = @transform_5, window_bounds = array<i64: 2, 4, 1, 128>}, {pipeline_mode = #tpu.pipeline_mode<synchronous>, transform_indices = @transform_6, window_bounds = array<i64: 2, 4, 128, 128>}, {pipeline_mode = #tpu.pipeline_mode<synchronous>, transform_indices = @transform_7, window_bounds = array<i64: 2, 4, 1, 128>}, {pipeline_mode = #tpu.pipeline_mode<synchronous>, transform_indices = @transform_8, window_bounds = array<i64: 2, 4, 128, 128>}, {pipeline_mode = #tpu.pipeline_mode<synchronous>, transform_indices = @transform_9, window_bounds = array<i64: 2, 4, 1, 128>}, {pipeline_mode = #tpu.pipeline_mode<synchronous>, transform_indices = @transform_10, window_bounds = array<i64: 2, 4, 128, 128>}, {pipeline_mode = #tpu.pipeline_mode<synchronous>, transform_indices = @transform_11, window_bounds = array<i64: 2, 1, 128>}, {pipeline_mode = #tpu.pipeline_mode<synchronous>, transform_indices = @transform_12, window_bounds = array<i64: 2, 128, 128>}, {pipeline_mode = #tpu.pipeline_mode<synchronous>, transform_indices = @transform_13, window_bounds = array<i64: 2, 1, 128>}, {pipeline_mode = #tpu.pipeline_mode<synchronous>, transform_indices = @transform_14, window_bounds = array<i64: 2, 128, 128>}, {pipeline_mode = #tpu.pipeline_mode<synchronous>, transform_indices = @transform_15, window_bounds = array<i64: 2, 1, 128>}, {pipeline_mode = #tpu.pipeline_mode<synchronous>, transform_indices = @transform_16, window_bounds = array<i64: 2, 1, 128>}, {pipeline_mode = #tpu.pipeline_mode<synchronous>, transform_indices = @transform_17, window_bounds = array<i64: 2, 1, 128>}, {pipeline_mode = #tpu.pipeline_mode<synchronous>, transform_indices = @transform_18, window_bounds = array<i64: 2, 1, 128>}, {pipeline_mode = #tpu.pipeline_mode<synchronous>, transform_indices = @transform_19, window_bounds = array<i64: 2, 1, 128>}, {pipeline_mode = #tpu.pipeline_mode<synchronous>, transform_indices = @transform_20, window_bounds = array<i64: 1, 128>}, {pipeline_mode = #tpu.pipeline_mode<synchronous>, transform_indices = @transform_21, window_bounds = array<i64: 1, 128>}, {pipeline_mode = #tpu.pipeline_mode<synchronous>, transform_indices = @transform_22, window_bounds = array<i64: 128, 128>}, {pipeline_mode = #tpu.pipeline_mode<synchronous>, transform_indices = @transform_23, window_bounds = array<i64: 1, 128>}, {transform_indices = @transform_24, window_bounds = array<i64: 1, 8, 128>}]} {
    %0 = tpu.iota {dimensions = array<i32: 1>} : vector<1x128xi32>
    %c32_i32 = arith.constant 32 : i32
    %1 = vector.broadcast %c32_i32 : i32 to vector<1x128xi32>
    %2 = arith.cmpi slt, %0, %1 : vector<1x128xi32>
    %3 = arith.extui %2 : vector<1x128xi1> to vector<1x128xi32>
    %4 = arith.sitofp %3 : vector<1x128xi32> to vector<1x128xf32>
    %5 = tpu.iota {dimensions = array<i32: 0>} : vector<8x8xi32>
    %6 = tpu.iota {dimensions = array<i32: 1>} : vector<8x8xi32>
    %c0 = arith.constant 0 : index
    %c0_0 = arith.constant 0 : index
    %c0_1 = arith.constant 0 : index
    %7 = vector.load %arg2[%c0, %c0_0, %c0_1] : memref<1x1x8xf32, #tpu.memory_space<vmem>>, vector<1x1x8xf32>
    %cst = arith.constant 5.000000e-01 : f32
    %8 = vector.broadcast %cst : f32 to vector<1x1x8xf32>
    %9 = arith.cmpf ogt, %7, %8 : vector<1x1x8xf32>
    %10 = arith.cmpi sgt, %6, %5 : vector<8x8xi32>
    %11 = vector.shape_cast %10 : vector<8x8xi1> to vector<1x8x8xi1>
    %12 = vector.broadcast %9 : vector<1x1x8xi1> to vector<1x8x8xi1>
    %13 = arith.ori %11, %12 : vector<1x8x8xi1>
    %cst_2 = arith.constant -1.000000e+30 : f32
    %cst_3 = arith.constant 0.000000e+00 : f32
    %14 = vector.broadcast %cst_2 : f32 to vector<1x8x8xf32>
    %15 = vector.broadcast %cst_3 : f32 to vector<1x8x8xf32>
    %16 = arith.select %13, %14, %15 : vector<1x8x8xi1>, vector<1x8x8xf32>
    %c0_4 = arith.constant 0 : index
    %c0_5 = arith.constant 0 : index
    %c0_6 = arith.constant 0 : index
    %17 = vector.load %arg1[%c0_4, %c0_5, %c0_6] : memref<1x8x128xf32, #tpu.memory_space<vmem>>, vector<1x8x128xf32>
    %18 = vector.shape_cast %17 : vector<1x8x128xf32> to vector<8x128xf32>
    %c0_7 = arith.constant 0 : index
    %c0_8 = arith.constant 0 : index
    %19 = vector.load %arg3[%c0_7, %c0_8] : memref<1x128xf32, #tpu.memory_space<vmem>>, vector<1x128xf32>
    %c0_9 = arith.constant 0 : index
    %c0_10 = arith.constant 0 : index
    %20 = vector.load %arg4[%c0_9, %c0_10] : memref<1x128xf32, #tpu.memory_space<vmem>>, vector<1x128xf32>
    %21 = vector.broadcast %4 : vector<1x128xf32> to vector<8x128xf32>
    %22 = arith.mulf %18, %21 : vector<8x128xf32>
    %cst_11 = arith.constant dense<0.000000e+00> : vector<8xf32>
    %23 = vector.multi_reduction <add>, %22, %cst_11 [1] : vector<8x128xf32> to vector<8xf32>
    %24 = vector.shape_cast %23 : vector<8xf32> to vector<8x1xf32>
    %cst_12 = arith.constant 3.125000e-02 : f32
    %25 = vector.broadcast %cst_12 : f32 to vector<8x1xf32>
    %26 = arith.mulf %24, %25 : vector<8x1xf32>
    %27 = vector.broadcast %26 : vector<8x1xf32> to vector<8x128xf32>
    %28 = arith.subf %18, %27 : vector<8x128xf32>
    %29 = vector.broadcast %4 : vector<1x128xf32> to vector<8x128xf32>
    %30 = arith.mulf %28, %29 : vector<8x128xf32>
    %31 = arith.mulf %30, %30 : vector<8x128xf32>
    %cst_13 = arith.constant dense<0.000000e+00> : vector<8xf32>
    %32 = vector.multi_reduction <add>, %31, %cst_13 [1] : vector<8x128xf32> to vector<8xf32>
    %33 = vector.shape_cast %32 : vector<8xf32> to vector<8x1xf32>
    %cst_14 = arith.constant 3.125000e-02 : f32
    %34 = vector.broadcast %cst_14 : f32 to vector<8x1xf32>
    %35 = arith.mulf %33, %34 : vector<8x1xf32>
    %cst_15 = arith.constant 9.99999974E-6 : f32
    %36 = vector.broadcast %cst_15 : f32 to vector<8x1xf32>
    %37 = arith.addf %35, %36 : vector<8x1xf32>
    %38 = math.rsqrt %37 : vector<8x1xf32>
    %39 = vector.broadcast %38 : vector<8x1xf32> to vector<8x128xf32>
    %40 = arith.mulf %30, %39 : vector<8x128xf32>
    %41 = vector.broadcast %19 : vector<1x128xf32> to vector<8x128xf32>
    %42 = arith.mulf %40, %41 : vector<8x128xf32>
    %43 = vector.broadcast %20 : vector<1x128xf32> to vector<8x128xf32>
    %44 = arith.addf %42, %43 : vector<8x128xf32>
    %45 = vector.shape_cast %44 : vector<8x128xf32> to vector<1x8x128xf32>
    %46 = vector.shape_cast %45 : vector<1x8x128xf32> to vector<1x8x128xf32>
    %47 = vector.broadcast %46 : vector<1x8x128xf32> to vector<4x8x128xf32>
    %c0_16 = arith.constant 0 : index
    %c0_17 = arith.constant 0 : index
    %c0_18 = arith.constant 0 : index
    %c0_19 = arith.constant 0 : index
    %48 = vector.load %arg5[%c0_16, %c0_17, %c0_18, %c0_19] : memref<2x4x128x128xf32, #tpu.memory_space<vmem>>, vector<1x4x128x128xf32>
    %49 = vector.shape_cast %48 : vector<1x4x128x128xf32> to vector<4x128x128xf32>
    "tpu.trace_start"() <{level = 10 : i32, message = "bse,bed->bsd"}> : () -> ()
    %cst_20 = arith.constant dense<0.000000e+00> : vector<4x8x128xf32>
    %50 = tpu.matmul %47, %49, %cst_20 {dimension_numbers = #tpu.dot_dimension_numbers<[2], [1], [1], [2], [0, 0, 0, 1, 1, 2], [0], [0]>} : vector<4x8x128xf32>, vector<4x128x128xf32>, vector<4x8x128xf32> -> vector<4x8x128xf32>
    "tpu.trace_stop"() : () -> ()
    %c0_21 = arith.constant 0 : index
    %c0_22 = arith.constant 0 : index
    %c0_23 = arith.constant 0 : index
    %c0_24 = arith.constant 0 : index
    %51 = vector.load %arg6[%c0_21, %c0_22, %c0_23, %c0_24] : memref<2x4x1x128xf32, #tpu.memory_space<vmem>>, vector<1x4x1x128xf32>
    %52 = vector.shape_cast %51 : vector<1x4x1x128xf32> to vector<4x1x128xf32>
    %53 = vector.broadcast %52 : vector<4x1x128xf32> to vector<4x8x128xf32>
    %54 = arith.addf %50, %53 : vector<4x8x128xf32>
    %c0_25 = arith.constant 0 : index
    %c0_26 = arith.constant 0 : index
    %c0_27 = arith.constant 0 : index
    %c0_28 = arith.constant 0 : index
    %55 = vector.load %arg7[%c0_25, %c0_26, %c0_27, %c0_28] : memref<2x4x128x128xf32, #tpu.memory_space<vmem>>, vector<1x4x128x128xf32>
    %56 = vector.shape_cast %55 : vector<1x4x128x128xf32> to vector<4x128x128xf32>
    "tpu.trace_start"() <{level = 10 : i32, message = "bse,bed->bsd"}> : () -> ()
    %cst_29 = arith.constant dense<0.000000e+00> : vector<4x8x128xf32>
    %57 = tpu.matmul %47, %56, %cst_29 {dimension_numbers = #tpu.dot_dimension_numbers<[2], [1], [1], [2], [0, 0, 0, 1, 1, 2], [0], [0]>} : vector<4x8x128xf32>, vector<4x128x128xf32>, vector<4x8x128xf32> -> vector<4x8x128xf32>
    "tpu.trace_stop"() : () -> ()
    %c0_30 = arith.constant 0 : index
    %c0_31 = arith.constant 0 : index
    %c0_32 = arith.constant 0 : index
    %c0_33 = arith.constant 0 : index
    %58 = vector.load %arg8[%c0_30, %c0_31, %c0_32, %c0_33] : memref<2x4x1x128xf32, #tpu.memory_space<vmem>>, vector<1x4x1x128xf32>
    %59 = vector.shape_cast %58 : vector<1x4x1x128xf32> to vector<4x1x128xf32>
    %60 = vector.broadcast %59 : vector<4x1x128xf32> to vector<4x8x128xf32>
    %61 = arith.addf %57, %60 : vector<4x8x128xf32>
    %c0_34 = arith.constant 0 : index
    %c0_35 = arith.constant 0 : index
    %c0_36 = arith.constant 0 : index
    %c0_37 = arith.constant 0 : index
    %62 = vector.load %arg9[%c0_34, %c0_35, %c0_36, %c0_37] : memref<2x4x128x128xf32, #tpu.memory_space<vmem>>, vector<1x4x128x128xf32>
    %63 = vector.shape_cast %62 : vector<1x4x128x128xf32> to vector<4x128x128xf32>
    "tpu.trace_start"() <{level = 10 : i32, message = "bse,bed->bsd"}> : () -> ()
    %cst_38 = arith.constant dense<0.000000e+00> : vector<4x8x128xf32>
    %64 = tpu.matmul %47, %63, %cst_38 {dimension_numbers = #tpu.dot_dimension_numbers<[2], [1], [1], [2], [0, 0, 0, 1, 1, 2], [0], [0]>} : vector<4x8x128xf32>, vector<4x128x128xf32>, vector<4x8x128xf32> -> vector<4x8x128xf32>
    "tpu.trace_stop"() : () -> ()
    %c0_39 = arith.constant 0 : index
    %c0_40 = arith.constant 0 : index
    %c0_41 = arith.constant 0 : index
    %c0_42 = arith.constant 0 : index
    %65 = vector.load %arg10[%c0_39, %c0_40, %c0_41, %c0_42] : memref<2x4x1x128xf32, #tpu.memory_space<vmem>>, vector<1x4x1x128xf32>
    %66 = vector.shape_cast %65 : vector<1x4x1x128xf32> to vector<4x1x128xf32>
    %67 = vector.broadcast %66 : vector<4x1x128xf32> to vector<4x8x128xf32>
    %68 = arith.addf %64, %67 : vector<4x8x128xf32>
    "tpu.trace_start"() <{level = 10 : i32, message = "bqd,bkd->bqk"}> : () -> ()
    %cst_43 = arith.constant dense<0.000000e+00> : vector<4x8x8xf32>
    %69 = tpu.matmul %54, %61, %cst_43 {dimension_numbers = #tpu.dot_dimension_numbers<[2], [2], [1], [1], [0, 0, 0, 1, 1, 1], [0], [0]>} : vector<4x8x128xf32>, vector<4x8x128xf32>, vector<4x8x8xf32> -> vector<4x8x8xf32>
    "tpu.trace_stop"() : () -> ()
    %70 = vector.broadcast %16 : vector<1x8x8xf32> to vector<4x8x8xf32>
    %71 = arith.addf %69, %70 : vector<4x8x8xf32>
    %cst_44 = arith.constant dense<0xFF800000> : vector<4x8xf32>
    %72 = vector.multi_reduction <maximumf>, %71, %cst_44 [2] : vector<4x8x8xf32> to vector<4x8xf32>
    %73 = vector.shape_cast %72 : vector<4x8xf32> to vector<4x8x1xf32>
    %74 = vector.broadcast %73 : vector<4x8x1xf32> to vector<4x8x8xf32>
    %75 = arith.subf %71, %74 : vector<4x8x8xf32>
    %76 = math.exp %75 : vector<4x8x8xf32>
    %cst_45 = arith.constant dense<0.000000e+00> : vector<4x8xf32>
    %77 = vector.multi_reduction <add>, %76, %cst_45 [2] : vector<4x8x8xf32> to vector<4x8xf32>
    %78 = vector.shape_cast %77 : vector<4x8xf32> to vector<4x8x1xf32>
    %79 = tpu.reciprocal %78 {approx = true} : vector<4x8x1xf32> -> vector<4x8x1xf32>
    %80 = vector.broadcast %79 : vector<4x8x1xf32> to vector<4x8x8xf32>
    %81 = arith.mulf %76, %80 : vector<4x8x8xf32>
    "tpu.trace_start"() <{level = 10 : i32, message = "bqk,bkd->bqd"}> : () -> ()
    %cst_46 = arith.constant dense<0.000000e+00> : vector<4x8x128xf32>
    %82 = tpu.matmul %81, %68, %cst_46 {dimension_numbers = #tpu.dot_dimension_numbers<[2], [1], [1], [2], [0, 0, 0, 1, 1, 2], [0], [0]>} : vector<4x8x8xf32>, vector<4x8x128xf32>, vector<4x8x128xf32> -> vector<4x8x128xf32>
    "tpu.trace_stop"() : () -> ()
    %c0_47 = arith.constant 0 : index
    %c0_48 = arith.constant 0 : index
    %c0_49 = arith.constant 0 : index
    %c0_50 = arith.constant 0 : index
    %83 = vector.load %arg11[%c0_47, %c0_48, %c0_49, %c0_50] : memref<2x4x128x128xf32, #tpu.memory_space<vmem>>, vector<1x4x128x128xf32>
    %84 = vector.shape_cast %83 : vector<1x4x128x128xf32> to vector<4x128x128xf32>
    "tpu.trace_start"() <{level = 10 : i32, message = "bsd,bde->bse"}> : () -> ()
    %cst_51 = arith.constant dense<0.000000e+00> : vector<4x8x128xf32>
    %85 = tpu.matmul %82, %84, %cst_51 {dimension_numbers = #tpu.dot_dimension_numbers<[2], [1], [1], [2], [0, 0, 0, 1, 1, 2], [0], [0]>} : vector<4x8x128xf32>, vector<4x128x128xf32>, vector<4x8x128xf32> -> vector<4x8x128xf32>
    "tpu.trace_stop"() : () -> ()
    %cst_52 = arith.constant dense<0.000000e+00> : vector<8x128xf32>
    %86 = vector.multi_reduction <add>, %85, %cst_52 [0] : vector<4x8x128xf32> to vector<8x128xf32>
    %c0_53 = arith.constant 0 : index
    %c0_54 = arith.constant 0 : index
    %c0_55 = arith.constant 0 : index
    %87 = vector.load %arg12[%c0_53, %c0_54, %c0_55] : memref<2x1x128xf32, #tpu.memory_space<vmem>>, vector<1x1x128xf32>
    %88 = vector.shape_cast %87 : vector<1x1x128xf32> to vector<1x128xf32>
    %89 = vector.broadcast %88 : vector<1x128xf32> to vector<8x128xf32>
    %90 = arith.addf %86, %89 : vector<8x128xf32>
    %91 = arith.addf %44, %90 : vector<8x128xf32>
    %c0_56 = arith.constant 0 : index
    %c0_57 = arith.constant 0 : index
    %c0_58 = arith.constant 0 : index
    %92 = vector.load %arg17[%c0_56, %c0_57, %c0_58] : memref<2x1x128xf32, #tpu.memory_space<vmem>>, vector<1x1x128xf32>
    %93 = vector.shape_cast %92 : vector<1x1x128xf32> to vector<1x128xf32>
    %c0_59 = arith.constant 0 : index
    %c0_60 = arith.constant 0 : index
    %c0_61 = arith.constant 0 : index
    %94 = vector.load %arg18[%c0_59, %c0_60, %c0_61] : memref<2x1x128xf32, #tpu.memory_space<vmem>>, vector<1x1x128xf32>
    %95 = vector.shape_cast %94 : vector<1x1x128xf32> to vector<1x128xf32>
    %96 = vector.broadcast %4 : vector<1x128xf32> to vector<8x128xf32>
    %97 = arith.mulf %91, %96 : vector<8x128xf32>
    %cst_62 = arith.constant dense<0.000000e+00> : vector<8xf32>
    %98 = vector.multi_reduction <add>, %97, %cst_62 [1] : vector<8x128xf32> to vector<8xf32>
    %99 = vector.shape_cast %98 : vector<8xf32> to vector<8x1xf32>
    %cst_63 = arith.constant 3.125000e-02 : f32
    %100 = vector.broadcast %cst_63 : f32 to vector<8x1xf32>
    %101 = arith.mulf %99, %100 : vector<8x1xf32>
    %102 = vector.broadcast %101 : vector<8x1xf32> to vector<8x128xf32>
    %103 = arith.subf %91, %102 : vector<8x128xf32>
    %104 = vector.broadcast %4 : vector<1x128xf32> to vector<8x128xf32>
    %105 = arith.mulf %103, %104 : vector<8x128xf32>
    %106 = arith.mulf %105, %105 : vector<8x128xf32>
    %cst_64 = arith.constant dense<0.000000e+00> : vector<8xf32>
    %107 = vector.multi_reduction <add>, %106, %cst_64 [1] : vector<8x128xf32> to vector<8xf32>
    %108 = vector.shape_cast %107 : vector<8xf32> to vector<8x1xf32>
    %cst_65 = arith.constant 3.125000e-02 : f32
    %109 = vector.broadcast %cst_65 : f32 to vector<8x1xf32>
    %110 = arith.mulf %108, %109 : vector<8x1xf32>
    %cst_66 = arith.constant 9.99999974E-6 : f32
    %111 = vector.broadcast %cst_66 : f32 to vector<8x1xf32>
    %112 = arith.addf %110, %111 : vector<8x1xf32>
    %113 = math.rsqrt %112 : vector<8x1xf32>
    %114 = vector.broadcast %113 : vector<8x1xf32> to vector<8x128xf32>
    %115 = arith.mulf %105, %114 : vector<8x128xf32>
    %116 = vector.broadcast %93 : vector<1x128xf32> to vector<8x128xf32>
    %117 = arith.mulf %115, %116 : vector<8x128xf32>
    %118 = vector.broadcast %95 : vector<1x128xf32> to vector<8x128xf32>
    %119 = arith.addf %117, %118 : vector<8x128xf32>
    %c0_67 = arith.constant 0 : index
    %c0_68 = arith.constant 0 : index
    %c0_69 = arith.constant 0 : index
    %120 = vector.load %arg13[%c0_67, %c0_68, %c0_69] : memref<2x128x128xf32, #tpu.memory_space<vmem>>, vector<1x128x128xf32>
    %121 = vector.shape_cast %120 : vector<1x128x128xf32> to vector<128x128xf32>
    %cst_70 = arith.constant dense<0.000000e+00> : vector<8x128xf32>
    %122 = tpu.matmul %119, %121, %cst_70 {dimension_numbers = #tpu.dot_dimension_numbers<[1], [0], [0], [1], [0, 0, 1, 1], [], []>} : vector<8x128xf32>, vector<128x128xf32>, vector<8x128xf32> -> vector<8x128xf32>
    %c0_71 = arith.constant 0 : index
    %c0_72 = arith.constant 0 : index
    %c0_73 = arith.constant 0 : index
    %123 = vector.load %arg14[%c0_71, %c0_72, %c0_73] : memref<2x1x128xf32, #tpu.memory_space<vmem>>, vector<1x1x128xf32>
    %124 = vector.shape_cast %123 : vector<1x1x128xf32> to vector<1x128xf32>
    %125 = vector.broadcast %124 : vector<1x128xf32> to vector<8x128xf32>
    %126 = arith.addf %122, %125 : vector<8x128xf32>
    %cst_74 = arith.constant 0.000000e+00 : f32
    %127 = vector.broadcast %cst_74 : f32 to vector<8x128xf32>
    %128 = arith.maximumf %126, %127 : vector<8x128xf32>
    %c0_75 = arith.constant 0 : index
    %c0_76 = arith.constant 0 : index
    %c0_77 = arith.constant 0 : index
    %129 = vector.load %arg15[%c0_75, %c0_76, %c0_77] : memref<2x128x128xf32, #tpu.memory_space<vmem>>, vector<1x128x128xf32>
    %130 = vector.shape_cast %129 : vector<1x128x128xf32> to vector<128x128xf32>
    %cst_78 = arith.constant dense<0.000000e+00> : vector<8x128xf32>
    %131 = tpu.matmul %128, %130, %cst_78 {dimension_numbers = #tpu.dot_dimension_numbers<[1], [0], [0], [1], [0, 0, 1, 1], [], []>} : vector<8x128xf32>, vector<128x128xf32>, vector<8x128xf32> -> vector<8x128xf32>
    %c0_79 = arith.constant 0 : index
    %c0_80 = arith.constant 0 : index
    %c0_81 = arith.constant 0 : index
    %132 = vector.load %arg16[%c0_79, %c0_80, %c0_81] : memref<2x1x128xf32, #tpu.memory_space<vmem>>, vector<1x1x128xf32>
    %133 = vector.shape_cast %132 : vector<1x1x128xf32> to vector<1x128xf32>
    %134 = vector.broadcast %133 : vector<1x128xf32> to vector<8x128xf32>
    %135 = arith.addf %131, %134 : vector<8x128xf32>
    %136 = arith.addf %119, %135 : vector<8x128xf32>
    %c0_82 = arith.constant 0 : index
    %c0_83 = arith.constant 0 : index
    %c0_84 = arith.constant 0 : index
    %137 = vector.load %arg19[%c0_82, %c0_83, %c0_84] : memref<2x1x128xf32, #tpu.memory_space<vmem>>, vector<1x1x128xf32>
    %138 = vector.shape_cast %137 : vector<1x1x128xf32> to vector<1x128xf32>
    %c0_85 = arith.constant 0 : index
    %c0_86 = arith.constant 0 : index
    %c0_87 = arith.constant 0 : index
    %139 = vector.load %arg20[%c0_85, %c0_86, %c0_87] : memref<2x1x128xf32, #tpu.memory_space<vmem>>, vector<1x1x128xf32>
    %140 = vector.shape_cast %139 : vector<1x1x128xf32> to vector<1x128xf32>
    %141 = vector.broadcast %4 : vector<1x128xf32> to vector<8x128xf32>
    %142 = arith.mulf %136, %141 : vector<8x128xf32>
    %cst_88 = arith.constant dense<0.000000e+00> : vector<8xf32>
    %143 = vector.multi_reduction <add>, %142, %cst_88 [1] : vector<8x128xf32> to vector<8xf32>
    %144 = vector.shape_cast %143 : vector<8xf32> to vector<8x1xf32>
    %cst_89 = arith.constant 3.125000e-02 : f32
    %145 = vector.broadcast %cst_89 : f32 to vector<8x1xf32>
    %146 = arith.mulf %144, %145 : vector<8x1xf32>
    %147 = vector.broadcast %146 : vector<8x1xf32> to vector<8x128xf32>
    %148 = arith.subf %136, %147 : vector<8x128xf32>
    %149 = vector.broadcast %4 : vector<1x128xf32> to vector<8x128xf32>
    %150 = arith.mulf %148, %149 : vector<8x128xf32>
    %151 = arith.mulf %150, %150 : vector<8x128xf32>
    %cst_90 = arith.constant dense<0.000000e+00> : vector<8xf32>
    %152 = vector.multi_reduction <add>, %151, %cst_90 [1] : vector<8x128xf32> to vector<8xf32>
    %153 = vector.shape_cast %152 : vector<8xf32> to vector<8x1xf32>
    %cst_91 = arith.constant 3.125000e-02 : f32
    %154 = vector.broadcast %cst_91 : f32 to vector<8x1xf32>
    %155 = arith.mulf %153, %154 : vector<8x1xf32>
    %cst_92 = arith.constant 9.99999974E-6 : f32
    %156 = vector.broadcast %cst_92 : f32 to vector<8x1xf32>
    %157 = arith.addf %155, %156 : vector<8x1xf32>
    %158 = math.rsqrt %157 : vector<8x1xf32>
    %159 = vector.broadcast %158 : vector<8x1xf32> to vector<8x128xf32>
    %160 = arith.mulf %150, %159 : vector<8x128xf32>
    %161 = vector.broadcast %138 : vector<1x128xf32> to vector<8x128xf32>
    %162 = arith.mulf %160, %161 : vector<8x128xf32>
    %163 = vector.broadcast %140 : vector<1x128xf32> to vector<8x128xf32>
    %164 = arith.addf %162, %163 : vector<8x128xf32>
    %165 = vector.shape_cast %164 : vector<8x128xf32> to vector<1x8x128xf32>
    %166 = vector.shape_cast %165 : vector<1x8x128xf32> to vector<1x8x128xf32>
    %167 = vector.broadcast %166 : vector<1x8x128xf32> to vector<4x8x128xf32>
    %c1 = arith.constant 1 : index
    %c0_93 = arith.constant 0 : index
    %c0_94 = arith.constant 0 : index
    %c0_95 = arith.constant 0 : index
    %168 = vector.load %arg5[%c1, %c0_93, %c0_94, %c0_95] : memref<2x4x128x128xf32, #tpu.memory_space<vmem>>, vector<1x4x128x128xf32>
    %169 = vector.shape_cast %168 : vector<1x4x128x128xf32> to vector<4x128x128xf32>
    "tpu.trace_start"() <{level = 10 : i32, message = "bse,bed->bsd"}> : () -> ()
    %cst_96 = arith.constant dense<0.000000e+00> : vector<4x8x128xf32>
    %170 = tpu.matmul %167, %169, %cst_96 {dimension_numbers = #tpu.dot_dimension_numbers<[2], [1], [1], [2], [0, 0, 0, 1, 1, 2], [0], [0]>} : vector<4x8x128xf32>, vector<4x128x128xf32>, vector<4x8x128xf32> -> vector<4x8x128xf32>
    "tpu.trace_stop"() : () -> ()
    %c1_97 = arith.constant 1 : index
    %c0_98 = arith.constant 0 : index
    %c0_99 = arith.constant 0 : index
    %c0_100 = arith.constant 0 : index
    %171 = vector.load %arg6[%c1_97, %c0_98, %c0_99, %c0_100] : memref<2x4x1x128xf32, #tpu.memory_space<vmem>>, vector<1x4x1x128xf32>
    %172 = vector.shape_cast %171 : vector<1x4x1x128xf32> to vector<4x1x128xf32>
    %173 = vector.broadcast %172 : vector<4x1x128xf32> to vector<4x8x128xf32>
    %174 = arith.addf %170, %173 : vector<4x8x128xf32>
    %c1_101 = arith.constant 1 : index
    %c0_102 = arith.constant 0 : index
    %c0_103 = arith.constant 0 : index
    %c0_104 = arith.constant 0 : index
    %175 = vector.load %arg7[%c1_101, %c0_102, %c0_103, %c0_104] : memref<2x4x128x128xf32, #tpu.memory_space<vmem>>, vector<1x4x128x128xf32>
    %176 = vector.shape_cast %175 : vector<1x4x128x128xf32> to vector<4x128x128xf32>
    "tpu.trace_start"() <{level = 10 : i32, message = "bse,bed->bsd"}> : () -> ()
    %cst_105 = arith.constant dense<0.000000e+00> : vector<4x8x128xf32>
    %177 = tpu.matmul %167, %176, %cst_105 {dimension_numbers = #tpu.dot_dimension_numbers<[2], [1], [1], [2], [0, 0, 0, 1, 1, 2], [0], [0]>} : vector<4x8x128xf32>, vector<4x128x128xf32>, vector<4x8x128xf32> -> vector<4x8x128xf32>
    "tpu.trace_stop"() : () -> ()
    %c1_106 = arith.constant 1 : index
    %c0_107 = arith.constant 0 : index
    %c0_108 = arith.constant 0 : index
    %c0_109 = arith.constant 0 : index
    %178 = vector.load %arg8[%c1_106, %c0_107, %c0_108, %c0_109] : memref<2x4x1x128xf32, #tpu.memory_space<vmem>>, vector<1x4x1x128xf32>
    %179 = vector.shape_cast %178 : vector<1x4x1x128xf32> to vector<4x1x128xf32>
    %180 = vector.broadcast %179 : vector<4x1x128xf32> to vector<4x8x128xf32>
    %181 = arith.addf %177, %180 : vector<4x8x128xf32>
    %c1_110 = arith.constant 1 : index
    %c0_111 = arith.constant 0 : index
    %c0_112 = arith.constant 0 : index
    %c0_113 = arith.constant 0 : index
    %182 = vector.load %arg9[%c1_110, %c0_111, %c0_112, %c0_113] : memref<2x4x128x128xf32, #tpu.memory_space<vmem>>, vector<1x4x128x128xf32>
    %183 = vector.shape_cast %182 : vector<1x4x128x128xf32> to vector<4x128x128xf32>
    "tpu.trace_start"() <{level = 10 : i32, message = "bse,bed->bsd"}> : () -> ()
    %cst_114 = arith.constant dense<0.000000e+00> : vector<4x8x128xf32>
    %184 = tpu.matmul %167, %183, %cst_114 {dimension_numbers = #tpu.dot_dimension_numbers<[2], [1], [1], [2], [0, 0, 0, 1, 1, 2], [0], [0]>} : vector<4x8x128xf32>, vector<4x128x128xf32>, vector<4x8x128xf32> -> vector<4x8x128xf32>
    "tpu.trace_stop"() : () -> ()
    %c1_115 = arith.constant 1 : index
    %c0_116 = arith.constant 0 : index
    %c0_117 = arith.constant 0 : index
    %c0_118 = arith.constant 0 : index
    %185 = vector.load %arg10[%c1_115, %c0_116, %c0_117, %c0_118] : memref<2x4x1x128xf32, #tpu.memory_space<vmem>>, vector<1x4x1x128xf32>
    %186 = vector.shape_cast %185 : vector<1x4x1x128xf32> to vector<4x1x128xf32>
    %187 = vector.broadcast %186 : vector<4x1x128xf32> to vector<4x8x128xf32>
    %188 = arith.addf %184, %187 : vector<4x8x128xf32>
    "tpu.trace_start"() <{level = 10 : i32, message = "bqd,bkd->bqk"}> : () -> ()
    %cst_119 = arith.constant dense<0.000000e+00> : vector<4x8x8xf32>
    %189 = tpu.matmul %174, %181, %cst_119 {dimension_numbers = #tpu.dot_dimension_numbers<[2], [2], [1], [1], [0, 0, 0, 1, 1, 1], [0], [0]>} : vector<4x8x128xf32>, vector<4x8x128xf32>, vector<4x8x8xf32> -> vector<4x8x8xf32>
    "tpu.trace_stop"() : () -> ()
    %190 = vector.broadcast %16 : vector<1x8x8xf32> to vector<4x8x8xf32>
    %191 = arith.addf %189, %190 : vector<4x8x8xf32>
    %cst_120 = arith.constant dense<0xFF800000> : vector<4x8xf32>
    %192 = vector.multi_reduction <maximumf>, %191, %cst_120 [2] : vector<4x8x8xf32> to vector<4x8xf32>
    %193 = vector.shape_cast %192 : vector<4x8xf32> to vector<4x8x1xf32>
    %194 = vector.broadcast %193 : vector<4x8x1xf32> to vector<4x8x8xf32>
    %195 = arith.subf %191, %194 : vector<4x8x8xf32>
    %196 = math.exp %195 : vector<4x8x8xf32>
    %cst_121 = arith.constant dense<0.000000e+00> : vector<4x8xf32>
    %197 = vector.multi_reduction <add>, %196, %cst_121 [2] : vector<4x8x8xf32> to vector<4x8xf32>
    %198 = vector.shape_cast %197 : vector<4x8xf32> to vector<4x8x1xf32>
    %199 = tpu.reciprocal %198 {approx = true} : vector<4x8x1xf32> -> vector<4x8x1xf32>
    %200 = vector.broadcast %199 : vector<4x8x1xf32> to vector<4x8x8xf32>
    %201 = arith.mulf %196, %200 : vector<4x8x8xf32>
    "tpu.trace_start"() <{level = 10 : i32, message = "bqk,bkd->bqd"}> : () -> ()
    %cst_122 = arith.constant dense<0.000000e+00> : vector<4x8x128xf32>
    %202 = tpu.matmul %201, %188, %cst_122 {dimension_numbers = #tpu.dot_dimension_numbers<[2], [1], [1], [2], [0, 0, 0, 1, 1, 2], [0], [0]>} : vector<4x8x8xf32>, vector<4x8x128xf32>, vector<4x8x128xf32> -> vector<4x8x128xf32>
    "tpu.trace_stop"() : () -> ()
    %c1_123 = arith.constant 1 : index
    %c0_124 = arith.constant 0 : index
    %c0_125 = arith.constant 0 : index
    %c0_126 = arith.constant 0 : index
    %203 = vector.load %arg11[%c1_123, %c0_124, %c0_125, %c0_126] : memref<2x4x128x128xf32, #tpu.memory_space<vmem>>, vector<1x4x128x128xf32>
    %204 = vector.shape_cast %203 : vector<1x4x128x128xf32> to vector<4x128x128xf32>
    "tpu.trace_start"() <{level = 10 : i32, message = "bsd,bde->bse"}> : () -> ()
    %cst_127 = arith.constant dense<0.000000e+00> : vector<4x8x128xf32>
    %205 = tpu.matmul %202, %204, %cst_127 {dimension_numbers = #tpu.dot_dimension_numbers<[2], [1], [1], [2], [0, 0, 0, 1, 1, 2], [0], [0]>} : vector<4x8x128xf32>, vector<4x128x128xf32>, vector<4x8x128xf32> -> vector<4x8x128xf32>
    "tpu.trace_stop"() : () -> ()
    %cst_128 = arith.constant dense<0.000000e+00> : vector<8x128xf32>
    %206 = vector.multi_reduction <add>, %205, %cst_128 [0] : vector<4x8x128xf32> to vector<8x128xf32>
    %c1_129 = arith.constant 1 : index
    %c0_130 = arith.constant 0 : index
    %c0_131 = arith.constant 0 : index
    %207 = vector.load %arg12[%c1_129, %c0_130, %c0_131] : memref<2x1x128xf32, #tpu.memory_space<vmem>>, vector<1x1x128xf32>
    %208 = vector.shape_cast %207 : vector<1x1x128xf32> to vector<1x128xf32>
    %209 = vector.broadcast %208 : vector<1x128xf32> to vector<8x128xf32>
    %210 = arith.addf %206, %209 : vector<8x128xf32>
    %211 = arith.addf %164, %210 : vector<8x128xf32>
    %c1_132 = arith.constant 1 : index
    %c0_133 = arith.constant 0 : index
    %c0_134 = arith.constant 0 : index
    %212 = vector.load %arg17[%c1_132, %c0_133, %c0_134] : memref<2x1x128xf32, #tpu.memory_space<vmem>>, vector<1x1x128xf32>
    %213 = vector.shape_cast %212 : vector<1x1x128xf32> to vector<1x128xf32>
    %c1_135 = arith.constant 1 : index
    %c0_136 = arith.constant 0 : index
    %c0_137 = arith.constant 0 : index
    %214 = vector.load %arg18[%c1_135, %c0_136, %c0_137] : memref<2x1x128xf32, #tpu.memory_space<vmem>>, vector<1x1x128xf32>
    %215 = vector.shape_cast %214 : vector<1x1x128xf32> to vector<1x128xf32>
    %216 = vector.broadcast %4 : vector<1x128xf32> to vector<8x128xf32>
    %217 = arith.mulf %211, %216 : vector<8x128xf32>
    %cst_138 = arith.constant dense<0.000000e+00> : vector<8xf32>
    %218 = vector.multi_reduction <add>, %217, %cst_138 [1] : vector<8x128xf32> to vector<8xf32>
    %219 = vector.shape_cast %218 : vector<8xf32> to vector<8x1xf32>
    %cst_139 = arith.constant 3.125000e-02 : f32
    %220 = vector.broadcast %cst_139 : f32 to vector<8x1xf32>
    %221 = arith.mulf %219, %220 : vector<8x1xf32>
    %222 = vector.broadcast %221 : vector<8x1xf32> to vector<8x128xf32>
    %223 = arith.subf %211, %222 : vector<8x128xf32>
    %224 = vector.broadcast %4 : vector<1x128xf32> to vector<8x128xf32>
    %225 = arith.mulf %223, %224 : vector<8x128xf32>
    %226 = arith.mulf %225, %225 : vector<8x128xf32>
    %cst_140 = arith.constant dense<0.000000e+00> : vector<8xf32>
    %227 = vector.multi_reduction <add>, %226, %cst_140 [1] : vector<8x128xf32> to vector<8xf32>
    %228 = vector.shape_cast %227 : vector<8xf32> to vector<8x1xf32>
    %cst_141 = arith.constant 3.125000e-02 : f32
    %229 = vector.broadcast %cst_141 : f32 to vector<8x1xf32>
    %230 = arith.mulf %228, %229 : vector<8x1xf32>
    %cst_142 = arith.constant 9.99999974E-6 : f32
    %231 = vector.broadcast %cst_142 : f32 to vector<8x1xf32>
    %232 = arith.addf %230, %231 : vector<8x1xf32>
    %233 = math.rsqrt %232 : vector<8x1xf32>
    %234 = vector.broadcast %233 : vector<8x1xf32> to vector<8x128xf32>
    %235 = arith.mulf %225, %234 : vector<8x128xf32>
    %236 = vector.broadcast %213 : vector<1x128xf32> to vector<8x128xf32>
    %237 = arith.mulf %235, %236 : vector<8x128xf32>
    %238 = vector.broadcast %215 : vector<1x128xf32> to vector<8x128xf32>
    %239 = arith.addf %237, %238 : vector<8x128xf32>
    %c1_143 = arith.constant 1 : index
    %c0_144 = arith.constant 0 : index
    %c0_145 = arith.constant 0 : index
    %240 = vector.load %arg13[%c1_143, %c0_144, %c0_145] : memref<2x128x128xf32, #tpu.memory_space<vmem>>, vector<1x128x128xf32>
    %241 = vector.shape_cast %240 : vector<1x128x128xf32> to vector<128x128xf32>
    %cst_146 = arith.constant dense<0.000000e+00> : vector<8x128xf32>
    %242 = tpu.matmul %239, %241, %cst_146 {dimension_numbers = #tpu.dot_dimension_numbers<[1], [0], [0], [1], [0, 0, 1, 1], [], []>} : vector<8x128xf32>, vector<128x128xf32>, vector<8x128xf32> -> vector<8x128xf32>
    %c1_147 = arith.constant 1 : index
    %c0_148 = arith.constant 0 : index
    %c0_149 = arith.constant 0 : index
    %243 = vector.load %arg14[%c1_147, %c0_148, %c0_149] : memref<2x1x128xf32, #tpu.memory_space<vmem>>, vector<1x1x128xf32>
    %244 = vector.shape_cast %243 : vector<1x1x128xf32> to vector<1x128xf32>
    %245 = vector.broadcast %244 : vector<1x128xf32> to vector<8x128xf32>
    %246 = arith.addf %242, %245 : vector<8x128xf32>
    %cst_150 = arith.constant 0.000000e+00 : f32
    %247 = vector.broadcast %cst_150 : f32 to vector<8x128xf32>
    %248 = arith.maximumf %246, %247 : vector<8x128xf32>
    %c1_151 = arith.constant 1 : index
    %c0_152 = arith.constant 0 : index
    %c0_153 = arith.constant 0 : index
    %249 = vector.load %arg15[%c1_151, %c0_152, %c0_153] : memref<2x128x128xf32, #tpu.memory_space<vmem>>, vector<1x128x128xf32>
    %250 = vector.shape_cast %249 : vector<1x128x128xf32> to vector<128x128xf32>
    %cst_154 = arith.constant dense<0.000000e+00> : vector<8x128xf32>
    %251 = tpu.matmul %248, %250, %cst_154 {dimension_numbers = #tpu.dot_dimension_numbers<[1], [0], [0], [1], [0, 0, 1, 1], [], []>} : vector<8x128xf32>, vector<128x128xf32>, vector<8x128xf32> -> vector<8x128xf32>
    %c1_155 = arith.constant 1 : index
    %c0_156 = arith.constant 0 : index
    %c0_157 = arith.constant 0 : index
    %252 = vector.load %arg16[%c1_155, %c0_156, %c0_157] : memref<2x1x128xf32, #tpu.memory_space<vmem>>, vector<1x1x128xf32>
    %253 = vector.shape_cast %252 : vector<1x1x128xf32> to vector<1x128xf32>
    %254 = vector.broadcast %253 : vector<1x128xf32> to vector<8x128xf32>
    %255 = arith.addf %251, %254 : vector<8x128xf32>
    %256 = arith.addf %239, %255 : vector<8x128xf32>
    %c1_158 = arith.constant 1 : index
    %c0_159 = arith.constant 0 : index
    %c0_160 = arith.constant 0 : index
    %257 = vector.load %arg19[%c1_158, %c0_159, %c0_160] : memref<2x1x128xf32, #tpu.memory_space<vmem>>, vector<1x1x128xf32>
    %258 = vector.shape_cast %257 : vector<1x1x128xf32> to vector<1x128xf32>
    %c1_161 = arith.constant 1 : index
    %c0_162 = arith.constant 0 : index
    %c0_163 = arith.constant 0 : index
    %259 = vector.load %arg20[%c1_161, %c0_162, %c0_163] : memref<2x1x128xf32, #tpu.memory_space<vmem>>, vector<1x1x128xf32>
    %260 = vector.shape_cast %259 : vector<1x1x128xf32> to vector<1x128xf32>
    %261 = vector.broadcast %4 : vector<1x128xf32> to vector<8x128xf32>
    %262 = arith.mulf %256, %261 : vector<8x128xf32>
    %cst_164 = arith.constant dense<0.000000e+00> : vector<8xf32>
    %263 = vector.multi_reduction <add>, %262, %cst_164 [1] : vector<8x128xf32> to vector<8xf32>
    %264 = vector.shape_cast %263 : vector<8xf32> to vector<8x1xf32>
    %cst_165 = arith.constant 3.125000e-02 : f32
    %265 = vector.broadcast %cst_165 : f32 to vector<8x1xf32>
    %266 = arith.mulf %264, %265 : vector<8x1xf32>
    %267 = vector.broadcast %266 : vector<8x1xf32> to vector<8x128xf32>
    %268 = arith.subf %256, %267 : vector<8x128xf32>
    %269 = vector.broadcast %4 : vector<1x128xf32> to vector<8x128xf32>
    %270 = arith.mulf %268, %269 : vector<8x128xf32>
    %271 = arith.mulf %270, %270 : vector<8x128xf32>
    %cst_166 = arith.constant dense<0.000000e+00> : vector<8xf32>
    %272 = vector.multi_reduction <add>, %271, %cst_166 [1] : vector<8x128xf32> to vector<8xf32>
    %273 = vector.shape_cast %272 : vector<8xf32> to vector<8x1xf32>
    %cst_167 = arith.constant 3.125000e-02 : f32
    %274 = vector.broadcast %cst_167 : f32 to vector<8x1xf32>
    %275 = arith.mulf %273, %274 : vector<8x1xf32>
    %cst_168 = arith.constant 9.99999974E-6 : f32
    %276 = vector.broadcast %cst_168 : f32 to vector<8x1xf32>
    %277 = arith.addf %275, %276 : vector<8x1xf32>
    %278 = math.rsqrt %277 : vector<8x1xf32>
    %279 = vector.broadcast %278 : vector<8x1xf32> to vector<8x128xf32>
    %280 = arith.mulf %270, %279 : vector<8x128xf32>
    %281 = vector.broadcast %258 : vector<1x128xf32> to vector<8x128xf32>
    %282 = arith.mulf %280, %281 : vector<8x128xf32>
    %283 = vector.broadcast %260 : vector<1x128xf32> to vector<8x128xf32>
    %284 = arith.addf %282, %283 : vector<8x128xf32>
    %c0_169 = arith.constant 0 : index
    %c0_170 = arith.constant 0 : index
    %285 = vector.load %arg21[%c0_169, %c0_170] : memref<1x128xf32, #tpu.memory_space<vmem>>, vector<1x128xf32>
    %c0_171 = arith.constant 0 : index
    %c0_172 = arith.constant 0 : index
    %286 = vector.load %arg22[%c0_171, %c0_172] : memref<1x128xf32, #tpu.memory_space<vmem>>, vector<1x128xf32>
    %287 = vector.broadcast %4 : vector<1x128xf32> to vector<8x128xf32>
    %288 = arith.mulf %284, %287 : vector<8x128xf32>
    %cst_173 = arith.constant dense<0.000000e+00> : vector<8xf32>
    %289 = vector.multi_reduction <add>, %288, %cst_173 [1] : vector<8x128xf32> to vector<8xf32>
    %290 = vector.shape_cast %289 : vector<8xf32> to vector<8x1xf32>
    %cst_174 = arith.constant 3.125000e-02 : f32
    %291 = vector.broadcast %cst_174 : f32 to vector<8x1xf32>
    %292 = arith.mulf %290, %291 : vector<8x1xf32>
    %293 = vector.broadcast %292 : vector<8x1xf32> to vector<8x128xf32>
    %294 = arith.subf %284, %293 : vector<8x128xf32>
    %295 = vector.broadcast %4 : vector<1x128xf32> to vector<8x128xf32>
    %296 = arith.mulf %294, %295 : vector<8x128xf32>
    %297 = arith.mulf %296, %296 : vector<8x128xf32>
    %cst_175 = arith.constant dense<0.000000e+00> : vector<8xf32>
    %298 = vector.multi_reduction <add>, %297, %cst_175 [1] : vector<8x128xf32> to vector<8xf32>
    %299 = vector.shape_cast %298 : vector<8xf32> to vector<8x1xf32>
    %cst_176 = arith.constant 3.125000e-02 : f32
    %300 = vector.broadcast %cst_176 : f32 to vector<8x1xf32>
    %301 = arith.mulf %299, %300 : vector<8x1xf32>
    %cst_177 = arith.constant 9.99999974E-6 : f32
    %302 = vector.broadcast %cst_177 : f32 to vector<8x1xf32>
    %303 = arith.addf %301, %302 : vector<8x1xf32>
    %304 = math.rsqrt %303 : vector<8x1xf32>
    %305 = vector.broadcast %304 : vector<8x1xf32> to vector<8x128xf32>
    %306 = arith.mulf %296, %305 : vector<8x128xf32>
    %307 = vector.broadcast %285 : vector<1x128xf32> to vector<8x128xf32>
    %308 = arith.mulf %306, %307 : vector<8x128xf32>
    %309 = vector.broadcast %286 : vector<1x128xf32> to vector<8x128xf32>
    %310 = arith.addf %308, %309 : vector<8x128xf32>
    %c0_178 = arith.constant 0 : index
    %c0_179 = arith.constant 0 : index
    %311 = vector.load %arg23[%c0_178, %c0_179] : memref<128x128xf32, #tpu.memory_space<vmem>>, vector<128x128xf32>
    %cst_180 = arith.constant dense<0.000000e+00> : vector<8x128xf32>
    %312 = tpu.matmul %310, %311, %cst_180 {dimension_numbers = #tpu.dot_dimension_numbers<[1], [0], [0], [1], [0, 0, 1, 1], [], []>} : vector<8x128xf32>, vector<128x128xf32>, vector<8x128xf32> -> vector<8x128xf32>
    %c0_181 = arith.constant 0 : index
    %c0_182 = arith.constant 0 : index
    %313 = vector.load %arg24[%c0_181, %c0_182] : memref<1x128xf32, #tpu.memory_space<vmem>>, vector<1x128xf32>
    %314 = vector.broadcast %313 : vector<1x128xf32> to vector<8x128xf32>
    %315 = arith.addf %312, %314 : vector<8x128xf32>
    %316 = vector.shape_cast %315 : vector<8x128xf32> to vector<1x8x128xf32>
    %c0_183 = arith.constant 0 : index
    %c0_184 = arith.constant 0 : index
    %c0_185 = arith.constant 0 : index
    %317 = vector.load %arg25[%c0_183, %c0_184, %c0_185] : memref<1x8x128xf32, #tpu.memory_space<vmem>>, vector<1x8x128xf32>
    tpu.vector_store %arg25[%c0_183, %c0_184, %c0_185], %316 {strides = array<i32>} : memref<1x8x128xf32, #tpu.memory_space<vmem>>, vector<1x8x128xf32>,
    return
  }
  func.func @transform_0(%arg0: i32) -> (i32, i32, i32) {
    %c0_i32 = arith.constant 0 : i32
    %c0_i32_0 = arith.constant 0 : i32
    %c0_i32_1 = arith.constant 0 : i32
    return %arg0, %c0_i32, %c0_i32_0 : i32, i32, i32
  }
  func.func @transform_1(%arg0: i32) -> (i32, i32, i32) {
    %c0_i32 = arith.constant 0 : i32
    %c0_i32_0 = arith.constant 0 : i32
    %c0_i32_1 = arith.constant 0 : i32
    return %arg0, %c0_i32, %c0_i32_0 : i32, i32, i32
  }
  func.func @transform_2(%arg0: i32) -> (i32, i32) {
    %c0_i32 = arith.constant 0 : i32
    %c0_i32_0 = arith.constant 0 : i32
    %c0_i32_1 = arith.constant 0 : i32
    return %c0_i32, %c0_i32_0 : i32, i32
  }
  func.func @transform_3(%arg0: i32) -> (i32, i32) {
    %c0_i32 = arith.constant 0 : i32
    %c0_i32_0 = arith.constant 0 : i32
    %c0_i32_1 = arith.constant 0 : i32
    return %c0_i32, %c0_i32_0 : i32, i32
  }
  func.func @transform_4(%arg0: i32) -> (i32, i32, i32, i32) {
    %c0_i32 = arith.constant 0 : i32
    %c0_i32_0 = arith.constant 0 : i32
    %c0_i32_1 = arith.constant 0 : i32
    %c0_i32_2 = arith.constant 0 : i32
    %c0_i32_3 = arith.constant 0 : i32
    return %c0_i32, %c0_i32_0, %c0_i32_1, %c0_i32_2 : i32, i32, i32, i32
  }
  func.func @transform_5(%arg0: i32) -> (i32, i32, i32, i32) {
    %c0_i32 = arith.constant 0 : i32
    %c0_i32_0 = arith.constant 0 : i32
    %c0_i32_1 = arith.constant 0 : i32
    %c0_i32_2 = arith.constant 0 : i32
    %c0_i32_3 = arith.constant 0 : i32
    return %c0_i32, %c0_i32_0, %c0_i32_1, %c0_i32_2 : i32, i32, i32, i32
  }
  func.func @transform_6(%arg0: i32) -> (i32, i32, i32, i32) {
    %c0_i32 = arith.constant 0 : i32
    %c0_i32_0 = arith.constant 0 : i32
    %c0_i32_1 = arith.constant 0 : i32
    %c0_i32_2 = arith.constant 0 : i32
    %c0_i32_3 = arith.constant 0 : i32
    return %c0_i32, %c0_i32_0, %c0_i32_1, %c0_i32_2 : i32, i32, i32, i32
  }
  func.func @transform_7(%arg0: i32) -> (i32, i32, i32, i32) {
    %c0_i32 = arith.constant 0 : i32
    %c0_i32_0 = arith.constant 0 : i32
    %c0_i32_1 = arith.constant 0 : i32
    %c0_i32_2 = arith.constant 0 : i32
    %c0_i32_3 = arith.constant 0 : i32
    return %c0_i32, %c0_i32_0, %c0_i32_1, %c0_i32_2 : i32, i32, i32, i32
  }
  func.func @transform_8(%arg0: i32) -> (i32, i32, i32, i32) {
    %c0_i32 = arith.constant 0 : i32
    %c0_i32_0 = arith.constant 0 : i32
    %c0_i32_1 = arith.constant 0 : i32
    %c0_i32_2 = arith.constant 0 : i32
    %c0_i32_3 = arith.constant 0 : i32
    return %c0_i32, %c0_i32_0, %c0_i32_1, %c0_i32_2 : i32, i32, i32, i32
  }
  func.func @transform_9(%arg0: i32) -> (i32, i32, i32, i32) {
    %c0_i32 = arith.constant 0 : i32
    %c0_i32_0 = arith.constant 0 : i32
    %c0_i32_1 = arith.constant 0 : i32
    %c0_i32_2 = arith.constant 0 : i32
    %c0_i32_3 = arith.constant 0 : i32
    return %c0_i32, %c0_i32_0, %c0_i32_1, %c0_i32_2 : i32, i32, i32, i32
  }
  func.func @transform_10(%arg0: i32) -> (i32, i32, i32, i32) {
    %c0_i32 = arith.constant 0 : i32
    %c0_i32_0 = arith.constant 0 : i32
    %c0_i32_1 = arith.constant 0 : i32
    %c0_i32_2 = arith.constant 0 : i32
    %c0_i32_3 = arith.constant 0 : i32
    return %c0_i32, %c0_i32_0, %c0_i32_1, %c0_i32_2 : i32, i32, i32, i32
  }
  func.func @transform_11(%arg0: i32) -> (i32, i32, i32) {
    %c0_i32 = arith.constant 0 : i32
    %c0_i32_0 = arith.constant 0 : i32
    %c0_i32_1 = arith.constant 0 : i32
    %c0_i32_2 = arith.constant 0 : i32
    return %c0_i32, %c0_i32_0, %c0_i32_1 : i32, i32, i32
  }
  func.func @transform_12(%arg0: i32) -> (i32, i32, i32) {
    %c0_i32 = arith.constant 0 : i32
    %c0_i32_0 = arith.constant 0 : i32
    %c0_i32_1 = arith.constant 0 : i32
    %c0_i32_2 = arith.constant 0 : i32
    return %c0_i32, %c0_i32_0, %c0_i32_1 : i32, i32, i32
  }
  func.func @transform_13(%arg0: i32) -> (i32, i32, i32) {
    %c0_i32 = arith.constant 0 : i32
    %c0_i32_0 = arith.constant 0 : i32
    %c0_i32_1 = arith.constant 0 : i32
    %c0_i32_2 = arith.constant 0 : i32
    return %c0_i32, %c0_i32_0, %c0_i32_1 : i32, i32, i32
  }
  func.func @transform_14(%arg0: i32) -> (i32, i32, i32) {
    %c0_i32 = arith.constant 0 : i32
    %c0_i32_0 = arith.constant 0 : i32
    %c0_i32_1 = arith.constant 0 : i32
    %c0_i32_2 = arith.constant 0 : i32
    return %c0_i32, %c0_i32_0, %c0_i32_1 : i32, i32, i32
  }
  func.func @transform_15(%arg0: i32) -> (i32, i32, i32) {
    %c0_i32 = arith.constant 0 : i32
    %c0_i32_0 = arith.constant 0 : i32
    %c0_i32_1 = arith.constant 0 : i32
    %c0_i32_2 = arith.constant 0 : i32
    return %c0_i32, %c0_i32_0, %c0_i32_1 : i32, i32, i32
  }
  func.func @transform_16(%arg0: i32) -> (i32, i32, i32) {
    %c0_i32 = arith.constant 0 : i32
    %c0_i32_0 = arith.constant 0 : i32
    %c0_i32_1 = arith.constant 0 : i32
    %c0_i32_2 = arith.constant 0 : i32
    return %c0_i32, %c0_i32_0, %c0_i32_1 : i32, i32, i32
  }
  func.func @transform_17(%arg0: i32) -> (i32, i32, i32) {
    %c0_i32 = arith.constant 0 : i32
    %c0_i32_0 = arith.constant 0 : i32
    %c0_i32_1 = arith.constant 0 : i32
    %c0_i32_2 = arith.constant 0 : i32
    return %c0_i32, %c0_i32_0, %c0_i32_1 : i32, i32, i32
  }
  func.func @transform_18(%arg0: i32) -> (i32, i32, i32) {
    %c0_i32 = arith.constant 0 : i32
    %c0_i32_0 = arith.constant 0 : i32
    %c0_i32_1 = arith.constant 0 : i32
    %c0_i32_2 = arith.constant 0 : i32
    return %c0_i32, %c0_i32_0, %c0_i32_1 : i32, i32, i32
  }
  func.func @transform_19(%arg0: i32) -> (i32, i32, i32) {
    %c0_i32 = arith.constant 0 : i32
    %c0_i32_0 = arith.constant 0 : i32
    %c0_i32_1 = arith.constant 0 : i32
    %c0_i32_2 = arith.constant 0 : i32
    return %c0_i32, %c0_i32_0, %c0_i32_1 : i32, i32, i32
  }
  func.func @transform_20(%arg0: i32) -> (i32, i32) {
    %c0_i32 = arith.constant 0 : i32
    %c0_i32_0 = arith.constant 0 : i32
    %c0_i32_1 = arith.constant 0 : i32
    return %c0_i32, %c0_i32_0 : i32, i32
  }
  func.func @transform_21(%arg0: i32) -> (i32, i32) {
    %c0_i32 = arith.constant 0 : i32
    %c0_i32_0 = arith.constant 0 : i32
    %c0_i32_1 = arith.constant 0 : i32
    return %c0_i32, %c0_i32_0 : i32, i32
  }
  func.func @transform_22(%arg0: i32) -> (i32, i32) {
    %c0_i32 = arith.constant 0 : i32
    %c0_i32_0 = arith.constant 0 : i32
    %c0_i32_1 = arith.constant 0 : i32
    return %c0_i32, %c0_i32_0 : i32, i32
  }
  func.func @transform_23(%arg0: i32) -> (i32, i32) {
    %c0_i32 = arith.constant 0 : i32
    %c0_i32_0 = arith.constant 0 : i32
    %c0_i32_1 = arith.constant 0 : i32
    return %c0_i32, %c0_i32_0 : i32, i32
  }
  func.func @transform_24(%arg0: i32) -> (i32, i32, i32) {
    %c0_i32 = arith.constant 0 : i32
    %c0_i32_0 = arith.constant 0 : i32
    %c0_i32_1 = arith.constant 0 : i32
    return %arg0, %c0_i32, %c0_i32_0 : i32, i32, i32
  }
}

</mosaic_0001>

<bundles_post_ra>
// kernel: tpu_custom_call.1
= control target key start
LH: loop header
LB: loop body
LE: loop exit
PB: predicated region body
PF: predicated region fallthrough
CT: control target
= control target key end

     0   :  { %s10727_s0 = inlined_call_operand.hbm [shape: f32[2,8,128], index: 0, kind: input, shape index: {}]   ;;  %s10728_s1 = inlined_call_operand.vmem [shape: f32[2,1,8], index: 1, kind: input, shape index: {}]   ;;  %s10729_s2 = inlined_call_operand.hbm [shape: f32[1,128], index: 2, kind: input, shape index: {}]   ;;  %s10730_s3 = inlined_call_operand.hbm [shape: f32[1,128], index: 3, kind: input, shape index: {}]   ;;  %s10731_s4 = inlined_call_operand.hbm [shape: f32[2,4,128,128], index: 4, kind: input, shape index: {}]   ;;  %s10732_s5 = inlined_call_operand.vmem [shape: f32[2,4,1,128], index: 5, kind: input, shape index: {}]   ;;  %s10733_s6 = inlined_call_operand.hbm [shape: f32[2,4,128,128], index: 6, kind: input, shape index: {}]   ;;  %s10734_s7 = inlined_call_operand.vmem [shape: f32[2,4,1,128], index: 7, kind: input, shape index: {}]   ;;  %s10735_s8 = inlined_call_operand.hbm [shape: f32[2,4,128,128], index: 8, kind: input, shape index: {}]   ;;  %s10736_s9 = inlined_call_operand.vmem [shape: f32[2,4,1,128], index: 9, kind: input, shape index: {}]   ;;  %s10737_s10 = inlined_call_operand.hbm [shape: f32[2,4,128,128], index: 10, kind: input, shape index: {}]   ;;  %s10738_s11 = inlined_call_operand.vmem [shape: f32[2,1,128], index: 11, kind: input, shape index: {}]   ;;  %s10739_s12 = inlined_call_operand.hbm [shape: f32[2,128,128], index: 12, kind: input, shape index: {}]   ;;  %s10740_s13 = inlined_call_operand.vmem [shape: f32[2,1,128], index: 13, kind: input, shape index: {}]   ;;  %s10741_s14 = inlined_call_operand.hbm [shape: f32[2,128,128], index: 14, kind: input, shape index: {}]   ;;  %s10742_s15 = inlined_call_operand.vmem [shape: f32[2,1,128], index: 15, kind: input, shape index: {}]   ;;  %s10743_s16 = inlined_call_operand.vmem [shape: f32[2,1,128], index: 16, kind: input, shape index: {}]   ;;  %s10744_s17 = inlined_call_operand.vmem [shape: f32[2,1,128], index: 17, kind: input, shape index: {}]   ;;  %s10745_s18 = inlined_call_operand.vmem [shape: f32[2,1,128], index: 18, kind: input, shape index: {}]   ;;  %s10746_s19 = inlined_call_operand.vmem [shape: f32[2,1,128], index: 19, kind: input, shape index: {}]   ;;  %s10747_s20 = inlined_call_operand.vmem [shape: f32[1,128], index: 20, kind: input, shape index: {}]   ;;  %s10748_s21 = inlined_call_operand.vmem [shape: f32[1,128], index: 21, kind: input, shape index: {}]   ;;  %s10749_s22 = inlined_call_operand.hbm [shape: f32[128,128], index: 22, kind: input, shape index: {}]   ;;  %s10750_s23 = inlined_call_operand.vmem [shape: f32[1,128], index: 23, kind: input, shape index: {}]   ;;  %s10751_s24 = inlined_call_operand.hbm [shape: f32[2,8,128], index: 24, kind: output, shape index: {}]  }
   0x1   :  { %10781 = sst [smem:[#allocation27_spill]] %s10727_s0 }
   0x2   :  { %10782 = sst [smem:[#allocation28_spill]] %s10728_s1 }
   0x3   :  { %10783 = sst [smem:[#allocation29_spill]] %s10729_s2 }
   0x4   :  { %10784 = sst [smem:[#allocation30_spill]] %s10730_s3 }
   0x5   :  { %10785 = sst [smem:[#allocation31_spill]] %s10731_s4 }
   0x6   :  { %10786 = sst [smem:[#allocation32_spill]] %s10732_s5 }
   0x7   :  { %10787 = sst [smem:[#allocation33_spill]] %s10733_s6 }
   0x8   :  { %10788 = sst [smem:[#allocation34_spill]] %s10734_s7 }
   0x9   :  { %10789 = sst [smem:[#allocation35_spill]] %s10735_s8 }
   0xa   :  { %10790 = sst [smem:[#allocation36_spill]] %s10736_s9 }
   0xb   :  { %10791 = sst [smem:[#allocation37_spill]] %s10737_s10 }
   0xc   :  { %10792 = sst [smem:[#allocation38_spill]] %s10738_s11 }
   0xd   :  { %10793 = sst [smem:[#allocation39_spill]] %s10739_s12 }
   0xe   :  { %10794 = sst [smem:[#allocation40_spill]] %s10740_s13 }
   0xf   :  { %10795 = sst [smem:[#allocation41_spill]] %s10741_s14 }
  0x10   :  { %10796 = sst [smem:[#allocation42_spill]] %s10742_s15 }
  0x11   :  { %10797 = sst [smem:[#allocation43_spill]] %s10744_s17 }
  0x12   :  { %10798 = sst [smem:[#allocation44_spill]] %s10745_s18 }
  0x13   :  { %10799 = sst [smem:[#allocation45_spill]] %s10746_s19 }
  0x14   :  { %10800 = sst [smem:[#allocation46_spill]] %s10747_s20 }
  0x15   :  { %10801 = sst [smem:[#allocation47_spill]] %s10748_s21 }
  0x16   :  { %10802 = sst [smem:[#allocation48_spill]] %s10750_s23 }
  0x17   :  { %10803 = sst [smem:[#allocation49_spill]] %s10751_s24 }
  0x18   :  { %29 = vsyncpa [#allocation3], 0 }
  0x19   :  { %31 = vsyncpa [#allocation3 + $0x1], 0 }
  0x1a   :  { %32 = vsyncpa [#allocation6], 0 }
  0x1b   :  { %33 = vsyncpa [#allocation9], 0 }
  0x1c   :  { %34 = vsyncpa [#allocation12], 0 }
  0x1d   :  { %35 = vsyncpa [#allocation15], 0 }
  0x1e   :  { %36 = vsyncpa [#allocation18], 0 }
  0x1f   :  { %37 = vsyncpa [#allocation4], 0 }
  0x20   :  { %39 = vsyncpa [#allocation4 + $0x1], 0  ;;  %s9653_s5 = smov 0   ;;  %s9655_s26 = smov 0  }
  0x21   :  { %s9657_s27 = smov 0   ;;  %s9659_s28 = smov 0  }
  0x22 LB: > { %s9511_s6 = smov [#allocation5]   ;;  %s9674_s29 = sadd.s32 4294967295, %s9509_s28   ;;  %s9509_s28 = sphi %s9659_s28, %s10855_s28   ;;  %s9505_s27 = sphi %s9657_s27, %s10854_s27   ;;  %s9501_s26 = sphi %s9655_s26, %s10853_s26   ;;  %s9497_s5 = sphi %s9653_s5, %s10852_s5  }
  0x23   : > { %s603_s2 = sshll.u32 %s9511_s6, 4  ;;  %p5930_p0 = scmp.ge.s32.totalorder %s9509_s28, 1  ;;  %s9679_s2 = int_to_ptr.vmem [resolvable:$true] %s603_s2 }
  0x24   : > { %p10768_p1 = scmp.eq.s32.totalorder %s9674_s29, 0  ;;  %p590_p2 = scmp.lt.s32.totalorder %s9509_s28, 3 }
  0x25   : > { %s9512_s7 = smov [#allocation8]   ;;  %s9513_s25 = smov [#allocation11]  }
  0x26   : > { %p9681_p3 = pnand %p5930_p0, %p590_p2  ;;  %s624_s30 = sshll.u32 %s9512_s7, 4  ;;  %s9688_s30 = int_to_ptr.vmem [resolvable:$true] %s624_s30 }
  0x27   : > { %s656_s8 = sshll.u32 %s9513_s25, 4  ;;  %s10806_s6 = sld [smem:[#allocation29_spill]]  ;;  %s9696_s8 = int_to_ptr.vmem [resolvable:$true] %s656_s8 }
  0x28   : > { %s10804_s0 = scalar_select %p9681_p3, 1, 0 }
  0x29   : > { %p8994_p5 = pneg %p9681_p3 }
  0x2b   : > { %p9692_p6 = pnand %p8994_p5, %p10768_p1 }
  0x2d   : > { %s9141_s24 = scalar_lea.hbm %s10806_s6, 16  ;;  %p9706_p8 = pneg %p9692_p6 }
  0x2e   : > { %p9142_p7 = scmp.ne.s32.totalorder %s10806_s6, %s9141_s24  ;;  %p9148_p11 = scmp.lt.u32.totalorder %s9141_s24, %s10806_s6 }
  0x30   : > { %p9144_p9 = pnand %p9706_p8, %p9142_p7 }
  0x32   : > { %p9145_p10 = pneg %p9144_p9 }
  0x34   : > { %p9150_p12 = pnand %p9148_p11, %p9145_p10 }
  0x36   : > { %9153 = shalt.err (!%p9150_p12)
}
  0x37   : > { %s9154_s21 = scalar_lea.vmem %s9679_s2, 16  ;;  %s9161_s23 = scalar_lea.vmem %s9679_s2, 32 }
  0x38   : > { %p9155_p13 = scmp.ne.s32.totalorder %s9679_s2, %s9154_s21  ;;  %p9162_p5 = scmp.lt.s32.totalorder %s9679_s2, %s9679_s2 }
  0x39   : > { %p9163_p7 = scmp.lt.s32.totalorder %s9161_s23, %s9154_s21 }
  0x3a   : > { %p9157_p0 = pnand %p9155_p13, %p9706_p8 }
  0x3b   : > { %p9164_p9 = por %p9163_p7, %p9162_p5 }
  0x3c   : > { %p9158_p2 = pneg %p9157_p0 }
  0x3e   : > { %p9165_p4 = pnand %p9164_p9, %p9158_p2 }
  0x40   : > { %9168 = shalt.err (!%p9165_p4)
}
  0x41   : > { %8997 = dma.hbm_to_vmem [thread:$0]  (!%p9692_p6), %s10806_s6, 16, %s9679_s2, [#allocation6]  }
  0x42   : > { %s10808_s25 = sld [smem:[#allocation31_spill]] }
  0x48   : > { %s9169_s19 = scalar_lea.hbm %s10808_s25, 16384 }
  0x49   : > { %p9170_p10 = scmp.ne.s32.totalorder %s10808_s25, %s9169_s19  ;;  %p9176_p4 = scmp.lt.u32.totalorder %s9169_s19, %s10808_s25 }
  0x4b   : > { %p9172_p11 = pnand %p9170_p10, %p9706_p8 }
  0x4d   : > { %p9173_p12 = pneg %p9172_p11 }
  0x4f   : > { %p9178_p13 = pnand %p9176_p4, %p9173_p12 }
  0x51   : > { %9181 = shalt.err (!%p9178_p13)
}
  0x52   : > { %s9182_s2 = scalar_lea.vmem %s9688_s30, 16384  ;;  %p9190_p7 = scmp.lt.s32.totalorder %s9688_s30, %s9688_s30 }
  0x53   : > { %p9183_p0 = scmp.ne.s32.totalorder %s9688_s30, %s9182_s2  ;;  %p9191_p9 = scmp.lt.s32.totalorder %s9182_s2, %s9182_s2 }
  0x55   : > { %p9185_p2 = pnand %p9183_p0, %p9706_p8  ;;  %p9192_p10 = por %p9191_p9, %p9190_p7 }
  0x57   : > { %p9186_p5 = pneg %p9185_p2 }
  0x59   : > { %p9193_p11 = pnand %p9192_p10, %p9186_p5 }
  0x5b   : > { %9196 = shalt.err (!%p9193_p11)
}
  0x5c   : > { %s10770_s15 = smov 128   ;;  %s10772_s18 = smov 8  }
  0x5d   : > { %9003 = dma.hbm_to_vmem [thread:$0]  (!%p9692_p6), %s10808_s25, 16384, %s9688_s30, [#allocation9], %s10770_s15, %s10770_s15, %s10772_s18  }
  0x5e   : > { %s10809_s1 = sld [smem:[#allocation35_spill]] }
  0x64   : > { %s9197_s21 = scalar_lea.hbm %s10809_s1, 16384 }
  0x65   : > { %p9198_p12 = scmp.ne.s32.totalorder %s10809_s1, %s9197_s21  ;;  %p9204_p0 = scmp.lt.u32.totalorder %s9197_s21, %s10809_s1 }
  0x67   : > { %p9200_p4 = pnand %p9198_p12, %p9706_p8 }
  0x69   : > { %p9201_p13 = pneg %p9200_p4 }
  0x6b   : > { %p9206_p2 = pnand %p9204_p0, %p9201_p13 }
  0x6d   : > { %9209 = shalt.err (!%p9206_p2)
}
  0x6e   : > { %s9210_s30 = scalar_lea.vmem %s9696_s8, 16384  ;;  %p9218_p10 = scmp.lt.s32.totalorder %s9696_s8, %s9696_s8 }
  0x6f   : > { %p9211_p5 = scmp.ne.s32.totalorder %s9696_s8, %s9210_s30  ;;  %p9219_p11 = scmp.lt.s32.totalorder %s9210_s30, %s9210_s30 }
  0x71   : > { %p9213_p7 = pnand %p9211_p5, %p9706_p8  ;;  %p9220_p12 = por %p9219_p11, %p9218_p10 }
  0x73   : > { %p9214_p9 = pneg %p9213_p7 }
  0x75   : > { %p9221_p4 = pnand %p9220_p12, %p9214_p9 }
  0x77   : > { %9224 = shalt.err (!%p9221_p4)
}
  0x78   : > { %9009 = dma.hbm_to_vmem [thread:$0]  (!%p9692_p6), %s10809_s1, 16384, %s9696_s8, [#allocation12], %s10770_s15, %s10770_s15, %s10772_s18  }
  0x79   : > { %s9516_s19 = smov [#allocation14]   ;;  %s9517_s24 = smov [#allocation7]  }
  0x7a   : > { %s688_s20 = sshll.u32 %s9516_s19, 4  ;;  %s614_s4 = sshll.u32 %s9517_s24, 4  ;;  %s689_s20 = int_to_ptr.vmem [resolvable:$true] %s688_s20  ;;  %s615_s4 = int_to_ptr.vmem [resolvable:$true] %s614_s4 }
  0x7b   : > { %s10810_s12 = sld [smem:[#allocation39_spill]] }
  0x81   : > { %s9225_s2 = scalar_lea.hbm %s10810_s12, 4096 }
  0x82   : > { %p9226_p13 = scmp.ne.s32.totalorder %s10810_s12, %s9225_s2  ;;  %p9232_p5 = scmp.lt.u32.totalorder %s9225_s2, %s10810_s12 }
  0x84   : > { %p9228_p0 = pnand %p9226_p13, %p9706_p8 }
  0x86   : > { %p9229_p2 = pneg %p9228_p0 }
  0x88   : > { %p9234_p7 = pnand %p9232_p5, %p9229_p2 }
  0x8a   : > { %9237 = shalt.err (!%p9234_p7)
}
  0x8b   : > { %s9238_s8 = scalar_lea.vmem %s689_s20, 4096  ;;  %p9246_p12 = scmp.lt.s32.totalorder %s689_s20, %s689_s20 }
  0x8c   : > { %p9239_p9 = scmp.ne.s32.totalorder %s689_s20, %s9238_s8  ;;  %p9247_p4 = scmp.lt.s32.totalorder %s9238_s8, %s9238_s8 }
  0x8e   : > { %p9241_p10 = pnand %p9239_p9, %p9706_p8  ;;  %p9248_p1 = por %p9247_p4, %p9246_p12 }
  0x90   : > { %p9242_p11 = pneg %p9241_p10 }
  0x92   : > { %p9249_p3 = pnand %p9248_p1, %p9242_p11 }
  0x94   : > { %9252 = shalt.err (!%p9249_p3)
}
  0x95   : > { %9015 = dma.hbm_to_vmem [thread:$0]  (!%p9692_p6), %s10810_s12, 4096, %s689_s20, [#allocation15], %s10770_s15, %s10770_s15, %s10772_s18  }
  0x96   : > { %s10811_s24 = sld [smem:[#allocation30_spill]] }
  0x9c   : > { %s9253_s21 = scalar_lea.hbm %s10811_s24, 16 }
  0x9d   : > { %p9254_p1 = scmp.ne.s32.totalorder %s10811_s24, %s9253_s21  ;;  %p9260_p0 = scmp.lt.u32.totalorder %s9253_s21, %s10811_s24 }
  0x9f   : > { %p9256_p3 = pnand %p9254_p1, %p9706_p8 }
  0xa1   : > { %p9257_p13 = pneg %p9256_p3 }
  0xa3   : > { %p9262_p2 = pnand %p9260_p0, %p9257_p13 }
  0xa5   : > { %9265 = shalt.err (!%p9262_p2)
}
  0xa6   : > { %s9266_s8 = scalar_lea.vmem %s615_s4, 16  ;;  %s9273_s20 = scalar_lea.vmem %s615_s4, 32 }
  0xa7   : > { %p9267_p5 = scmp.ne.s32.totalorder %s615_s4, %s9266_s8  ;;  %p9274_p10 = scmp.lt.s32.totalorder %s615_s4, %s615_s4 }
  0xa8   : > { %p9275_p11 = scmp.lt.s32.totalorder %s9273_s20, %s9266_s8 }
  0xa9   : > { %p9269_p7 = pnand %p9267_p5, %p9706_p8 }
  0xaa   : > { %p9276_p12 = por %p9275_p11, %p9274_p10 }
  0xab   : > { %p9270_p9 = pneg %p9269_p7 }
  0xad   : > { %p9277_p4 = pnand %p9276_p12, %p9270_p9 }
  0xaf   : > { %9280 = shalt.err (!%p9277_p4)
}
  0xb0   : > { %9000 = dma.hbm_to_vmem [thread:$0]  (!%p9692_p6), %s10811_s24, 16, %s615_s4, [#allocation6]  }
  0xb1   : > { %s9518_s6 = smov [#allocation10]   ;;  %s9519_s21 = smov [#allocation13]  }
  0xb2   : > { %s640_s19 = sshll.u32 %s9518_s6, 4  ;;  %s672_s23 = sshll.u32 %s9519_s21, 4  ;;  %s641_s19 = int_to_ptr.vmem [resolvable:$true] %s640_s19  ;;  %s673_s23 = int_to_ptr.vmem [resolvable:$true] %s672_s23 }
  0xb3   : > { %s10812_s13 = sld [smem:[#allocation33_spill]] }
  0xb9   : > { %s9281_s15 = scalar_lea.hbm %s10812_s13, 16384 }
  0xba   : > { %p9282_p1 = scmp.ne.s32.totalorder %s10812_s13, %s9281_s15  ;;  %p9288_p0 = scmp.lt.u32.totalorder %s9281_s15, %s10812_s13 }
  0xbc   : > { %p9284_p3 = pnand %p9282_p1, %p9706_p8 }
  0xbe   : > { %p9285_p13 = pneg %p9284_p3 }
  0xc0   : > { %p9290_p2 = pnand %p9288_p0, %p9285_p13 }
  0xc2   : > { %9293 = shalt.err (!%p9290_p2)
}
  0xc3   : > { %s9294_s4 = scalar_lea.vmem %s641_s19, 16384  ;;  %p9302_p10 = scmp.lt.s32.totalorder %s641_s19, %s641_s19 }
  0xc4   : > { %p9295_p5 = scmp.ne.s32.totalorder %s641_s19, %s9294_s4  ;;  %p9303_p11 = scmp.lt.s32.totalorder %s9294_s4, %s9294_s4 }
  0xc6   : > { %p9297_p7 = pnand %p9295_p5, %p9706_p8  ;;  %p9304_p12 = por %p9303_p11, %p9302_p10 }
  0xc8   : > { %p9298_p9 = pneg %p9297_p7 }
  0xca   : > { %p9305_p4 = pnand %p9304_p12, %p9298_p9 }
  0xcc   : > { %9308 = shalt.err (!%p9305_p4)
}
  0xcd   : > { %s10813_s25 = smov 8   ;;  %s10814_s6 = smov 128  }
  0xce   : > { %9006 = dma.hbm_to_vmem [thread:$0]  (!%p9692_p6), %s10812_s13, 16384, %s641_s19, [#allocation9], %s10814_s6, %s10814_s6, %s10813_s25  }
  0xcf   : > { %s10815_s10 = sld [smem:[#allocation37_spill]] }
  0xd5   : > { %s9309_s30 = scalar_lea.hbm %s10815_s10, 16384 }
  0xd6   : > { %p9310_p1 = scmp.ne.s32.totalorder %s10815_s10, %s9309_s30  ;;  %p9316_p0 = scmp.lt.u32.totalorder %s9309_s30, %s10815_s10 }
  0xd8   : > { %p9312_p3 = pnand %p9310_p1, %p9706_p8 }
  0xda   : > { %p9313_p13 = pneg %p9312_p3 }
  0xdc   : > { %p9318_p2 = pnand %p9316_p0, %p9313_p13 }
  0xde   : > { %9321 = shalt.err (!%p9318_p2)
}
  0xdf   : > { %s9322_s18 = scalar_lea.vmem %s673_s23, 16384  ;;  %p9330_p10 = scmp.lt.s32.totalorder %s673_s23, %s673_s23 }
  0xe0   : > { %p9323_p5 = scmp.ne.s32.totalorder %s673_s23, %s9322_s18  ;;  %p9331_p11 = scmp.lt.s32.totalorder %s9322_s18, %s9322_s18 }
  0xe2   : > { %p9325_p7 = pnand %p9323_p5, %p9706_p8  ;;  %p9332_p12 = por %p9331_p11, %p9330_p10 }
  0xe4   : > { %p9326_p9 = pneg %p9325_p7 }
  0xe6   : > { %p9333_p4 = pnand %p9332_p12, %p9326_p9 }
  0xe8   : > { %9336 = shalt.err (!%p9333_p4)
}
  0xe9   : > { %9012 = dma.hbm_to_vmem [thread:$0]  (!%p9692_p6), %s10815_s10, 16384, %s673_s23, [#allocation12], %s10814_s6, %s10814_s6, %s10813_s25  }
  0xea   : > { %s9520_s21 = smov [#allocation16]   ;;  %s9521_s30 = smov [#allocation17]  }
  0xeb   : > { %s704_s2 = sshll.u32 %s9520_s21, 4  ;;  %s738_s8 = sshll.u32 %s9521_s30, 4  ;;  %s705_s2 = int_to_ptr.vmem [resolvable:$true] %s704_s2  ;;  %s739_s8 = int_to_ptr.vmem [resolvable:$true] %s738_s8 }
  0xec   : > { %s10816_s14 = sld [smem:[#allocation41_spill]] }
  0xf2   : > { %s9337_s4 = scalar_lea.hbm %s10816_s14, 4096 }
  0xf3   : > { %p9338_p1 = scmp.ne.s32.totalorder %s10816_s14, %s9337_s4  ;;  %p9344_p0 = scmp.lt.u32.totalorder %s9337_s4, %s10816_s14 }
  0xf5   : > { %p9340_p3 = pnand %p9338_p1, %p9706_p8 }
  0xf7   : > { %p9341_p13 = pneg %p9340_p3 }
  0xf9   : > { %p9346_p2 = pnand %p9344_p0, %p9341_p13 }
  0xfb   : > { %9349 = shalt.err (!%p9346_p2)
}
  0xfc   : > { %s9350_s23 = scalar_lea.vmem %s705_s2, 4096  ;;  %p9358_p10 = scmp.lt.s32.totalorder %s705_s2, %s705_s2 }
  0xfd   : > { %p9351_p5 = scmp.ne.s32.totalorder %s705_s2, %s9350_s23  ;;  %p9359_p11 = scmp.lt.s32.totalorder %s9350_s23, %s9350_s23 }
  0xff   : > { %p9353_p7 = pnand %p9351_p5, %p9706_p8  ;;  %p9360_p12 = por %p9359_p11, %p9358_p10 }
 0x101   : > { %p9354_p9 = pneg %p9353_p7 }
 0x103   : > { %p9361_p4 = pnand %p9360_p12, %p9354_p9 }
 0x105   : > { %9364 = shalt.err (!%p9361_p4)
}
 0x106   : > { %9018 = dma.hbm_to_vmem [thread:$0]  (!%p9692_p6), %s10816_s14, 4096, %s705_s2, [#allocation15], %s10814_s6, %s10814_s6, %s10813_s25  }
 0x107   : > { %s9365_s30 = scalar_lea.hbm %s10749_s22, 2048 }
 0x108   : > { %p9366_p1 = scmp.ne.s32.totalorder %s10749_s22, %s9365_s30  ;;  %p9372_p0 = scmp.lt.u32.totalorder %s9365_s30, %s10749_s22 }
 0x10a   : > { %p9368_p3 = pnand %p9366_p1, %p9706_p8 }
 0x10c   : > { %p9369_p13 = pneg %p9368_p3 }
 0x10e   : > { %p9374_p2 = pnand %p9372_p0, %p9369_p13 }
 0x110   : > { %9377 = shalt.err (!%p9374_p2)
}
 0x111   : > { %s9378_s19 = scalar_lea.vmem %s739_s8, 2048  ;;  %p9386_p10 = scmp.lt.s32.totalorder %s739_s8, %s739_s8 }
 0x112   : > { %p9379_p5 = scmp.ne.s32.totalorder %s739_s8, %s9378_s19  ;;  %p9387_p11 = scmp.lt.s32.totalorder %s9378_s19, %s9378_s19 }
 0x114   : > { %p9381_p7 = pnand %p9379_p5, %p9706_p8  ;;  %p9388_p12 = por %p9387_p11, %p9386_p10 }
 0x116   : > { %p9382_p9 = pneg %p9381_p7 }
 0x118   : > { %p9389_p4 = pnand %p9388_p12, %p9382_p9 }
 0x11a   : > { %9392 = shalt.err (!%p9389_p4)
}
 0x11b   : > { %9021 = dma.hbm_to_vmem [thread:$0]  (!%p9692_p6), %s10749_s22, 2048, %s739_s8, [#allocation18], %s10814_s6, %s10814_s6, %s10813_s25  }
 0x11c   : > { %s5929_s3 = sadd.s32 4294967294, %s9509_s28   ;;  %s9905_s7 = sadd.s32 1, %s9509_s28  }
 0x11d   : > { %s52_s12 = sadd.s32 1, %s9505_s27  ;;  %s49_s1 = ssub.s32 %s9509_s28, %s9905_s7 }
 0x11e   : > { %p59_p8 = scmp.ne.s32.totalorder %s9505_s27, %s9501_s26  ;;  %p50_p1 = scmp.eq.s32.totalorder %s49_s1, 0 }
 0x11f   : > { %p60_p3 = scmp.eq.s32.totalorder %s9509_s28, 0  ;;  %p65_p13 = scmp.ne.s32.totalorder %s9501_s26, %s9497_s5 }
 0x120   : > { %p577_p0 = scmp.eq.s32.totalorder %s9674_s29, 1  ;;  %p10817_p5 = scmp.eq.s32.totalorder %s9674_s29, 0 }
 0x121   : > { %s9917_s15 = scalar_select %p50_p1, %s9505_s27, %s52_s12  }
 0x122   : > { %p61_p2 = por %p60_p3, %p59_p8  ;;  %p9921_p7 = por %p10817_p5, %p65_p13 }
 0x123   : > { %p9925_p6 = por %p577_p0, %p59_p8  ;;  %p583_p9 = scmp.eq.s32.totalorder %s5929_s3, 1 }
 0x124   : > { %p9039_p10 = scmp.lt.s32.totalorder %s9509_s28, 2  ;;  %s755_s6 = sand.u32 1, %s9505_s27  }
 0x125   : > { %s10819_s25 = scalar_select %p9925_p6, 1, 0 }
 0x126   : > { %p9931_p11 = por %p583_p9, %p65_p13  ;;  %s5941_s30 = sshll.u32 %s755_s6, 3 }
 0x127   : > { %s5942_s20 = sshll.u32 %s9509_s28, 7  ;;  %s10821_s18 = sld [smem:[#allocation27_spill]] }
 0x128   : > { %s10820_s8 = scalar_select %p9931_p11, 1, 0 }
 0x129   : > { %s759_s2 = scalar_lea.vmem [#allocation2], %s5941_s30  ;;  %p9941_p12 = pnand %p9039_p10, %p61_p2 }
 0x12a   : > { %s766_s23 = sshll.u32 %s759_s2, 4  ;;  %s756_s12 = scalar_lea.sflag [#allocation3], %s755_s6  ;;  %s9945_s23 = int_to_ptr.vmem [resolvable:$true] %s766_s23 }
 0x12b   : > { %p9395_p8 = pneg %p9941_p12 }
 0x12d   : > { %s9939_s19 = scalar_lea.hbm %s10821_s18, %s5942_s20  ;;  %s9398_s17 = scalar_lea.hbm %s10821_s18, 256 }
 0x12e   : > { %s9393_s1 = scalar_lea.hbm %s9939_s19, 128  ;;  %p9399_p13 = scmp.lt.u32.totalorder %s9939_s19, %s10821_s18 }
 0x12f   : > { %p9394_p4 = scmp.ne.s32.totalorder %s9939_s19, %s9393_s1  ;;  %p9400_p0 = scmp.lt.u32.totalorder %s9398_s17, %s9393_s1 }
 0x130   : > { %p9402_p5 = scmp.lt.u32.totalorder %s9393_s1, %s9939_s19 }
 0x131   : > { %p9396_p1 = pnand %p9395_p8, %p9394_p4  ;;  %p9401_p2 = por %p9400_p0, %p9399_p13 }
 0x133   : > { %p9397_p3 = pneg %p9396_p1  ;;  %p9403_p9 = por %p9402_p5, %p9401_p2 }
 0x135   : > { %p9404_p10 = pnand %p9403_p9, %p9397_p3 }
 0x137   : > { %9407 = shalt.err (!%p9404_p10)
}
 0x138   : > { %s9408_s6 = scalar_lea.vmem %s9945_s23, 128  ;;  %s9522_s20 = smov [#allocation2]  }
 0x139   : > { %p9409_p4 = scmp.ne.s32.totalorder %s9945_s23, %s9408_s6  ;;  %s9413_s30 = sshll.u32 %s9522_s20, 4  ;;  %s9414_s30 = int_to_ptr.vmem [resolvable:$false] %s9413_s30 }
 0x13a   : > { %s9415_s4 = scalar_lea.vmem %s9414_s30, 256  ;;  %p9416_p6 = scmp.lt.s32.totalorder %s9945_s23, %s9414_s30 }
 0x13b   : > { %p9411_p1 = pnand %p9409_p4, %p9395_p8  ;;  %p9417_p13 = scmp.lt.s32.totalorder %s9415_s4, %s9408_s6 }
 0x13d   : > { %p9412_p11 = pneg %p9411_p1  ;;  %p9418_p0 = por %p9417_p13, %p9416_p6 }
 0x13f   : > { %p9419_p2 = pnand %p9418_p0, %p9412_p11 }
 0x141   : > { %9422 = shalt.err (!%p9419_p2)
}
 0x142   : > { %9025 = dma.hbm_to_vmem [thread:$0]  (!%p9941_p12), %s9939_s19, 128, %s9945_s23, %s756_s12  }
 0x143   : > { %p10823_p3 = scmp.ne.s32.totalorder %s10804_s0, 0 }
 0x144   : > { %s9975_s1 = sand.u32 (!%p10823_p3), 1, %s9501_s26  }
 0x145   : > { %781 = sbr.rel (%p10823_p3) target bundleno = 5884 (0x16fc), region = 116  ;;  %s10776_s17 = sshll.u32 (!%p10823_p3), %s9975_s1, 3 }
 0x146   : > { %s784_s2 = scalar_lea.sflag (!%p10823_p3), [#allocation3], %s9975_s1  ;;  %s787_s6 = scalar_lea.vmem (!%p10823_p3), [#allocation2], %s10776_s17 }
 0x14c   : > { %9468 = dma.done.wait (%p9921_p7), %s784_s2, 128  }
 0x14d   : > { %9470 = vsyncadd (%p9921_p7), %s784_s2, 4294967168  ;;  %p10824_p6 = scmp.eq.s32.totalorder %s9674_s29, 0 }
 0x14f   : > { %9472 = dma.done.wait (%p10824_p6), [#allocation6], 32   ;;  %p10825_p11 = pmov %p10824_p6 }
 0x150   : > { %p10826_p12 = pmov %p10824_p6 }
 0x151   : > { %9474 = vsyncadd (%p10825_p11), [#allocation6], 4294967264 }
 0x152   : > { %9476 = dma.done.wait (%p10826_p12), [#allocation9], 32768   ;;  %p10827_p8 = pmov %p10824_p6 }
 0x153   : > { %p10828_p5 = pmov %p10824_p6 }
 0x154   : > { %9478 = vsyncadd (%p10827_p8), [#allocation9], 4294934528 }
 0x155   : > { %9480 = dma.done.wait (%p10828_p5), [#allocation12], 32768   ;;  %p10829_p9 = pmov %p10828_p5 }
 0x156   : > { %p10830_p7 = pmov %p10828_p5 }
 0x157   : > { %9482 = vsyncadd (%p10829_p9), [#allocation12], 4294934528 }
 0x158   : > { %9484 = dma.done.wait (%p10830_p7), [#allocation15], 8192   ;;  %p10831_p10 = pmov %p10828_p5 }
 0x159   : > { %p10832_p4 = pmov %p10828_p5 }
 0x15a   : > { %9486 = vsyncadd (%p10831_p10), [#allocation15], 4294959104 }
 0x15b   : > { %9488 = dma.done.wait (%p10832_p4), [#allocation18], 2048   ;;  %p10833_p1 = pmov %p10832_p4 }
 0x15c   : > { %v894_v0 = vlaneseq  ;;  %v9523_v2 = vmov 0.0   ;;  %v912_v4 = vld [vmem:[%s787_s6] sm:$0xff]  ;;  %v942_v6 = vld [vmem:[#allocation8] sm:$0xff]  ;;  %v9524_v9 = vmov 0.0|0.0   ;;  %vm9525_vm1 = vmmov 0   ;;  %s10834_s19 = sld [smem:[#allocation34_spill]] }
 0x15d   : > { %9490 = vsyncadd (%p10833_p1), [#allocation18], 4294965248  ;;  %v943_v7 = vld [vmem:[#allocation8 + $0x8] sm:$0xff]  ;;  %v958_v8 = vld [vmem:[#allocation8 + $0x80] sm:$0xff]  ;;  %8066 = vmatprep.subr.bf16.mxu0 %v9524_v9  ;;  %8090 = vmatprep.subr.bf16.mxu1 %v9524_v9  ;;  %s10835_s12 = sld [smem:[#allocation32_spill]]  ;;  %s10836_s9 = sld [smem:[#allocation36_spill]] }
 0x15e   : > { %v10006_v1 = vand.u32 127, %v894_v0  ;;  %v8067_v10 = vpack.c.bf16 %v943_v7, %v942_v6  ;;  %v959_v11 = vld [vmem:[#allocation8 + $0x88] sm:$0xff]  ;;  %v944_v12 = vld [vmem:[#allocation8 + $0x10] sm:$0xff]  ;;  %v945_v13 = vld [vmem:[#allocation8 + $0x18] sm:$0xff]  ;;  %6723 = vmatprep.mubr.msk.f32.mxu0 %vm9525_vm1, %v9523_v2  ;;  %6758 = vmatprep.mubr.msk.f32.mxu1 %vm9525_vm1, %v9523_v2  ;;  %p891_p13 = scmp.lt.s32.totalorder %s9674_s29, 1  ;;  %s10837_s3 = sld [smem:[#allocation28_spill]] }
 0x15f   : > { %v8091_v14 = vpack.c.bf16 %v959_v11, %v958_v8  ;;  %v960_v15 = vld [vmem:[#allocation8 + $0x90] sm:$0xff]  ;;  %v961_v16 = vld [vmem:[#allocation8 + $0x98] sm:$0xff]  ;;  %v8070_v17 = vpack.c.bf16 %v945_v13, %v944_v12  ;;  %v946_v19 = vld [vmem:[#allocation8 + $0x20] sm:$0xff]  ;;  %vm2338_vm6 = vcmask 64512   ;;  %s10838_s11 = sld [smem:[#allocation38_spill]]  ;;  %s10839_s6 = sld [smem:[#allocation43_spill]] }
 0x160   : > { %vm896_vm0 = vcmp.lt.s32.totalorder %v10006_v1, 32  ;;  %8068 = vmatpush3.bf16.msra.mxu0 %v8067_v10  ;;  %v8094_v18 = vpack.c.bf16 %v961_v16, %v960_v15  ;;  %v947_v20 = vld [vmem:[#allocation8 + $0x28] sm:$0xff]  ;;  %v962_v21 = vld [vmem:[#allocation8 + $0xa0] sm:$0xff]  ;;  %v948_v30 = vld [vmem:[#allocation8 + $0x30] sm:$0xff]  ;;  %s892_s0 = scalar_select %p891_p13, %s9674_s29, 1 }
 0x161   : > { %v10010_v3 = vsel %vm896_vm0, 1.0, %v9523_v2  ;;  %8092 = vmatpush3.bf16.msra.mxu1 %v8091_v14  ;;  %8069 = vmatprep.subr.bf16.mxu0 %v9524_v9  ;;  %v963_v22 = vld [vmem:[#allocation8 + $0xa8] sm:$0xff]  ;;  %v8073_v23 = vpack.c.bf16 %v947_v20, %v946_v19  ;;  %v949_v31 = vld [vmem:[#allocation8 + $0x38] sm:$0xff]  ;;  %v964_v32 = vld [vmem:[#allocation8 + $0xb0] sm:$0xff]  ;;  %s10840_s23 = sld [smem:[#allocation40_spill]]  ;;  %s10841_s30 = sld [smem:[#allocation42_spill]] }
 0x162   : > { %v915_v5 = vmul.f32 %v10010_v3, %v912_v4  ;;  %8093 = vmatprep.subr.bf16.mxu1 %v9524_v9  ;;  %v8097_v24 = vpack.c.bf16 %v963_v22, %v962_v21  ;;  %v8076_v33 = vpack.c.bf16 %v949_v31, %v948_v30  ;;  %v965_v34 = vld [vmem:[#allocation8 + $0xb8] sm:$0xff]  ;;  %v950_v36 = vld [vmem:[#allocation8 + $0x40] sm:$0xff]  ;;  %v951_v37 = vld [vmem:[#allocation8 + $0x48] sm:$0xff]  ;;  %s10844_s10 = sld [smem:[#allocation46_spill]]  ;;  %s10845_s17 = sld [smem:[#allocation47_spill]] }
 0x163   : > { %v8100_v35 = vpack.c.bf16 %v965_v34, %v964_v32  ;;  %v966_v38 = vld [vmem:[#allocation8 + $0xc0] sm:$0xff]  ;;  %v8079_v39 = vpack.c.bf16 %v951_v37, %v950_v36  ;;  %v967_v40 = vld [vmem:[#allocation8 + $0xc8] sm:$0xff]  ;;  %v952_v42 = vld [vmem:[#allocation8 + $0x50] sm:$0xff]  ;;  %s5751_s13 = scalar_lea.sflag [#allocation4], %s9975_s1  ;;  %p10849_p2 = scmp.ne.s32.totalorder %s10819_s25, 0 }
 0x164   : > { %916 = vadd.xlane.f32.xlu0 %v915_v5  ;;  %8071 = vmatpush3.bf16.msra.mxu0 %v8070_v17  ;;  %v8103_v41 = vpack.c.bf16 %v967_v40, %v966_v38  ;;  %v953_v43 = vld [vmem:[#allocation8 + $0x58] sm:$0xff]  ;;  %v968_v44 = vld [vmem:[#allocation8 + $0xd0] sm:$0xff]  ;;  %v954_v48 = vld [vmem:[#allocation8 + $0x60] sm:$0xff]  ;;  %s893_s20 = scalar_lea.vmem %s10837_s3, %s892_s0  ;;  %s10842_s0 = sld [smem:[#allocation44_spill]] }
 0x165   : > { %8095 = vmatpush3.bf16.msra.mxu1 %v8094_v18  ;;  %8072 = vmatprep.subr.bf16.mxu0 %v9524_v9  ;;  %v8082_v45 = vpack.c.bf16 %v953_v43, %v952_v42  ;;  %v969_v46 = vld [vmem:[#allocation8 + $0xd8] sm:$0xff]  ;;  %v955_v49 = vld [vmem:[#allocation8 + $0x68] sm:$0xff]  ;;  %v970_v50 = vld [vmem:[#allocation8 + $0xe0] sm:$0xff] }
 0x166   : > { %8096 = vmatprep.subr.bf16.mxu1 %v9524_v9  ;;  %v8106_v47 = vpack.c.bf16 %v969_v46, %v968_v44  ;;  %v8085_v51 = vpack.c.bf16 %v955_v49, %v954_v48  ;;  %v971_v52 = vld [vmem:[#allocation8 + $0xe8] sm:$0xff]  ;;  %v956_v54 = vld [vmem:[#allocation8 + $0x70] sm:$0xff]  ;;  %v957_v55 = vld [vmem:[#allocation8 + $0x78] sm:$0xff] }
 0x167   : > { %v8109_v53 = vpack.c.bf16 %v971_v52, %v970_v50  ;;  %v972_v56 = vld [vmem:[#allocation8 + $0xf0] sm:$0xff]  ;;  %v8088_v57 = vpack.c.bf16 %v957_v55, %v956_v54  ;;  %v973_v58 = vld [vmem:[#allocation8 + $0xf8] sm:$0xff]  ;;  %v974_v5 = vld [vmem:[#allocation8 + $0x100] sm:$0xff] }
 0x168   : > { %8074 = vmatpush3.bf16.msra.mxu0 %v8073_v23  ;;  %v8112_v59 = vpack.c.bf16 %v973_v58, %v972_v56  ;;  %v975_v7 = vld [vmem:[#allocation8 + $0x108] sm:$0xff]  ;;  %v990_v8 = vld [vmem:[#allocation8 + $0x180] sm:$0xff]  ;;  %v5957_v11 = vld [vmem:[#allocation7] ss:$0 sm:$0xff] }
 0x169   : > { %8098 = vmatpush3.bf16.msra.mxu1 %v8097_v24  ;;  %8075 = vmatprep.subr.bf16.mxu0 %v9524_v9  ;;  %v991_v10 = vld [vmem:[#allocation8 + $0x188] sm:$0xff]  ;;  %v8115_v13 = vpack.c.bf16 %v975_v7, %v974_v5  ;;  %v976_v15 = vld [vmem:[#allocation8 + $0x110] sm:$0xff]  ;;  %v977_v17 = vld [vmem:[#allocation8 + $0x118] sm:$0xff] }
 0x16a   : > { %8099 = vmatprep.subr.bf16.mxu1 %v9524_v9  ;;  %v8139_v14 = vpack.c.bf16 %v991_v10, %v990_v8  ;;  %v992_v18 = vld [vmem:[#allocation8 + $0x190] sm:$0xff]  ;;  %v993_v19 = vld [vmem:[#allocation8 + $0x198] sm:$0xff]  ;;  %v8118_v20 = vpack.c.bf16 %v977_v17, %v976_v15  ;;  %v978_v22 = vld [vmem:[#allocation8 + $0x120] sm:$0xff] }
 0x16b   : > { %v8142_v21 = vpack.c.bf16 %v993_v19, %v992_v18  ;;  %v979_v23 = vld [vmem:[#allocation8 + $0x128] sm:$0xff]  ;;  %v994_v24 = vld [vmem:[#allocation8 + $0x1a0] sm:$0xff]  ;;  %v996_v30 = vld [vmem:[#allocation8 + $0x1b0] sm:$0xff] }
 0x16c   : > { %8077 = vmatpush3.bf16.msra.mxu0 %v8076_v33  ;;  %v997_v31 = vld [vmem:[#allocation8 + $0x1b8] sm:$0xff]  ;;  %v982_v34 = vld [vmem:[#allocation8 + $0x140] sm:$0xff]  ;;  %v999_v37 = vld [vmem:[#allocation8 + $0x1c8] sm:$0xff] }
 0x16d   : > { %8101 = vmatpush3.bf16.msra.mxu1 %v8100_v35  ;;  %8078 = vmatprep.subr.bf16.mxu0 %v9524_v9  ;;  %v8148_v33 = vpack.c.bf16 %v997_v31, %v996_v30  ;;  %v983_v35 = vld [vmem:[#allocation8 + $0x148] sm:$0xff]  ;;  %v998_v36 = vld [vmem:[#allocation8 + $0x1c0] sm:$0xff]  ;;  %v984_v40 = vld [vmem:[#allocation8 + $0x150] sm:$0xff] }
 0x16e   : > { %8102 = vmatprep.subr.bf16.mxu1 %v9524_v9  ;;  %v8127_v38 = vpack.c.bf16 %v983_v35, %v982_v34  ;;  %v1000_v42 = vld [vmem:[#allocation8 + $0x1d0] sm:$0xff]  ;;  %v1001_v43 = vld [vmem:[#allocation8 + $0x1d8] sm:$0xff]  ;;  %v986_v46 = vld [vmem:[#allocation8 + $0x160] sm:$0xff] }
 0x16f   : > { %v1002_v48 = vld [vmem:[#allocation8 + $0x1e0] sm:$0xff]  ;;  %v1003_v49 = vld [vmem:[#allocation8 + $0x1e8] sm:$0xff]  ;;  %v988_v52 = vld [vmem:[#allocation8 + $0x170] sm:$0xff] }
 0x170   : > { %8080 = vmatpush3.bf16.msra.mxu0 %v8079_v39  ;;  %v8151_v39 = vpack.c.bf16 %v999_v37, %v998_v36  ;;  %v1004_v54 = vld [vmem:[#allocation8 + $0x1f0] sm:$0xff]  ;;  %v1005_v55 = vld [vmem:[#allocation8 + $0x1f8] sm:$0xff]  ;;  %v1314_v58 = vld [vmem:[#allocation10] sm:$0xff] }
 0x171   : > { %8104 = vmatpush3.bf16.msra.mxu1 %v8103_v41  ;;  %8081 = vmatprep.subr.bf16.mxu0 %v9524_v9  ;;  %v985_v41 = vld [vmem:[#allocation8 + $0x158] sm:$0xff]  ;;  %v1320_v18 = vld [vmem:[#allocation10 + $0x30] sm:$0xff]  ;;  %v1326_v36 = vld [vmem:[#allocation10 + $0x60] sm:$0xff] }
 0x172   : > { %8105 = vmatprep.subr.bf16.mxu1 %v9524_v9  ;;  %v8130_v44 = vpack.c.bf16 %v985_v41, %v984_v40  ;;  %v1317_v5 = vld [vmem:[#allocation10 + $0x18] sm:$0xff]  ;;  %v1324_v30 = vld [vmem:[#allocation10 + $0x50] sm:$0xff]  ;;  %v1327_v37 = vld [vmem:[#allocation10 + $0x68] sm:$0xff] }
 0x173   : > { %v1333_v7 = vld [vmem:[#allocation10 + $0x98] sm:$0xff]  ;;  %v8181_v40 = vpack.c.bf16 %v1327_v37, %v1326_v36 }
 0x174   : > { %8083 = vmatpush3.bf16.msra.mxu0 %v8082_v45  ;;  %v8154_v45 = vpack.c.bf16 %v1001_v43, %v1000_v42  ;;  %v1321_v19 = vld [vmem:[#allocation10 + $0x38] sm:$0xff]  ;;  %v1328_v42 = vld [vmem:[#allocation10 + $0x70] sm:$0xff] }
 0x175   : > { %8107 = vmatpush3.bf16.msra.mxu1 %v8106_v47  ;;  %8084 = vmatprep.subr.bf16.mxu0 %v9524_v9  ;;  %v987_v47 = vld [vmem:[#allocation8 + $0x168] sm:$0xff]  ;;  %v1325_v31 = vld [vmem:[#allocation10 + $0x58] sm:$0xff] }
 0x176   : > { %8108 = vmatprep.subr.bf16.mxu1 %v9524_v9  ;;  %v8133_v50 = vpack.c.bf16 %v987_v47, %v986_v46  ;;  %v8178_v34 = vpack.c.bf16 %v1325_v31, %v1324_v30  ;;  %v1329_v43 = vld [vmem:[#allocation10 + $0x78] sm:$0xff] }
 0x177   : > { %v8184_v46 = vpack.c.bf16 %v1329_v43, %v1328_v42 }
 0x178   : > { %8086 = vmatpush3.bf16.msra.mxu0 %v8085_v51  ;;  %v8157_v51 = vpack.c.bf16 %v1003_v49, %v1002_v48  ;;  %v1346_v48 = vld [vmem:[#allocation10 + $0x100] sm:$0xff]  ;;  %v1347_v49 = vld [vmem:[#allocation10 + $0x108] sm:$0xff] }
 0x179   : > { %8110 = vmatpush3.bf16.msra.mxu1 %v8109_v53  ;;  %8087 = vmatprep.subr.bf16.mxu0 %v9524_v9  ;;  %v989_v53 = vld [vmem:[#allocation8 + $0x178] sm:$0xff] }
 0x17a   : > { %8111 = vmatprep.subr.bf16.mxu1 %v9524_v9  ;;  %v8136_v56 = vpack.c.bf16 %v989_v53, %v988_v52  ;;  %v8211_v52 = vpack.c.bf16 %v1347_v49, %v1346_v48 }
 0x17c   : > { %8089 = vmatpush3.bf16.msra.mxu0 %v8088_v57  ;;  %v8160_v57 = vpack.c.bf16 %v1005_v55, %v1004_v54  ;;  %v1348_v54 = vld [vmem:[#allocation10 + $0x110] sm:$0xff]  ;;  %v1349_v55 = vld [vmem:[#allocation10 + $0x118] sm:$0xff] }
 0x17d   : > { %8113 = vmatpush3.bf16.msra.mxu1 %v8112_v59  ;;  %8114 = vmatprep.subr.bf16.mxu0 %v9524_v9  ;;  %v1315_v59 = vld [vmem:[#allocation10 + $0x8] sm:$0xff] }
 0x17e   : > { %8138 = vmatprep.subr.bf16.mxu1 %v9524_v9 }
 0x1f1   : > { %v917_v25 = vpop.xlane.xlu0 %916 }
 0x1f2   : > { %v918_v26 = vmul.f32 0.03125, %v917_v25  ;;  %v995_v25 = vld [vmem:[#allocation8 + $0x1a8] sm:$0xff] }
 0x1f4   : > { %v919_v27 = vsub.f32 %v912_v4, %v918_v26  ;;  %v5956_v4 = vld [vmem:[#allocation5] ss:$0 sm:$0xff]  ;;  %v8121_v26 = vpack.c.bf16 %v979_v23, %v978_v22  ;;  %v8172_v22 = vpack.c.bf16 %v1321_v19, %v1320_v18 }
 0x1f6   : > { %v10022_v28 = vmul.f32 %v10010_v3, %v919_v27  ;;  %v8145_v27 = vpack.c.bf16 %v995_v25, %v994_v24  ;;  %v1322_v24 = vld [vmem:[#allocation10 + $0x40] sm:$0xff]  ;;  %v1323_v25 = vld [vmem:[#allocation10 + $0x48] sm:$0xff] }
 0x1f8   : > { %v921_v29 = vmul.f32 %v10022_v28, %v10022_v28 }
 0x1fa   : > { %922 = vadd.xlane.f32.xlu0 %v921_v29  ;;  %v981_v29 = vld [vmem:[#allocation8 + $0x138] sm:$0xff] }
 0x287   : > { %v923_v60 = vpop.xlane.xlu0 %922 }
 0x288   : > { %v924_v61 = vmul.f32 0.03125, %v923_v60  ;;  %v1330_v60 = vld [vmem:[#allocation10 + $0x80] sm:$0xff] }
 0x28a   : > { %v925_v62 = vadd.f32 1e-05, %v924_v61  ;;  %v1331_v61 = vld [vmem:[#allocation10 + $0x88] sm:$0xff] }
 0x28c   : > { %9097 = vrsqrt.f32 %v925_v62  ;;  %v8163_v62 = vpack.c.bf16 %v1315_v59, %v1314_v58  ;;  %v8214_v58 = vpack.c.bf16 %v1349_v55, %v1348_v54 }
 0x296   : > { %v9098_v63 = vpop.eup %9097 }
 0x297   : > { %v927_v6 = vmul.f32 %v9098_v63, %v10022_v28  ;;  %v980_v28 = vld [vmem:[#allocation8 + $0x130] sm:$0xff]  ;;  %v8187_v63 = vpack.c.bf16 %v1331_v61, %v1330_v60  ;;  %v1350_v60 = vld [vmem:[#allocation10 + $0x120] sm:$0xff]  ;;  %v1351_v61 = vld [vmem:[#allocation10 + $0x128] sm:$0xff] }
 0x298   : > { %v8124_v32 = vpack.c.bf16 %v981_v29, %v980_v28  ;;  %v8175_v28 = vpack.c.bf16 %v1323_v25, %v1322_v24 }
 0x299   : > { %v934_v12 = vmul.f32 %v5956_v4, %v927_v6  ;;  %v1316_v4 = vld [vmem:[#allocation10 + $0x10] sm:$0xff] }
 0x29a   : > { %v1332_v6 = vld [vmem:[#allocation10 + $0x90] sm:$0xff]  ;;  %v8166_v8 = vpack.c.bf16 %v1317_v5, %v1316_v4  ;;  %v8217_v4 = vpack.c.bf16 %v1351_v61, %v1350_v60 }
 0x29b   : > { %v10041_v16 = vadd.f32 %v5957_v11, %v934_v12  ;;  %v8190_v10 = vpack.c.bf16 %v1333_v7, %v1332_v6  ;;  %v1318_v11 = vld [vmem:[#allocation10 + $0x20] sm:$0xff]  ;;  %v1319_v12 = vld [vmem:[#allocation10 + $0x28] sm:$0xff]  ;;  %v1352_v6 = vld [vmem:[#allocation10 + $0x130] sm:$0xff] }
 0x29c   : > { %v8169_v15 = vpack.c.bf16 %v1319_v12, %v1318_v11  ;;  %v1353_v7 = vld [vmem:[#allocation10 + $0x138] sm:$0xff] }
 0x29d   : > { %6724 = vmatmul.mubr.f32.vlgmr.msra.gmra.mrb[0].mxu0 %v10041_v16  ;;  %6759 = vmatmul.mubr.f32.vlgmr.msra.gmra.mrb[0].mxu1 %v10041_v16  ;;  %v8220_v11 = vpack.c.bf16 %v1353_v7, %v1352_v6 }
 0x29e   : > { %8116 = vmatpush3.bf16.msra.mxu0 %v8115_v13  ;;  %8140 = vmatpush3.bf16.msra.mxu1 %v8139_v14  ;;  %v1334_v13 = vld [vmem:[#allocation10 + $0xa0] sm:$0xff]  ;;  %v1335_v14 = vld [vmem:[#allocation10 + $0xa8] sm:$0xff] }
 0x29f   : > { %8117 = vmatprep.subr.bf16.mxu0 %v9524_v9  ;;  %8141 = vmatprep.subr.bf16.mxu1 %v9524_v9  ;;  %v8193_v17 = vpack.c.bf16 %v1335_v14, %v1334_v13  ;;  %v1354_v13 = vld [vmem:[#allocation10 + $0x140] sm:$0xff]  ;;  %v1355_v14 = vld [vmem:[#allocation10 + $0x148] sm:$0xff] }
 0x2a0   : > { %6793 = vmatprep.mubr.msk.f32.mxu0 %vm9525_vm1, %v9523_v2  ;;  %6828 = vmatprep.mubr.msk.f32.mxu1 %vm9525_vm1, %v9523_v2  ;;  %v8223_v18 = vpack.c.bf16 %v1355_v14, %v1354_v13 }
 0x2a2   : > { %8119 = vmatpush3.bf16.msra.mxu0 %v8118_v20  ;;  %8143 = vmatpush3.bf16.msra.mxu1 %v8142_v21  ;;  %v1336_v20 = vld [vmem:[#allocation10 + $0xb0] sm:$0xff]  ;;  %v1337_v21 = vld [vmem:[#allocation10 + $0xb8] sm:$0xff] }
 0x2a3   : > { %8120 = vmatprep.subr.bf16.mxu0 %v9524_v9  ;;  %8144 = vmatprep.subr.bf16.mxu1 %v9524_v9  ;;  %v8196_v23 = vpack.c.bf16 %v1337_v21, %v1336_v20  ;;  %v1356_v20 = vld [vmem:[#allocation10 + $0x150] sm:$0xff]  ;;  %v1357_v21 = vld [vmem:[#allocation10 + $0x158] sm:$0xff] }
 0x2a4   : > { %v8226_v24 = vpack.c.bf16 %v1357_v21, %v1356_v20 }
 0x2a6   : > { %8122 = vmatpush3.bf16.msra.mxu0 %v8121_v26  ;;  %8146 = vmatpush3.bf16.msra.mxu1 %v8145_v27  ;;  %v1338_v26 = vld [vmem:[#allocation10 + $0xc0] sm:$0xff]  ;;  %v1339_v27 = vld [vmem:[#allocation10 + $0xc8] sm:$0xff] }
 0x2a7   : > { %8123 = vmatprep.subr.bf16.mxu0 %v9524_v9  ;;  %8147 = vmatprep.subr.bf16.mxu1 %v9524_v9  ;;  %v8199_v29 = vpack.c.bf16 %v1339_v27, %v1338_v26  ;;  %v1358_v26 = vld [vmem:[#allocation10 + $0x160] sm:$0xff]  ;;  %v1359_v27 = vld [vmem:[#allocation10 + $0x168] sm:$0xff] }
 0x2a8   : > { %v8229_v30 = vpack.c.bf16 %v1359_v27, %v1358_v26 }
 0x2aa   : > { %8125 = vmatpush3.bf16.msra.mxu0 %v8124_v32  ;;  %8149 = vmatpush3.bf16.msra.mxu1 %v8148_v33  ;;  %v1340_v32 = vld [vmem:[#allocation10 + $0xd0] sm:$0xff]  ;;  %v1341_v33 = vld [vmem:[#allocation10 + $0xd8] sm:$0xff] }
 0x2ab   : > { %8126 = vmatprep.subr.bf16.mxu0 %v9524_v9  ;;  %8150 = vmatprep.subr.bf16.mxu1 %v9524_v9  ;;  %v8202_v35 = vpack.c.bf16 %v1341_v33, %v1340_v32  ;;  %v1360_v32 = vld [vmem:[#allocation10 + $0x170] sm:$0xff]  ;;  %v1361_v33 = vld [vmem:[#allocation10 + $0x178] sm:$0xff] }
 0x2ac   : > { %v8232_v36 = vpack.c.bf16 %v1361_v33, %v1360_v32 }
 0x2ae   : > { %8128 = vmatpush3.bf16.msra.mxu0 %v8127_v38  ;;  %8152 = vmatpush3.bf16.msra.mxu1 %v8151_v39  ;;  %v1342_v38 = vld [vmem:[#allocation10 + $0xe0] sm:$0xff]  ;;  %v1343_v39 = vld [vmem:[#allocation10 + $0xe8] sm:$0xff] }
 0x2af   : > { %8129 = vmatprep.subr.bf16.mxu0 %v9524_v9  ;;  %8153 = vmatprep.subr.bf16.mxu1 %v9524_v9  ;;  %v8205_v41 = vpack.c.bf16 %v1343_v39, %v1342_v38  ;;  %v1686_v38 = vld [vmem:[#allocation11] sm:$0xff]  ;;  %v1687_v39 = vld [vmem:[#allocation11 + $0x8] sm:$0xff] }
 0x2b0   : > { %v8259_v42 = vpack.c.bf16 %v1687_v39, %v1686_v38 }
 0x2b2   : > { %8131 = vmatpush3.bf16.msra.mxu0 %v8130_v44  ;;  %8155 = vmatpush3.bf16.msra.mxu1 %v8154_v45  ;;  %v1344_v44 = vld [vmem:[#allocation10 + $0xf0] sm:$0xff]  ;;  %v1345_v45 = vld [vmem:[#allocation10 + $0xf8] sm:$0xff] }
 0x2b3   : > { %8132 = vmatprep.subr.bf16.mxu0 %v9524_v9  ;;  %8156 = vmatprep.subr.bf16.mxu1 %v9524_v9  ;;  %v8208_v47 = vpack.c.bf16 %v1345_v45, %v1344_v44  ;;  %v1688_v44 = vld [vmem:[#allocation11 + $0x10] sm:$0xff]  ;;  %v1689_v45 = vld [vmem:[#allocation11 + $0x18] sm:$0xff] }
 0x2b4   : > { %v8262_v48 = vpack.c.bf16 %v1689_v45, %v1688_v44 }
 0x2b6   : > { %8134 = vmatpush3.bf16.msra.mxu0 %v8133_v50  ;;  %8158 = vmatpush3.bf16.msra.mxu1 %v8157_v51  ;;  %v1362_v50 = vld [vmem:[#allocation10 + $0x180] sm:$0xff]  ;;  %v1363_v51 = vld [vmem:[#allocation10 + $0x188] sm:$0xff] }
 0x2b7   : > { %8135 = vmatprep.subr.bf16.mxu0 %v9524_v9  ;;  %8159 = vmatprep.subr.bf16.mxu1 %v9524_v9  ;;  %v8235_v53 = vpack.c.bf16 %v1363_v51, %v1362_v50  ;;  %v1690_v50 = vld [vmem:[#allocation11 + $0x20] sm:$0xff]  ;;  %v1691_v51 = vld [vmem:[#allocation11 + $0x28] sm:$0xff] }
 0x2b8   : > { %v8265_v54 = vpack.c.bf16 %v1691_v51, %v1690_v50 }
 0x2ba   : > { %8137 = vmatpush3.bf16.msra.mxu0 %v8136_v56  ;;  %8161 = vmatpush3.bf16.msra.mxu1 %v8160_v57  ;;  %v1364_v56 = vld [vmem:[#allocation10 + $0x190] sm:$0xff]  ;;  %v1365_v57 = vld [vmem:[#allocation10 + $0x198] sm:$0xff] }
 0x2bb   : > { %8162 = vmatprep.subr.bf16.mxu0 %v9524_v9  ;;  %8186 = vmatprep.subr.bf16.mxu1 %v9524_v9  ;;  %v8238_v59 = vpack.c.bf16 %v1365_v57, %v1364_v56  ;;  %v1692_v56 = vld [vmem:[#allocation11 + $0x30] sm:$0xff]  ;;  %v1693_v57 = vld [vmem:[#allocation11 + $0x38] sm:$0xff] }
 0x2bc   : > { %v8268_v60 = vpack.c.bf16 %v1693_v57, %v1692_v56 }
 0x2bd   : > { %6794 = vmatmul.mubr.f32.vlgmr.msra.gmra.mrb[2].mxu0 %v10041_v16  ;;  %6829 = vmatmul.mubr.f32.vlgmr.msra.gmra.mrb[2].mxu1 %v10041_v16 }
 0x2be   : > { %8164 = vmatpush3.bf16.msra.mxu0 %v8163_v62  ;;  %8188 = vmatpush3.bf16.msra.mxu1 %v8187_v63  ;;  %v1366_v62 = vld [vmem:[#allocation10 + $0x1a0] sm:$0xff]  ;;  %v1367_v63 = vld [vmem:[#allocation10 + $0x1a8] sm:$0xff] }
 0x2bf   : > { %8165 = vmatprep.subr.bf16.mxu0 %v9524_v9  ;;  %8189 = vmatprep.subr.bf16.mxu1 %v9524_v9  ;;  %v8241_v5 = vpack.c.bf16 %v1367_v63, %v1366_v62  ;;  %v1694_v62 = vld [vmem:[#allocation11 + $0x40] sm:$0xff]  ;;  %v1695_v63 = vld [vmem:[#allocation11 + $0x48] sm:$0xff] }
 0x2c0   : > { %6863 = vmatprep.mubr.msk.f32.mxu0 %vm9525_vm1, %v9523_v2  ;;  %6898 = vmatprep.mubr.msk.f32.mxu1 %vm9525_vm1, %v9523_v2  ;;  %v8271_v6 = vpack.c.bf16 %v1695_v63, %v1694_v62 }
 0x2c2   : > { %8167 = vmatpush3.bf16.msra.mxu0 %v8166_v8  ;;  %8191 = vmatpush3.bf16.msra.mxu1 %v8190_v10  ;;  %v1368_v8 = vld [vmem:[#allocation10 + $0x1b0] sm:$0xff]  ;;  %v1369_v10 = vld [vmem:[#allocation10 + $0x1b8] sm:$0xff] }
 0x2c3   : > { %8168 = vmatprep.subr.bf16.mxu0 %v9524_v9  ;;  %8192 = vmatprep.subr.bf16.mxu1 %v9524_v9  ;;  %v8244_v12 = vpack.c.bf16 %v1369_v10, %v1368_v8  ;;  %v1696_v8 = vld [vmem:[#allocation11 + $0x50] sm:$0xff]  ;;  %v1697_v10 = vld [vmem:[#allocation11 + $0x58] sm:$0xff] }
 0x2c4   : > { %v8274_v13 = vpack.c.bf16 %v1697_v10, %v1696_v8 }
 0x2c6   : > { %8170 = vmatpush3.bf16.msra.mxu0 %v8169_v15  ;;  %8194 = vmatpush3.bf16.msra.mxu1 %v8193_v17  ;;  %v1370_v15 = vld [vmem:[#allocation10 + $0x1c0] sm:$0xff]  ;;  %v1371_v17 = vld [vmem:[#allocation10 + $0x1c8] sm:$0xff] }
 0x2c7   : > { %8171 = vmatprep.subr.bf16.mxu0 %v9524_v9  ;;  %8195 = vmatprep.subr.bf16.mxu1 %v9524_v9  ;;  %v8247_v19 = vpack.c.bf16 %v1371_v17, %v1370_v15  ;;  %v1698_v15 = vld [vmem:[#allocation11 + $0x60] sm:$0xff]  ;;  %v1699_v17 = vld [vmem:[#allocation11 + $0x68] sm:$0xff] }
 0x2c8   : > { %v8277_v20 = vpack.c.bf16 %v1699_v17, %v1698_v15 }
 0x2ca   : > { %8173 = vmatpush3.bf16.msra.mxu0 %v8172_v22  ;;  %8197 = vmatpush3.bf16.msra.mxu1 %v8196_v23  ;;  %v1372_v22 = vld [vmem:[#allocation10 + $0x1d0] sm:$0xff]  ;;  %v1373_v23 = vld [vmem:[#allocation10 + $0x1d8] sm:$0xff] }
 0x2cb   : > { %8174 = vmatprep.subr.bf16.mxu0 %v9524_v9  ;;  %8198 = vmatprep.subr.bf16.mxu1 %v9524_v9  ;;  %v8250_v25 = vpack.c.bf16 %v1373_v23, %v1372_v22  ;;  %v1700_v22 = vld [vmem:[#allocation11 + $0x70] sm:$0xff]  ;;  %v1701_v23 = vld [vmem:[#allocation11 + $0x78] sm:$0xff] }
 0x2cc   : > { %v8280_v26 = vpack.c.bf16 %v1701_v23, %v1700_v22 }
 0x2ce   : > { %8176 = vmatpush3.bf16.msra.mxu0 %v8175_v28  ;;  %8200 = vmatpush3.bf16.msra.mxu1 %v8199_v29  ;;  %v1374_v28 = vld [vmem:[#allocation10 + $0x1e0] sm:$0xff]  ;;  %v1375_v29 = vld [vmem:[#allocation10 + $0x1e8] sm:$0xff] }
 0x2cf   : > { %8177 = vmatprep.subr.bf16.mxu0 %v9524_v9  ;;  %8201 = vmatprep.subr.bf16.mxu1 %v9524_v9  ;;  %v8253_v31 = vpack.c.bf16 %v1375_v29, %v1374_v28  ;;  %v1718_v28 = vld [vmem:[#allocation11 + $0x100] sm:$0xff]  ;;  %v1719_v29 = vld [vmem:[#allocation11 + $0x108] sm:$0xff] }
 0x2d0   : > { %v8307_v32 = vpack.c.bf16 %v1719_v29, %v1718_v28  ;;  %v5958_v29 = vld [vmem:[%s10835_s12] ss:$0 sm:$0xff] }
 0x2d2   : > { %8179 = vmatpush3.bf16.msra.mxu0 %v8178_v34  ;;  %8203 = vmatpush3.bf16.msra.mxu1 %v8202_v35  ;;  %v1376_v34 = vld [vmem:[#allocation10 + $0x1f0] sm:$0xff]  ;;  %v1377_v35 = vld [vmem:[#allocation10 + $0x1f8] sm:$0xff] }
 0x2d3   : > { %8180 = vmatprep.subr.bf16.mxu0 %v9524_v9  ;;  %8204 = vmatprep.subr.bf16.mxu1 %v9524_v9  ;;  %v8256_v37 = vpack.c.bf16 %v1377_v35, %v1376_v34  ;;  %v1720_v34 = vld [vmem:[#allocation11 + $0x110] sm:$0xff]  ;;  %v1721_v35 = vld [vmem:[#allocation11 + $0x118] sm:$0xff] }
 0x2d4   : > { %v8310_v38 = vpack.c.bf16 %v1721_v35, %v1720_v34  ;;  %v5959_v35 = vld [vmem:[%s10835_s12 + $0x1] ss:$0 sm:$0xff] }
 0x2d6   : > { %8182 = vmatpush3.bf16.msra.mxu0 %v8181_v40  ;;  %8206 = vmatpush3.bf16.msra.mxu1 %v8205_v41  ;;  %v1702_v40 = vld [vmem:[#allocation11 + $0x80] sm:$0xff]  ;;  %v1703_v41 = vld [vmem:[#allocation11 + $0x88] sm:$0xff] }
 0x2d7   : > { %8183 = vmatprep.subr.bf16.mxu0 %v9524_v9  ;;  %8207 = vmatprep.subr.bf16.mxu1 %v9524_v9  ;;  %v8283_v43 = vpack.c.bf16 %v1703_v41, %v1702_v40  ;;  %v1722_v40 = vld [vmem:[#allocation11 + $0x120] sm:$0xff]  ;;  %v1723_v41 = vld [vmem:[#allocation11 + $0x128] sm:$0xff] }
 0x2d8   : > { %v8313_v44 = vpack.c.bf16 %v1723_v41, %v1722_v40  ;;  %v5960_v41 = vld [vmem:[%s10835_s12 + $0x2] ss:$0 sm:$0xff] }
 0x2da   : > { %8185 = vmatpush3.bf16.msra.mxu0 %v8184_v46  ;;  %8209 = vmatpush3.bf16.msra.mxu1 %v8208_v47  ;;  %v1704_v46 = vld [vmem:[#allocation11 + $0x90] sm:$0xff]  ;;  %v1705_v47 = vld [vmem:[#allocation11 + $0x98] sm:$0xff] }
 0x2db   : > { %8210 = vmatprep.subr.bf16.mxu0 %v9524_v9  ;;  %8234 = vmatprep.subr.bf16.mxu1 %v9524_v9  ;;  %v8286_v49 = vpack.c.bf16 %v1705_v47, %v1704_v46  ;;  %v1724_v46 = vld [vmem:[#allocation11 + $0x130] sm:$0xff]  ;;  %v1725_v47 = vld [vmem:[#allocation11 + $0x138] sm:$0xff] }
 0x2dc   : > { %v8316_v50 = vpack.c.bf16 %v1725_v47, %v1724_v46  ;;  %v5961_v47 = vld [vmem:[%s10835_s12 + $0x3] ss:$0 sm:$0xff] }
 0x2dd   : > { %6864 = vmatmul.mubr.f32.vlgmr.msra.gmra.mrb[4].mxu0 %v10041_v16  ;;  %6899 = vmatmul.mubr.f32.vlgmr.msra.gmra.mrb[4].mxu1 %v10041_v16 }
 0x2de   : > { %8212 = vmatpush3.bf16.msra.mxu0 %v8211_v52  ;;  %8236 = vmatpush3.bf16.msra.mxu1 %v8235_v53  ;;  %v1706_v52 = vld [vmem:[#allocation11 + $0xa0] sm:$0xff]  ;;  %v1707_v53 = vld [vmem:[#allocation11 + $0xa8] sm:$0xff] }
 0x2df   : > { %8213 = vmatprep.subr.bf16.mxu0 %v9524_v9  ;;  %8237 = vmatprep.subr.bf16.mxu1 %v9524_v9  ;;  %v8289_v55 = vpack.c.bf16 %v1707_v53, %v1706_v52  ;;  %v1726_v52 = vld [vmem:[#allocation11 + $0x140] sm:$0xff]  ;;  %v1727_v53 = vld [vmem:[#allocation11 + $0x148] sm:$0xff] }
 0x2e0   : > { %6933 = vmatprep.mubr.msk.f32.mxu0 %vm9525_vm1, %v9523_v2  ;;  %6968 = vmatprep.mubr.msk.f32.mxu1 %vm9525_vm1, %v9523_v2  ;;  %v8319_v56 = vpack.c.bf16 %v1727_v53, %v1726_v52 }
 0x2e2   : > { %8215 = vmatpush3.bf16.msra.mxu0 %v8214_v58  ;;  %8239 = vmatpush3.bf16.msra.mxu1 %v8238_v59  ;;  %v1708_v58 = vld [vmem:[#allocation11 + $0xb0] sm:$0xff]  ;;  %v1709_v59 = vld [vmem:[#allocation11 + $0xb8] sm:$0xff] }
 0x2e3   : > { %8216 = vmatprep.subr.bf16.mxu0 %v9524_v9  ;;  %8240 = vmatprep.subr.bf16.mxu1 %v9524_v9  ;;  %v8292_v61 = vpack.c.bf16 %v1709_v59, %v1708_v58  ;;  %v1728_v58 = vld [vmem:[#allocation11 + $0x150] sm:$0xff]  ;;  %v1729_v59 = vld [vmem:[#allocation11 + $0x158] sm:$0xff] }
 0x2e4   : > { %v8322_v62 = vpack.c.bf16 %v1729_v59, %v1728_v58 }
 0x2e6   : > { %8218 = vmatpush3.bf16.msra.mxu0 %v8217_v4  ;;  %8242 = vmatpush3.bf16.msra.mxu1 %v8241_v5  ;;  %v1710_v4 = vld [vmem:[#allocation11 + $0xc0] sm:$0xff]  ;;  %v1711_v5 = vld [vmem:[#allocation11 + $0xc8] sm:$0xff] }
 0x2e7   : > { %8219 = vmatprep.subr.bf16.mxu0 %v9524_v9  ;;  %8243 = vmatprep.subr.bf16.mxu1 %v9524_v9  ;;  %v8295_v7 = vpack.c.bf16 %v1711_v5, %v1710_v4  ;;  %v1730_v4 = vld [vmem:[#allocation11 + $0x160] sm:$0xff]  ;;  %v1731_v5 = vld [vmem:[#allocation11 + $0x168] sm:$0xff] }
 0x2e8   : > { %v8325_v8 = vpack.c.bf16 %v1731_v5, %v1730_v4 }
 0x2ea   : > { %8221 = vmatpush3.bf16.msra.mxu0 %v8220_v11  ;;  %8245 = vmatpush3.bf16.msra.mxu1 %v8244_v12  ;;  %v1712_v11 = vld [vmem:[#allocation11 + $0xd0] sm:$0xff]  ;;  %v1713_v12 = vld [vmem:[#allocation11 + $0xd8] sm:$0xff] }
 0x2eb   : > { %8222 = vmatprep.subr.bf16.mxu0 %v9524_v9  ;;  %8246 = vmatprep.subr.bf16.mxu1 %v9524_v9  ;;  %v8298_v14 = vpack.c.bf16 %v1713_v12, %v1712_v11  ;;  %v1732_v11 = vld [vmem:[#allocation11 + $0x170] sm:$0xff]  ;;  %v1733_v12 = vld [vmem:[#allocation11 + $0x178] sm:$0xff] }
 0x2ec   : > { %v8328_v15 = vpack.c.bf16 %v1733_v12, %v1732_v11 }
 0x2ee   : > { %8224 = vmatpush3.bf16.msra.mxu0 %v8223_v18  ;;  %8248 = vmatpush3.bf16.msra.mxu1 %v8247_v19  ;;  %v1714_v18 = vld [vmem:[#allocation11 + $0xe0] sm:$0xff]  ;;  %v1715_v19 = vld [vmem:[#allocation11 + $0xe8] sm:$0xff] }
 0x2ef   : > { %8225 = vmatprep.subr.bf16.mxu0 %v9524_v9  ;;  %8249 = vmatprep.subr.bf16.mxu1 %v9524_v9  ;;  %v8301_v21 = vpack.c.bf16 %v1715_v19, %v1714_v18 }
 0x2f2   : > { %8227 = vmatpush3.bf16.msra.mxu0 %v8226_v24  ;;  %8251 = vmatpush3.bf16.msra.mxu1 %v8250_v25  ;;  %v1716_v24 = vld [vmem:[#allocation11 + $0xf0] sm:$0xff]  ;;  %v1717_v25 = vld [vmem:[#allocation11 + $0xf8] sm:$0xff] }
 0x2f3   : > { %8228 = vmatprep.subr.bf16.mxu0 %v9524_v9  ;;  %8252 = vmatprep.subr.bf16.mxu1 %v9524_v9  ;;  %v8304_v27 = vpack.c.bf16 %v1717_v25, %v1716_v24 }
 0x2f6   : > { %8230 = vmatpush3.bf16.msra.mxu0 %v8229_v30  ;;  %8254 = vmatpush3.bf16.msra.mxu1 %v8253_v31  ;;  %v1734_v30 = vld [vmem:[#allocation11 + $0x180] sm:$0xff]  ;;  %v1735_v31 = vld [vmem:[#allocation11 + $0x188] sm:$0xff] }
 0x2f7   : > { %8231 = vmatprep.subr.bf16.mxu0 %v9524_v9  ;;  %8255 = vmatprep.subr.bf16.mxu1 %v9524_v9  ;;  %v8331_v33 = vpack.c.bf16 %v1735_v31, %v1734_v30 }
 0x2fa   : > { %8233 = vmatpush3.bf16.msra.mxu0 %v8232_v36  ;;  %8257 = vmatpush3.bf16.msra.mxu1 %v8256_v37  ;;  %v1736_v36 = vld [vmem:[#allocation11 + $0x190] sm:$0xff]  ;;  %v1737_v37 = vld [vmem:[#allocation11 + $0x198] sm:$0xff] }
 0x2fb   : > { %8258 = vmatprep.subr.bf16.mxu0 %v9524_v9  ;;  %8282 = vmatprep.subr.bf16.mxu1 %v9524_v9  ;;  %v8334_v39 = vpack.c.bf16 %v1737_v37, %v1736_v36 }
 0x2fd   : > { %6934 = vmatmul.mubr.f32.vlgmr.msra.gmra.mrb[6].mxu0 %v10041_v16  ;;  %6969 = vmatmul.mubr.f32.vlgmr.msra.gmra.mrb[6].mxu1 %v10041_v16 }
 0x2fe   : > { %8260 = vmatpush3.bf16.msra.mxu0 %v8259_v42  ;;  %8284 = vmatpush3.bf16.msra.mxu1 %v8283_v43  ;;  %v1738_v42 = vld [vmem:[#allocation11 + $0x1a0] sm:$0xff]  ;;  %v1739_v43 = vld [vmem:[#allocation11 + $0x1a8] sm:$0xff] }
 0x2ff   : > { %8261 = vmatprep.subr.bf16.mxu0 %v9524_v9  ;;  %8285 = vmatprep.subr.bf16.mxu1 %v9524_v9  ;;  %v8337_v45 = vpack.c.bf16 %v1739_v43, %v1738_v42 }
 0x300   : > { %7003 = vmatprep.mubr.msk.f32.mxu0 %vm9525_vm1, %v9523_v2  ;;  %7038 = vmatprep.mubr.msk.f32.mxu1 %vm9525_vm1, %v9523_v2 }
 0x302   : > { %8263 = vmatpush3.bf16.msra.mxu0 %v8262_v48  ;;  %8287 = vmatpush3.bf16.msra.mxu1 %v8286_v49  ;;  %v1740_v48 = vld [vmem:[#allocation11 + $0x1b0] sm:$0xff]  ;;  %v1741_v49 = vld [vmem:[#allocation11 + $0x1b8] sm:$0xff] }
 0x303   : > { %8264 = vmatprep.subr.bf16.mxu0 %v9524_v9  ;;  %8288 = vmatprep.subr.bf16.mxu1 %v9524_v9  ;;  %v8340_v51 = vpack.c.bf16 %v1741_v49, %v1740_v48 }
 0x306   : > { %8266 = vmatpush3.bf16.msra.mxu0 %v8265_v54  ;;  %8290 = vmatpush3.bf16.msra.mxu1 %v8289_v55  ;;  %v1742_v54 = vld [vmem:[#allocation11 + $0x1c0] sm:$0xff]  ;;  %v1743_v55 = vld [vmem:[#allocation11 + $0x1c8] sm:$0xff] }
 0x307   : > { %8267 = vmatprep.subr.bf16.mxu0 %v9524_v9  ;;  %8291 = vmatprep.subr.bf16.mxu1 %v9524_v9  ;;  %v8343_v57 = vpack.c.bf16 %v1743_v55, %v1742_v54 }
 0x30a   : > { %8269 = vmatpush3.bf16.msra.mxu0 %v8268_v60  ;;  %8293 = vmatpush3.bf16.msra.mxu1 %v8292_v61  ;;  %v1744_v60 = vld [vmem:[#allocation11 + $0x1d0] sm:$0xff]  ;;  %v1745_v61 = vld [vmem:[#allocation11 + $0x1d8] sm:$0xff] }
 0x30b   : > { %8270 = vmatprep.subr.bf16.mxu0 %v9524_v9  ;;  %8294 = vmatprep.subr.bf16.mxu1 %v9524_v9  ;;  %v8346_v63 = vpack.c.bf16 %v1745_v61, %v1744_v60  ;;  %v901_v60 = vld [vmem:[%s893_s20] sm:$0x1]  ;;  %v900_v61 = vshrl.u32 %v894_v0, 7  ;;  %s10843_s20 = sld [smem:[#allocation45_spill]] }
 0x30c   : > { %vm902_vm2 = vcmp.gt.f32.partialorder %v901_v60, 0.5 }
 0x30d   : > { %vm903_vm3 = vcmp.gt.s32.totalorder %v10006_v1, %v900_v61 }
 0x30e   : > { %8272 = vmatpush3.bf16.msra.mxu0 %v8271_v6  ;;  %8296 = vmatpush3.bf16.msra.mxu1 %v8295_v7  ;;  %v1746_v6 = vld [vmem:[#allocation11 + $0x1e0] sm:$0xff]  ;;  %v1747_v7 = vld [vmem:[#allocation11 + $0x1e8] sm:$0xff] }
 0x30f   : > { %8273 = vmatprep.subr.bf16.mxu0 %v9524_v9  ;;  %8297 = vmatprep.subr.bf16.mxu1 %v9524_v9  ;;  %v8349_v10 = vpack.c.bf16 %v1747_v7, %v1746_v6 }
 0x312   : > { %8275 = vmatpush3.bf16.msra.mxu0 %v8274_v13  ;;  %8299 = vmatpush3.bf16.msra.mxu1 %v8298_v14  ;;  %v1748_v13 = vld [vmem:[#allocation11 + $0x1f0] sm:$0xff]  ;;  %v1749_v14 = vld [vmem:[#allocation11 + $0x1f8] sm:$0xff] }
 0x313   : > { %8276 = vmatprep.subr.bf16.mxu0 %v9524_v9  ;;  %8300 = vmatprep.subr.bf16.mxu1 %v9524_v9  ;;  %v8352_v17 = vpack.c.bf16 %v1749_v14, %v1748_v13 }
 0x316   : > { %8278 = vmatpush3.bf16.msra.mxu0 %v8277_v20  ;;  %8302 = vmatpush3.bf16.msra.mxu1 %v8301_v21 }
 0x317   : > { %8279 = vmatprep.subr.bf16.mxu0 %v9524_v9  ;;  %8303 = vmatprep.subr.bf16.mxu1 %v9524_v9 }
 0x31a   : > { %8281 = vmatpush3.bf16.msra.mxu0 %v8280_v26  ;;  %8305 = vmatpush3.bf16.msra.mxu1 %v8304_v27  ;;  %v5962_v26 = vld [vmem:[%s10834_s19] ss:$0 sm:$0xff] }
 0x31b   : > { %8306 = vmatprep.subr.bf16.mxu0 %v9524_v9  ;;  %8330 = vmatprep.subr.bf16.mxu1 %v9524_v9 }
 0x31d   : > { %7004 = vmatmul.mubr.f32.vlgmr.msra.gmra.mrb[8].mxu0 %v10041_v16  ;;  %7039 = vmatmul.mubr.f32.vlgmr.msra.gmra.mrb[8].mxu1 %v10041_v16 }
 0x31e   : > { %8308 = vmatpush3.bf16.msra.mxu0 %v8307_v32  ;;  %8332 = vmatpush3.bf16.msra.mxu1 %v8331_v33  ;;  %v5963_v33 = vld [vmem:[%s10834_s19 + $0x1] ss:$0 sm:$0xff] }
 0x31f   : > { %8309 = vmatprep.subr.bf16.mxu0 %v9524_v9  ;;  %8333 = vmatprep.subr.bf16.mxu1 %v9524_v9 }
 0x320   : > { %7073 = vmatprep.mubr.msk.f32.mxu0 %vm9525_vm1, %v9523_v2  ;;  %7108 = vmatprep.mubr.msk.f32.mxu1 %vm9525_vm1, %v9523_v2 }
 0x322   : > { %8311 = vmatpush3.bf16.msra.mxu0 %v8310_v38  ;;  %8335 = vmatpush3.bf16.msra.mxu1 %v8334_v39  ;;  %v5964_v38 = vld [vmem:[%s10834_s19 + $0x2] ss:$0 sm:$0xff] }
 0x323   : > { %8312 = vmatprep.subr.bf16.mxu0 %v9524_v9  ;;  %8336 = vmatprep.subr.bf16.mxu1 %v9524_v9 }
 0x326   : > { %8314 = vmatpush3.bf16.msra.mxu0 %v8313_v44  ;;  %8338 = vmatpush3.bf16.msra.mxu1 %v8337_v45  ;;  %v5965_v45 = vld [vmem:[%s10834_s19 + $0x3] ss:$0 sm:$0xff] }
 0x327   : > { %8315 = vmatprep.subr.bf16.mxu0 %v9524_v9  ;;  %8339 = vmatprep.subr.bf16.mxu1 %v9524_v9 }
 0x32a   : > { %8317 = vmatpush3.bf16.msra.mxu0 %v8316_v50  ;;  %8341 = vmatpush3.bf16.msra.mxu1 %v8340_v51  ;;  %v5966_v50 = vld [vmem:[%s10836_s9] ss:$0 sm:$0xff] }
 0x32b   : > { %8318 = vmatprep.subr.bf16.mxu0 %v9524_v9  ;;  %8342 = vmatprep.subr.bf16.mxu1 %v9524_v9 }
 0x32e   : > { %8320 = vmatpush3.bf16.msra.mxu0 %v8319_v56  ;;  %8344 = vmatpush3.bf16.msra.mxu1 %v8343_v57 }
 0x32f   : > { %8321 = vmatprep.subr.bf16.mxu0 %v9524_v9  ;;  %8345 = vmatprep.subr.bf16.mxu1 %v9524_v9 }
 0x332   : > { %8323 = vmatpush3.bf16.msra.mxu0 %v8322_v62  ;;  %8347 = vmatpush3.bf16.msra.mxu1 %v8346_v63  ;;  %v907_v62 = vsub.s32 0, %v900_v61  ;;  %v9526_v63 = vmov 0   ;;  %v2685_v61 = vld [vmem:[#allocation13 + $0x50] sm:$0xff] }
 0x333   : > { %8324 = vmatprep.subr.bf16.mxu0 %v9524_v9  ;;  %8348 = vmatprep.subr.bf16.mxu1 %v9524_v9  ;;  %v904_v4 = vsel %vm902_vm2, 1, %v9526_v63 }
 0x334   : > { %v908_v5 = vrot.slane %v904_v4, %v907_v62  ;;  %v2686_v62 = vld [vmem:[#allocation13 + $0x58] sm:$0xff]  ;;  %v2687_v4 = vld [vmem:[#allocation13 + $0x60] sm:$0xff] }
 0x335   : > { %v8370_v63 = vpack.c.bf16 %v2686_v62, %v2685_v61 }
 0x336   : > { %8326 = vmatpush3.bf16.msra.mxu0 %v8325_v8  ;;  %8350 = vmatpush3.bf16.msra.mxu1 %v8349_v10  ;;  %vm909_vm4 = vcmp.eq.s32.totalorder %v908_v5, 1  ;;  %v2688_v5 = vld [vmem:[#allocation13 + $0x68] sm:$0xff] }
 0x337   : > { %8327 = vmatprep.subr.bf16.mxu0 %v9524_v9  ;;  %8351 = vmatprep.subr.bf16.mxu1 %v9524_v9  ;;  %vm910_vm5 = vmor %vm903_vm3, %vm909_vm4 }
 0x338   : > { %v10213_v6 = vsel %vm910_vm5, -1e+30, %v9523_v2 }
 0x33a   : > { %8329 = vmatpush3.bf16.msra.mxu0 %v8328_v15  ;;  %8353 = vmatpush3.bf16.msra.mxu1 %v8352_v17 }
 0x33b   : > { %7111 = vmatprep.subr.mxu1 %v9523_v2  ;;  %8354 = vmatprep.subr.bf16.mxu0 %v9524_v9 }
 0x33d   : > { %7074 = vmatmul.mubr.f32.vlgmr.msra.gmra.mrb[10].mxu0 %v10041_v16  ;;  %7109 = vmatmul.mubr.f32.vlgmr.msra.gmra.mrb[10].mxu1 %v10041_v16 }
 0x33e   : > { %7113 = vmatprep.mubr.msk.f32.mxu1 %vm9525_vm1, %v9523_v2  ;;  %7183 = vmatprep.mubr.msk.f32.mxu0 %vm9525_vm1, %v9523_v2 }
 0x370   : > { %v1100_v18 = vpop.f32.mrb[0].mxu0  ;;  %v1170_v19 = vpop.f32.mrb[0].mxu1 }
 0x371   : > { %v6725_v20 = vpop.f32.mrb[1].mxu0  ;;  %v6760_v21 = vpop.f32.mrb[1].mxu1  ;;  %v1101_v34 = vadd.f32 %v5958_v29, %v1100_v18  ;;  %v1171_v37 = vadd.f32 %v5959_v35, %v1170_v19 }
 0x390   : > { %v1240_v22 = vpop.f32.mrb[2].mxu0  ;;  %v1310_v23 = vpop.f32.mrb[2].mxu1 }
 0x391   : > { %v6795_v24 = vpop.f32.mrb[3].mxu0  ;;  %v6830_v25 = vpop.f32.mrb[3].mxu1  ;;  %v1241_v46 = vadd.f32 %v5960_v41, %v1240_v22  ;;  %v1311_v49 = vadd.f32 %v5961_v47, %v1310_v23  ;;  %v2678_v47 = vld [vmem:[#allocation13 + $0x18] sm:$0xff] }
 0x3b0   : > { %v1472_v27 = vpop.f32.mrb[4].mxu0  ;;  %v1542_v28 = vpop.f32.mrb[4].mxu1 }
 0x3b1   : > { %v1473_v30 = vadd.f32 %v5962_v26, %v1472_v27  ;;  %v6865_v31 = vpop.f32.mrb[5].mxu0  ;;  %v6900_v32 = vpop.f32.mrb[5].mxu1  ;;  %v1543_v36 = vadd.f32 %v5963_v33, %v1542_v28 }
 0x3b3   : > { %7112 = vmatpush3.xpose.msra.mxu1 %v1473_v30 }
 0x3b4   : > { %7116 = vmatprep.subr.mxu1 %v9523_v2 }
 0x3b6   : > { %7114 = vmatmul.mubr.f32.vlgmr.msra.gmra.mrb[12].mxu1 %v1101_v34 }
 0x3b7   : > { %7117 = vmatpush3.xpose.msra.mxu1 %v1543_v36  ;;  %7118 = vmatprep.mubr.msk.f32.mxu1 %vm9525_vm1, %v9523_v2 }
 0x3b8   : > { %7121 = vmatprep.subr.mxu1 %v9523_v2 }
 0x3ba   : > { %7119 = vmatmul.mubr.f32.vlgmr.msra.gmra.mrb[14].mxu1 %v1171_v37 }
 0x3bb   : > { %7123 = vmatprep.mubr.msk.f32.mxu1 %vm9525_vm1, %v9523_v2 }
 0x3d0   : > { %v1612_v39 = vpop.f32.mrb[6].mxu0  ;;  %v1682_v40 = vpop.f32.mrb[6].mxu1 }
 0x3d1   : > { %v1613_v42 = vadd.f32 %v5964_v38, %v1612_v39  ;;  %v6935_v43 = vpop.f32.mrb[7].mxu0  ;;  %v6970_v44 = vpop.f32.mrb[7].mxu1  ;;  %v1683_v48 = vadd.f32 %v5965_v45, %v1682_v40  ;;  %v2677_v45 = vld [vmem:[#allocation13 + $0x10] sm:$0xff] }
 0x3d2   : > { %v2675_v43 = vld [vmem:[#allocation13] sm:$0xff]  ;;  %v2676_v44 = vld [vmem:[#allocation13 + $0x8] sm:$0xff] }
 0x3d3   : > { %7122 = vmatpush3.xpose.msra.mxu1 %v1613_v42 }
 0x3d4   : > { %7126 = vmatprep.subr.mxu1 %v9523_v2 }
 0x3d6   : > { %7124 = vmatmul.mubr.f32.vlgmr.msra.gmra.mrb[16].mxu1 %v1241_v46  ;;  %v8355_v46 = vpack.c.bf16 %v2676_v44, %v2675_v43  ;;  %v2703_v44 = vld [vmem:[#allocation13 + $0xe0] sm:$0xff] }
 0x3d7   : > { %7127 = vmatpush3.xpose.msra.mxu1 %v1683_v48  ;;  %7128 = vmatprep.mubr.msk.f32.mxu1 %vm9525_vm1, %v9523_v2  ;;  %v8358_v48 = vpack.c.bf16 %v2678_v47, %v2677_v45  ;;  %v2704_v45 = vld [vmem:[#allocation13 + $0xe8] sm:$0xff]  ;;  %v2705_v47 = vld [vmem:[#allocation13 + $0xf0] sm:$0xff] }
 0x3d8   : > { %7131 = vmatprep.subr.mxu1 %v9523_v2  ;;  %8356 = vmatpush3.bf16.msra.mxu0 %v8355_v46  ;;  %v8397_v46 = vpack.c.bf16 %v2704_v45, %v2703_v44 }
 0x3d9   : > { %8357 = vmatprep.subr.bf16.mxu0 %v9524_v9 }
 0x3da   : > { %7129 = vmatmul.mubr.f32.vlgmr.msra.gmra.mrb[18].mxu1 %v1311_v49  ;;  %v2679_v49 = vld [vmem:[#allocation13 + $0x20] sm:$0xff] }
 0x3db   : > { %7133 = vmatprep.mubr.msk.f32.mxu1 %vm9525_vm1, %v9523_v2 }
 0x3dc   : > { %8359 = vmatpush3.bf16.msra.mxu0 %v8358_v48  ;;  %v2706_v48 = vld [vmem:[#allocation13 + $0xf8] sm:$0xff] }
 0x3dd   : > { %8360 = vmatprep.subr.bf16.mxu0 %v9524_v9 }
 0x3f0   : > { %v1844_v51 = vpop.f32.mrb[8].mxu0  ;;  %v10198_v52 = vpop.f32.mrb[8].mxu1 }
 0x3f1   : > { %v1845_v53 = vadd.f32 %v5966_v50, %v1844_v51  ;;  %v7005_v54 = vpop.f32.mrb[9].mxu0  ;;  %v7040_v55 = vpop.f32.mrb[9].mxu1  ;;  %v2680_v50 = vld [vmem:[#allocation13 + $0x28] sm:$0xff] }
 0x3f2   : > { %v8361_v51 = vpack.c.bf16 %v2680_v50, %v2679_v49  ;;  %v2682_v54 = vld [vmem:[#allocation13 + $0x38] sm:$0xff]  ;;  %v8400_v49 = vpack.c.bf16 %v2706_v48, %v2705_v47  ;;  %v2707_v50 = vld [vmem:[#allocation13 + $0x100] sm:$0xff] }
 0x3f3   : > { %7132 = vmatpush3.msra.mxu1 %v1845_v53  ;;  %v2681_v53 = vld [vmem:[#allocation13 + $0x30] sm:$0xff] }
 0x3f4   : > { %7136 = vmatprep.subr.mxu1 %v9523_v2  ;;  %8362 = vmatpush3.bf16.msra.mxu0 %v8361_v51  ;;  %v8364_v55 = vpack.c.bf16 %v2682_v54, %v2681_v53  ;;  %v2708_v51 = vld [vmem:[#allocation13 + $0x108] sm:$0xff]  ;;  %v2709_v54 = vld [vmem:[#allocation13 + $0x110] sm:$0xff] }
 0x3f5   : > { %8363 = vmatprep.subr.bf16.mxu0 %v9524_v9  ;;  %v8403_v53 = vpack.c.bf16 %v2708_v51, %v2707_v50 }
 0x3f8   : > { %8365 = vmatpush3.bf16.msra.mxu0 %v8364_v55  ;;  %v2710_v55 = vld [vmem:[#allocation13 + $0x118] sm:$0xff] }
 0x3f9   : > { %8366 = vmatprep.subr.bf16.mxu0 %v9524_v9  ;;  %v8406_v62 = vpack.c.bf16 %v2710_v55, %v2709_v54 }
 0x410   : > { %v10201_v56 = vpop.f32.mrb[10].mxu0  ;;  %v10203_v57 = vpop.f32.mrb[10].mxu1 }
 0x411   : > { %v7075_v58 = vpop.f32.mrb[11].mxu0  ;;  %v7110_v59 = vpop.f32.mrb[11].mxu1 }
 0x412   : > { %v2683_v58 = vld [vmem:[#allocation13 + $0x40] sm:$0xff]  ;;  %v2684_v59 = vld [vmem:[#allocation13 + $0x48] sm:$0xff] }
 0x413   : > { %v8367_v60 = vpack.c.bf16 %v2684_v59, %v2683_v58  ;;  %v2723_v58 = vld [vmem:[#allocation13 + $0x180] sm:$0xff]  ;;  %v2724_v59 = vld [vmem:[#allocation13 + $0x188] sm:$0xff] }
 0x415   : > { %8368 = vmatpush3.bf16.msra.mxu0 %v8367_v60 }
 0x416   : > { %8369 = vmatprep.subr.bf16.mxu0 %v9524_v9 }
 0x419   : > { %8371 = vmatpush3.bf16.msra.mxu0 %v8370_v63  ;;  %v8427_v63 = vpack.c.bf16 %v2724_v59, %v2723_v58  ;;  %v5974_v59 = vld [vmem:[%s10838_s11] ss:$0 sm:$0xff] }
 0x41a   : > { %8372 = vmatprep.subr.bf16.mxu0 %v9524_v9 }
 0x489   : > { %v2124_v7 = vpop.f32.mrb[12].mxu1 }
 0x48a   : > { %v2125_v8 = vadd.f32 %v2124_v7, %v10213_v6  ;;  %v7115_v10 = vpop.f32.mrb[13].mxu1  ;;  %v8373_v7 = vpack.c.bf16 %v2688_v5, %v2687_v4  ;;  %v2711_v4 = vld [vmem:[#allocation13 + $0x120] sm:$0xff]  ;;  %v2712_v5 = vld [vmem:[#allocation13 + $0x128] sm:$0xff] }
 0x48b   : > { %v2690_v10 = vld [vmem:[#allocation13 + $0x78] sm:$0xff] }
 0x48c   : > { %v2339_v11 = vsel %vm2338_vm6, %v2125_v8, -inf  ;;  %8374 = vmatpush3.bf16.msra.mxu0 %v8373_v7  ;;  %v2725_v7 = vld [vmem:[#allocation13 + $0x190] sm:$0xff] }
 0x48d   : > { %v2194_v0 = vpop.f32.mrb[14].mxu1  ;;  %2340 = vmax.xlane.f32.xlu1 %v2339_v11  ;;  %8375 = vmatprep.subr.bf16.mxu0 %v9524_v9 }
 0x48e   : > { %v2195_v12 = vadd.f32 %v2194_v0, %v10213_v6  ;;  %v7120_v13 = vpop.f32.mrb[15].mxu1 }
 0x48f   : > { %v5967_v13 = vld [vmem:[%s10836_s9 + $0x1] ss:$0 sm:$0xff] }
 0x490   : > { %v2342_v14 = vsel %vm2338_vm6, %v2195_v12, -inf }
 0x491   : > { %2343 = vmax.xlane.f32.xlu1 %v2342_v14 }
 0x4a9   : > { %v2264_v1 = vpop.f32.mrb[16].mxu1 }
 0x4aa   : > { %v2265_v15 = vadd.f32 %v2264_v1, %v10213_v6  ;;  %v7125_v17 = vpop.f32.mrb[17].mxu1 }
 0x4ab   : > { %v5968_v17 = vld [vmem:[%s10836_s9 + $0x2] ss:$0 sm:$0xff] }
 0x4ac   : > { %v2345_v18 = vsel %vm2338_vm6, %v2265_v15, -inf }
 0x4ad   : > { %v2334_v19 = vpop.f32.mrb[18].mxu1  ;;  %2346 = vmax.xlane.f32.xlu0 %v2345_v18 }
 0x4ae   : > { %v2335_v20 = vadd.f32 %v2334_v19, %v10213_v6  ;;  %v7130_v21 = vpop.f32.mrb[19].mxu1 }
 0x4b0   : > { %v2348_v22 = vsel %vm2338_vm6, %v2335_v20, -inf }
 0x4b1   : > { %2349 = vmax.xlane.f32.xlu1 %v2348_v22  ;;  %v5969_v22 = vld [vmem:[%s10836_s9 + $0x3] ss:$0 sm:$0xff] }
 0x51a   : > { %v2341_v23 = vpop.xlane.xlu1 %2340 }
 0x51b   : > { %v2351_v24 = vsub.f32 %v2125_v8, %v2341_v23  ;;  %v2689_v8 = vld [vmem:[#allocation13 + $0x70] sm:$0xff] }
 0x51c   : > { %v8376_v11 = vpack.c.bf16 %v2690_v10, %v2689_v8  ;;  %v2726_v8 = vld [vmem:[#allocation13 + $0x198] sm:$0xff] }
 0x51d   : > { %v2355_v25 = vmul.f32 1.442695, %v2351_v24 }
 0x51e   : > { %v2344_v26 = vpop.xlane.xlu1 %2343  ;;  %8377 = vmatpush3.bf16.msra.mxu0 %v8376_v11 }
 0x51f   : > { %9099 = vpow2.f32 %v2355_v25  ;;  %v2352_v27 = vsub.f32 %v2195_v12, %v2344_v26  ;;  %8402 = vmatprep.subr.bf16.mxu0 %v9524_v9  ;;  %v2692_v25 = vld [vmem:[#allocation13 + $0x88] sm:$0xff]  ;;  %v2055_v26 = vadd.f32 %v5969_v22, %v10203_v57  ;;  %v2695_v57 = vld [vmem:[#allocation13 + $0xa0] sm:$0xff] }
 0x521   : > { %v2357_v28 = vmul.f32 1.442695, %v2352_v27 }
 0x523   : > { %9101 = vpow2.f32 %v2357_v28 }
 0x529   : > { %v10223_v29 = vpop.eup %9099 }
 0x52a   : > { %v2363_v30 = vsel %vm2338_vm6, %v10223_v29, 0.0 }
 0x52b   : > { %2364 = vadd.xlane.f32.xlu0 %v2363_v30  ;;  %v2693_v30 = vld [vmem:[#allocation13 + $0x90] sm:$0xff] }
 0x52d   : > { %v10227_v31 = vpop.eup %9101 }
 0x52e   : > { %v2366_v32 = vsel %vm2338_vm6, %v10227_v31, 0.0 }
 0x52f   : > { %2367 = vadd.xlane.f32.xlu1 %v2366_v32 }
 0x53a   : > { %v2347_v33 = vpop.xlane.xlu0 %2346 }
 0x53b   : > { %v2353_v34 = vsub.f32 %v2265_v15, %v2347_v33  ;;  %v1915_v15 = vadd.f32 %v5967_v13, %v10198_v52  ;;  %v2696_v33 = vld [vmem:[#allocation13 + $0xa8] sm:$0xff]  ;;  %v2713_v13 = vld [vmem:[#allocation13 + $0x130] sm:$0xff] }
 0x53d   : > { %v2359_v35 = vmul.f32 1.442695, %v2353_v34  ;;  %v8385_v34 = vpack.c.bf16 %v2696_v33, %v2695_v57 }
 0x53e   : > { %v2350_v36 = vpop.xlane.xlu1 %2349 }
 0x53f   : > { %9103 = vpow2.f32 %v2359_v35  ;;  %v2354_v37 = vsub.f32 %v2335_v20, %v2350_v36  ;;  %v1985_v20 = vadd.f32 %v5968_v17, %v10201_v56  ;;  %v2691_v56 = vld [vmem:[#allocation13 + $0x80] sm:$0xff]  ;;  %v2697_v35 = vld [vmem:[#allocation13 + $0xb0] sm:$0xff]  ;;  %v2698_v36 = vld [vmem:[#allocation13 + $0xb8] sm:$0xff] }
 0x540   : > { %v8379_v28 = vpack.c.bf16 %v2692_v25, %v2691_v56  ;;  %v2718_v56 = vld [vmem:[#allocation13 + $0x158] sm:$0xff]  ;;  %v2731_v25 = vld [vmem:[#allocation13 + $0x1c0] sm:$0xff] }
 0x541   : > { %v2361_v38 = vmul.f32 1.442695, %v2354_v37  ;;  %v8388_v37 = vpack.c.bf16 %v2698_v36, %v2697_v35  ;;  %v2722_v35 = vld [vmem:[#allocation13 + $0x178] sm:$0xff]  ;;  %v2735_v36 = vld [vmem:[#allocation13 + $0x1e0] sm:$0xff] }
 0x543   : > { %9105 = vpow2.f32 %v2361_v38  ;;  %v2699_v38 = vld [vmem:[#allocation13 + $0xc0] sm:$0xff] }
 0x549   : > { %v10231_v39 = vpop.eup %9103 }
 0x54a   : > { %v2369_v40 = vsel %vm2338_vm6, %v10231_v39, 0.0 }
 0x54b   : > { %2370 = vadd.xlane.f32.xlu0 %v2369_v40 }
 0x54d   : > { %v10235_v41 = vpop.eup %9105 }
 0x54e   : > { %v2372_v42 = vsel %vm2338_vm6, %v10235_v41, 0.0 }
 0x54f   : > { %2373 = vadd.xlane.f32.xlu1 %v2372_v42  ;;  %v2702_v42 = vld [vmem:[#allocation13 + $0xd8] sm:$0xff] }
 0x5b8   : > { %v2365_v0 = vpop.xlane.xlu0 %2364 }
 0x5b9   : > { %9107 = vrcp.f32 %v2365_v0  ;;  %v8409_v0 = vpack.c.bf16 %v2712_v5, %v2711_v4  ;;  %v3060_v5 = vld [vmem:[#allocation14] sm:$0xff] }
 0x5bc   : > { %v2368_v12 = vpop.xlane.xlu1 %2367 }
 0x5bd   : > { %9109 = vrcp.f32 %v2368_v12  ;;  %v8430_v12 = vpack.c.bf16 %v2726_v8, %v2725_v7  ;;  %v3061_v7 = vld [vmem:[#allocation14 + $0x8] sm:$0xff]  ;;  %v3062_v8 = vld [vmem:[#allocation14 + $0x10] sm:$0xff] }
 0x5c3   : > { %v9108_v14 = vpop.eup %9107 }
 0x5c4   : > { %v2379_v1 = vmul.f32 %v9108_v14, %v10223_v29  ;;  %v2714_v14 = vld [vmem:[#allocation13 + $0x138] sm:$0xff] }
 0x5c5   : > { %v8412_v17 = vpack.c.bf16 %v2714_v14, %v2713_v13  ;;  %v3065_v13 = vld [vmem:[#allocation14 + $0x28] sm:$0xff] }
 0x5c6   : > { %7134 = vmatmul.mubr.msk.f32.vlgmr.msra.gmra.mrb[20].mxu1 %vm2338_vm6, %v2379_v1  ;;  %v2727_v1 = vld [vmem:[#allocation13 + $0x1a0] sm:$0xff] }
 0x5c7   : > { %v9110_v18 = vpop.eup %9109  ;;  %7137 = vmatpush3.msra.mxu1 %v1915_v15  ;;  %7138 = vmatprep.mubr.msk.f32.mxu1 %vm9525_vm1, %v9523_v2  ;;  %v2728_v15 = vld [vmem:[#allocation13 + $0x1a8] sm:$0xff] }
 0x5c8   : > { %v2380_v19 = vmul.f32 %v9110_v18, %v10227_v31  ;;  %7141 = vmatprep.subr.mxu1 %v9523_v2  ;;  %v2694_v31 = vld [vmem:[#allocation13 + $0x98] sm:$0xff]  ;;  %v8433_v18 = vpack.c.bf16 %v2728_v15, %v2727_v1 }
 0x5c9   : > { %v8382_v32 = vpack.c.bf16 %v2694_v31, %v2693_v30  ;;  %v2720_v30 = vld [vmem:[#allocation13 + $0x168] sm:$0xff]  ;;  %v2733_v31 = vld [vmem:[#allocation13 + $0x1d0] sm:$0xff] }
 0x5ca   : > { %7139 = vmatmul.mubr.msk.f32.vlgmr.msra.gmra.mrb[22].mxu1 %vm2338_vm6, %v2380_v19  ;;  %v2715_v19 = vld [vmem:[#allocation13 + $0x140] sm:$0xff] }
 0x5cb   : > { %7142 = vmatpush3.msra.mxu1 %v1985_v20  ;;  %7143 = vmatprep.mubr.msk.f32.mxu1 %vm9525_vm1, %v9523_v2  ;;  %v2716_v20 = vld [vmem:[#allocation13 + $0x148] sm:$0xff] }
 0x5cc   : > { %7146 = vmatprep.subr.mxu1 %v9523_v2  ;;  %v8415_v22 = vpack.c.bf16 %v2716_v20, %v2715_v19  ;;  %v3066_v19 = vld [vmem:[#allocation14 + $0x30] sm:$0xff]  ;;  %v3067_v20 = vld [vmem:[#allocation14 + $0x38] sm:$0xff] }
 0x5d8   : > { %v2371_v52 = vpop.xlane.xlu0 %2370 }
 0x5d9   : > { %9111 = vrcp.f32 %v2371_v52  ;;  %v2729_v52 = vld [vmem:[#allocation13 + $0x1b0] sm:$0xff] }
 0x5dc   : > { %v2374_v21 = vpop.xlane.xlu1 %2373 }
 0x5dd   : > { %9113 = vrcp.f32 %v2374_v21  ;;  %v2730_v21 = vld [vmem:[#allocation13 + $0x1b8] sm:$0xff] }
 0x5e3   : > { %v9112_v23 = vpop.eup %9111 }
 0x5e4   : > { %v2381_v24 = vmul.f32 %v9112_v23, %v10231_v39  ;;  %v2700_v39 = vld [vmem:[#allocation13 + $0xc8] sm:$0xff]  ;;  %v8436_v23 = vpack.c.bf16 %v2730_v21, %v2729_v52  ;;  %v8460_v52 = vpack.c.bf16 %v3067_v20, %v3066_v19  ;;  %v3068_v21 = vld [vmem:[#allocation14 + $0x40] sm:$0xff] }
 0x5e5   : > { %v8391_v40 = vpack.c.bf16 %v2700_v39, %v2699_v38  ;;  %v3279_v19 = vld [vmem:[#allocation8 + $0x208] sm:$0xff]  ;;  %v3294_v20 = vld [vmem:[#allocation8 + $0x280] sm:$0xff] }
 0x5e6   : > { %7144 = vmatmul.mubr.msk.f32.vlgmr.msra.gmra.mrb[24].mxu1 %vm2338_vm6, %v2381_v24  ;;  %v2717_v24 = vld [vmem:[#allocation13 + $0x150] sm:$0xff] }
 0x5e7   : > { %v9114_v27 = vpop.eup %9113  ;;  %7147 = vmatpush3.msra.mxu1 %v2055_v26  ;;  %7148 = vmatprep.mubr.msk.f32.mxu1 %vm9525_vm1, %v9523_v2  ;;  %v2732_v26 = vld [vmem:[#allocation13 + $0x1c8] sm:$0xff] }
 0x5e8   : > { %v2382_v29 = vmul.f32 %v9114_v27, %v10235_v41  ;;  %8378 = vmatprep.subr.bf16.mxu1 %v9524_v9  ;;  %v2701_v41 = vld [vmem:[#allocation13 + $0xd0] sm:$0xff]  ;;  %v8418_v27 = vpack.c.bf16 %v2718_v56, %v2717_v24  ;;  %v3071_v56 = vld [vmem:[#allocation14 + $0x58] sm:$0xff] }
 0x5e9   : > { %v8394_v43 = vpack.c.bf16 %v2702_v42, %v2701_v41  ;;  %v2738_v41 = vld [vmem:[#allocation13 + $0x1f8] sm:$0xff] }
 0x5ea   : > { %7149 = vmatmul.mubr.msk.f32.vlgmr.msra.gmra.mrb[26].mxu1 %vm2338_vm6, %v2382_v29  ;;  %v2719_v29 = vld [vmem:[#allocation13 + $0x160] sm:$0xff] }
 0x5eb   : > { %8380 = vmatpush3.bf16.msra.mxu1 %v8379_v28  ;;  %7218 = vmatprep.mubr.msk.f32.mxu1 %vm9525_vm1, %v9523_v2  ;;  %v8439_v28 = vpack.c.bf16 %v2732_v26, %v2731_v25  ;;  %v8421_v57 = vpack.c.bf16 %v2720_v30, %v2719_v29  ;;  %v3072_v26 = vld [vmem:[#allocation14 + $0x60] sm:$0xff]  ;;  %v3074_v29 = vld [vmem:[#allocation14 + $0x70] sm:$0xff]  ;;  %v3075_v30 = vld [vmem:[#allocation14 + $0x78] sm:$0xff] }
 0x5ec   : > { %8381 = vmatprep.subr.bf16.mxu1 %v9524_v9 }
 0x5ef   : > { %8383 = vmatpush3.bf16.msra.mxu1 %v8382_v32  ;;  %v2734_v32 = vld [vmem:[#allocation13 + $0x1d8] sm:$0xff] }
 0x5f0   : > { %8384 = vmatprep.subr.bf16.mxu1 %v9524_v9  ;;  %v8442_v33 = vpack.c.bf16 %v2734_v32, %v2733_v31  ;;  %v8472_v31 = vpack.c.bf16 %v3075_v30, %v3074_v29  ;;  %v3154_v32 = vld [vmem:[#allocation16] sm:$0xff]  ;;  %v3283_v29 = vld [vmem:[#allocation8 + $0x228] sm:$0xff] }
 0x5f1   : > { %v3298_v30 = vld [vmem:[#allocation8 + $0x2a0] sm:$0xff] }
 0x5f3   : > { %8386 = vmatpush3.bf16.msra.mxu1 %v8385_v34  ;;  %v2721_v34 = vld [vmem:[#allocation13 + $0x170] sm:$0xff] }
 0x5f4   : > { %8387 = vmatprep.subr.bf16.mxu1 %v9524_v9  ;;  %v8424_v38 = vpack.c.bf16 %v2722_v35, %v2721_v34  ;;  %v3157_v35 = vld [vmem:[#allocation16 + $0x18] sm:$0xff] }
 0x5f7   : > { %8389 = vmatpush3.bf16.msra.mxu1 %v8388_v37  ;;  %v2736_v37 = vld [vmem:[#allocation13 + $0x1e8] sm:$0xff] }
 0x5f8   : > { %8390 = vmatprep.subr.bf16.mxu1 %v9524_v9  ;;  %v8445_v39 = vpack.c.bf16 %v2736_v37, %v2735_v36  ;;  %v3158_v37 = vld [vmem:[#allocation16 + $0x20] sm:$0xff] }
 0x5fb   : > { %8392 = vmatpush3.bf16.msra.mxu1 %v8391_v40  ;;  %v2737_v40 = vld [vmem:[#allocation13 + $0x1f0] sm:$0xff] }
 0x5fc   : > { %8393 = vmatprep.subr.bf16.mxu1 %v9524_v9  ;;  %v8448_v42 = vpack.c.bf16 %v2738_v41, %v2737_v40  ;;  %v3160_v40 = vld [vmem:[#allocation16 + $0x30] sm:$0xff]  ;;  %v3161_v41 = vld [vmem:[#allocation16 + $0x38] sm:$0xff] }
 0x5ff   : > { %8395 = vmatpush3.bf16.msra.mxu1 %v8394_v43 }
 0x600   : > { %8396 = vmatprep.subr.bf16.mxu1 %v9524_v9 }
 0x603   : > { %8398 = vmatpush3.bf16.msra.mxu1 %v8397_v46 }
 0x604   : > { %8399 = vmatprep.subr.bf16.mxu1 %v9524_v9 }
 0x607   : > { %8401 = vmatpush3.bf16.msra.mxu1 %v8400_v49 }
 0x608   : > { %8426 = vmatprep.subr.bf16.mxu1 %v9524_v9 }
 0x699   : > { %v2452_v60 = vpop.f32.mrb[20].mxu1 }
 0x69a   : > { %v7135_v61 = vpop.f32.mrb[21].mxu1  ;;  %7184 = vmatmul.mubr.f32.vlgmr.msra.gmra.mrb[12].mxu0 %v2452_v60 }
 0x69b   : > { %8404 = vmatpush3.bf16.msra.mxu0 %v8403_v53  ;;  %7253 = vmatprep.mubr.msk.f32.mxu0 %vm9525_vm1, %v9523_v2 }
 0x69c   : > { %8405 = vmatprep.subr.bf16.mxu0 %v9524_v9 }
 0x69d   : > { %v2525_v10 = vpop.f32.mrb[22].mxu1 }
 0x69e   : > { %v7140_v11 = vpop.f32.mrb[23].mxu1  ;;  %7219 = vmatmul.mubr.f32.vlgmr.msra.gmra.mrb[28].mxu1 %v2525_v10  ;;  %v8451_v10 = vpack.c.bf16 %v3061_v7, %v3060_v5  ;;  %v3169_v5 = vld [vmem:[#allocation16 + $0x78] sm:$0xff] }
 0x69f   : > { %8407 = vmatpush3.bf16.msra.mxu0 %v8406_v62  ;;  %8428 = vmatpush3.bf16.msra.mxu1 %v8427_v63  ;;  %v3063_v11 = vld [vmem:[#allocation14 + $0x18] sm:$0xff] }
 0x6a0   : > { %8408 = vmatprep.subr.bf16.mxu0 %v9524_v9  ;;  %8429 = vmatprep.subr.bf16.mxu1 %v9524_v9 }
 0x6a1   : > { %7288 = vmatprep.mubr.msk.f32.mxu1 %vm9525_vm1, %v9523_v2 }
 0x6a3   : > { %8410 = vmatpush3.bf16.msra.mxu0 %v8409_v0  ;;  %8431 = vmatpush3.bf16.msra.mxu1 %v8430_v12  ;;  %v8454_v0 = vpack.c.bf16 %v3063_v11, %v3062_v8  ;;  %v3064_v12 = vld [vmem:[#allocation14 + $0x20] sm:$0xff]  ;;  %v5977_v8 = vld [vmem:[%s10840_s23] ss:$0 sm:$0xff] }
 0x6a4   : > { %8411 = vmatprep.subr.bf16.mxu0 %v9524_v9  ;;  %8432 = vmatprep.subr.bf16.mxu1 %v9524_v9  ;;  %v8457_v14 = vpack.c.bf16 %v3065_v13, %v3064_v12  ;;  %v5978_v13 = vld [vmem:[%s10841_s30] ss:$0 sm:$0xff] }
 0x6a7   : > { %8413 = vmatpush3.bf16.msra.mxu0 %v8412_v17  ;;  %8434 = vmatpush3.bf16.msra.mxu1 %v8433_v18 }
 0x6a8   : > { %8414 = vmatprep.subr.bf16.mxu0 %v9524_v9  ;;  %8435 = vmatprep.subr.bf16.mxu1 %v9524_v9 }
 0x6ab   : > { %8416 = vmatpush3.bf16.msra.mxu0 %v8415_v22  ;;  %8437 = vmatpush3.bf16.msra.mxu1 %v8436_v23  ;;  %v3069_v22 = vld [vmem:[#allocation14 + $0x48] sm:$0xff]  ;;  %v3070_v23 = vld [vmem:[#allocation14 + $0x50] sm:$0xff] }
 0x6ac   : > { %8417 = vmatprep.subr.bf16.mxu0 %v9524_v9  ;;  %8438 = vmatprep.subr.bf16.mxu1 %v9524_v9  ;;  %v8463_v24 = vpack.c.bf16 %v3069_v22, %v3068_v21  ;;  %v8466_v25 = vpack.c.bf16 %v3071_v56, %v3070_v23  ;;  %v3295_v21 = vld [vmem:[#allocation8 + $0x288] sm:$0xff]  ;;  %v3280_v22 = vld [vmem:[#allocation8 + $0x210] sm:$0xff]  ;;  %v3281_v23 = vld [vmem:[#allocation8 + $0x218] sm:$0xff] }
 0x6ad   : > { %v3296_v56 = vld [vmem:[#allocation8 + $0x290] sm:$0xff] }
 0x6af   : > { %8419 = vmatpush3.bf16.msra.mxu0 %v8418_v27  ;;  %8440 = vmatpush3.bf16.msra.mxu1 %v8439_v28  ;;  %v3073_v27 = vld [vmem:[#allocation14 + $0x68] sm:$0xff] }
 0x6b0   : > { %8420 = vmatprep.subr.bf16.mxu0 %v9524_v9  ;;  %8441 = vmatprep.subr.bf16.mxu1 %v9524_v9  ;;  %v8469_v28 = vpack.c.bf16 %v3073_v27, %v3072_v26  ;;  %v8502_v26 = vpack.c.bf16 %v3281_v23, %v3280_v22 }
 0x6b3   : > { %8422 = vmatpush3.bf16.msra.mxu0 %v8421_v57  ;;  %8443 = vmatpush3.bf16.msra.mxu1 %v8442_v33  ;;  %v3155_v57 = vld [vmem:[#allocation16 + $0x8] sm:$0xff]  ;;  %v3156_v33 = vld [vmem:[#allocation16 + $0x10] sm:$0xff] }
 0x6b4   : > { %8423 = vmatprep.subr.bf16.mxu0 %v9524_v9  ;;  %8444 = vmatprep.subr.bf16.mxu1 %v9524_v9  ;;  %v8475_v34 = vpack.c.bf16 %v3155_v57, %v3154_v32  ;;  %v8478_v36 = vpack.c.bf16 %v3157_v35, %v3156_v33 }
 0x6b7   : > { %8425 = vmatpush3.bf16.msra.mxu0 %v8424_v38  ;;  %8446 = vmatpush3.bf16.msra.mxu1 %v8445_v39  ;;  %v3159_v38 = vld [vmem:[#allocation16 + $0x28] sm:$0xff] }
 0x6b8   : > { %8447 = vmatprep.subr.bf16.mxu1 %v9524_v9  ;;  %8450 = vmatprep.subr.bf16.mxu0 %v9524_v9  ;;  %v8481_v39 = vpack.c.bf16 %v3159_v38, %v3158_v37  ;;  %v3284_v38 = vld [vmem:[#allocation8 + $0x230] sm:$0xff] }
 0x6b9   : > { %v2598_v43 = vpop.f32.mrb[24].mxu1 }
 0x6ba   : > { %v7145_v44 = vpop.f32.mrb[25].mxu1  ;;  %7254 = vmatmul.mubr.f32.vlgmr.msra.gmra.mrb[14].mxu0 %v2598_v43  ;;  %v3162_v43 = vld [vmem:[#allocation16 + $0x40] sm:$0xff] }
 0x6bb   : > { %8449 = vmatpush3.bf16.msra.mxu1 %v8448_v42  ;;  %7323 = vmatprep.mubr.msk.f32.mxu0 %vm9525_vm1, %v9523_v2  ;;  %v8484_v42 = vpack.c.bf16 %v3161_v41, %v3160_v40  ;;  %v3163_v44 = vld [vmem:[#allocation16 + $0x48] sm:$0xff]  ;;  %v3300_v40 = vld [vmem:[#allocation8 + $0x2b0] sm:$0xff] }
 0x6bc   : > { %8474 = vmatprep.subr.bf16.mxu1 %v9524_v9  ;;  %8452 = vmatpush3.bf16.msra.mxu0 %v8451_v10 }
 0x6bd   : > { %v2671_v45 = vpop.f32.mrb[26].mxu1  ;;  %8453 = vmatprep.subr.bf16.mxu0 %v9524_v9 }
 0x6be   : > { %v7150_v46 = vpop.f32.mrb[27].mxu1  ;;  %7289 = vmatmul.mubr.f32.vlgmr.msra.gmra.mrb[30].mxu1 %v2671_v45  ;;  %v8487_v45 = vpack.c.bf16 %v3163_v44, %v3162_v43  ;;  %v3286_v44 = vld [vmem:[#allocation8 + $0x240] sm:$0xff] }
 0x6bf   : > { %7358 = vmatprep.mubr.msk.f32.mxu1 %vm9525_vm1, %v9523_v2  ;;  %8476 = vmatpush3.bf16.msra.mxu1 %v8475_v34  ;;  %v3164_v46 = vld [vmem:[#allocation16 + $0x50] sm:$0xff] }
 0x6c0   : > { %8455 = vmatpush3.bf16.msra.mxu0 %v8454_v0  ;;  %8477 = vmatprep.subr.bf16.mxu1 %v9524_v9 }
 0x6c1   : > { %8456 = vmatprep.subr.bf16.mxu0 %v9524_v9 }
 0x6c3   : > { %8479 = vmatpush3.bf16.msra.mxu1 %v8478_v36 }
 0x6c4   : > { %8458 = vmatpush3.bf16.msra.mxu0 %v8457_v14  ;;  %8480 = vmatprep.subr.bf16.mxu1 %v9524_v9 }
 0x6c5   : > { %8459 = vmatprep.subr.bf16.mxu0 %v9524_v9 }
 0x6c7   : > { %8482 = vmatpush3.bf16.msra.mxu1 %v8481_v39  ;;  %v3285_v39 = vld [vmem:[#allocation8 + $0x238] sm:$0xff] }
 0x6c8   : > { %8461 = vmatpush3.bf16.msra.mxu0 %v8460_v52  ;;  %8483 = vmatprep.subr.bf16.mxu1 %v9524_v9  ;;  %v8508_v41 = vpack.c.bf16 %v3285_v39, %v3284_v38  ;;  %v3333_v38 = vld [vmem:[#allocation8 + $0x3b8] sm:$0xff] }
 0x6c9   : > { %8462 = vmatprep.subr.bf16.mxu0 %v9524_v9 }
 0x6cb   : > { %8485 = vmatpush3.bf16.msra.mxu1 %v8484_v42  ;;  %v3301_v42 = vld [vmem:[#allocation8 + $0x2b8] sm:$0xff] }
 0x6cc   : > { %8464 = vmatpush3.bf16.msra.mxu0 %v8463_v24  ;;  %8486 = vmatprep.subr.bf16.mxu1 %v9524_v9  ;;  %v8523_v24 = vpack.c.bf16 %v3295_v21, %v3294_v20  ;;  %v8532_v43 = vpack.c.bf16 %v3301_v42, %v3300_v40  ;;  %v3327_v20 = vld [vmem:[#allocation8 + $0x388] sm:$0xff] }
 0x6cd   : > { %8465 = vmatprep.subr.bf16.mxu0 %v9524_v9  ;;  %v3319_v42 = vld [vmem:[#allocation8 + $0x348] sm:$0xff] }
 0x6cf   : > { %8488 = vmatpush3.bf16.msra.mxu1 %v8487_v45  ;;  %v3287_v45 = vld [vmem:[#allocation8 + $0x248] sm:$0xff] }
 0x6d0   : > { %8467 = vmatpush3.bf16.msra.mxu0 %v8466_v25  ;;  %8489 = vmatprep.subr.bf16.mxu1 %v9524_v9  ;;  %v3297_v25 = vld [vmem:[#allocation8 + $0x298] sm:$0xff] }
 0x6d1   : > { %8468 = vmatprep.subr.bf16.mxu0 %v9524_v9  ;;  %v8526_v27 = vpack.c.bf16 %v3297_v25, %v3296_v56  ;;  %v3313_v25 = vld [vmem:[#allocation8 + $0x318] sm:$0xff] }
 0x6d4   : > { %8470 = vmatpush3.bf16.msra.mxu0 %v8469_v28  ;;  %v3282_v28 = vld [vmem:[#allocation8 + $0x220] sm:$0xff] }
 0x6d5   : > { %8471 = vmatprep.subr.bf16.mxu0 %v9524_v9  ;;  %v8505_v32 = vpack.c.bf16 %v3283_v29, %v3282_v28 }
 0x6d8   : > { %8473 = vmatpush3.bf16.msra.mxu0 %v8472_v31  ;;  %v3299_v31 = vld [vmem:[#allocation8 + $0x2a8] sm:$0xff] }
 0x6d9   : > { %8498 = vmatprep.subr.bf16.mxu0 %v9524_v9  ;;  %v8529_v57 = vpack.c.bf16 %v3299_v31, %v3298_v30  ;;  %v3314_v30 = vld [vmem:[#allocation8 + $0x320] sm:$0xff]  ;;  %v3315_v31 = vld [vmem:[#allocation8 + $0x328] sm:$0xff] }
 0x76d   : > { %v2805_v47 = vpop.f32.mrb[12].mxu0 }
 0x76e   : > { %v7185_v48 = vpop.f32.mrb[13].mxu0 }
 0x771   : > { %v2875_v49 = vpop.f32.mrb[28].mxu1 }
 0x772   : > { %v3019_v50 = vadd.f32 %v2875_v49, %v2805_v47  ;;  %v7220_v51 = vpop.f32.mrb[29].mxu1  ;;  %v3165_v47 = vld [vmem:[#allocation16 + $0x58] sm:$0xff]  ;;  %v3166_v49 = vld [vmem:[#allocation16 + $0x60] sm:$0xff] }
 0x773   : > { %v8490_v48 = vpack.c.bf16 %v3165_v47, %v3164_v46  ;;  %v3302_v46 = vld [vmem:[#allocation8 + $0x2c0] sm:$0xff]  ;;  %v8511_v47 = vpack.c.bf16 %v3287_v45, %v3286_v44  ;;  %v3335_v44 = vld [vmem:[#allocation8 + $0x3c8] sm:$0xff] }
 0x775   : > { %8491 = vmatpush3.bf16.msra.mxu1 %v8490_v48  ;;  %v3303_v48 = vld [vmem:[#allocation8 + $0x2c8] sm:$0xff] }
 0x776   : > { %8492 = vmatprep.subr.bf16.mxu1 %v9524_v9 }
 0x78d   : > { %v2945_v53 = vpop.f32.mrb[14].mxu0 }
 0x78e   : > { %v3020_v54 = vadd.f32 %v3019_v50, %v2945_v53  ;;  %v7255_v55 = vpop.f32.mrb[15].mxu0  ;;  %v3167_v50 = vld [vmem:[#allocation16 + $0x68] sm:$0xff] }
 0x78f   : > { %v8493_v51 = vpack.c.bf16 %v3167_v50, %v3166_v49  ;;  %v8535_v49 = vpack.c.bf16 %v3303_v48, %v3302_v46  ;;  %v3288_v50 = vld [vmem:[#allocation8 + $0x250] sm:$0xff]  ;;  %v3321_v48 = vld [vmem:[#allocation8 + $0x358] sm:$0xff] }
 0x791   : > { %v3015_v58 = vpop.f32.mrb[30].mxu1  ;;  %8494 = vmatpush3.bf16.msra.mxu1 %v8493_v51  ;;  %v3289_v51 = vld [vmem:[#allocation8 + $0x258] sm:$0xff] }
 0x792   : > { %v3021_v60 = vadd.f32 %v3020_v54, %v3015_v58  ;;  %v7290_v61 = vpop.f32.mrb[31].mxu1  ;;  %8495 = vmatprep.subr.bf16.mxu1 %v9524_v9 }
 0x793   : > { %v5976_v61 = vld [vmem:[%s10839_s6] ss:$0 sm:$0xff] }
 0x794   : > { %v3029_v62 = vadd.f32 %v5974_v59, %v3021_v60  ;;  %v5975_v59 = vld [vmem:[%s10743_s16] ss:$0 sm:$0xff] }
 0x796   : > { %v3030_v63 = vadd.f32 %v3029_v62, %v10041_v16 }
 0x798   : > { %v3033_v4 = vmul.f32 %v10010_v3, %v3030_v63 }
 0x79a   : > { %3034 = vadd.xlane.f32.xlu0 %v3033_v4  ;;  %v3168_v4 = vld [vmem:[#allocation16 + $0x70] sm:$0xff] }
 0x79b   : > { %v8496_v7 = vpack.c.bf16 %v3169_v5, %v3168_v4  ;;  %v3292_v5 = vld [vmem:[#allocation8 + $0x270] sm:$0xff] }
 0x79d   : > { %8497 = vmatpush3.bf16.msra.mxu1 %v8496_v7  ;;  %v3293_v7 = vld [vmem:[#allocation8 + $0x278] sm:$0xff] }
 0x79e   : > { %8522 = vmatprep.subr.bf16.mxu1 %v9524_v9 }
 0x827   : > { %v3035_v16 = vpop.xlane.xlu0 %3034 }
 0x828   : > { %v3036_v1 = vmul.f32 0.03125, %v3035_v16 }
 0x82a   : > { %v3037_v15 = vsub.f32 %v3030_v63, %v3036_v1 }
 0x82c   : > { %v10319_v17 = vmul.f32 %v10010_v3, %v3037_v15 }
 0x82e   : > { %v3039_v18 = vmul.f32 %v10319_v17, %v10319_v17 }
 0x830   : > { %3040 = vadd.xlane.f32.xlu1 %v3039_v18  ;;  %v3278_v18 = vld [vmem:[#allocation8 + $0x200] sm:$0xff] }
 0x831   : > { %v8499_v52 = vpack.c.bf16 %v3279_v19, %v3278_v18  ;;  %v3311_v18 = vld [vmem:[#allocation8 + $0x308] sm:$0xff]  ;;  %v3326_v19 = vld [vmem:[#allocation8 + $0x380] sm:$0xff] }
 0x832   : > { %v8571_v23 = vpack.c.bf16 %v3327_v20, %v3326_v19  ;;  %v3656_v20 = vld [vmem:[#allocation10 + $0x220] sm:$0xff] }
 0x8bd   : > { %v3041_v53 = vpop.xlane.xlu1 %3040 }
 0x8be   : > { %v3042_v54 = vmul.f32 0.03125, %v3041_v53  ;;  %v3304_v53 = vld [vmem:[#allocation8 + $0x2d0] sm:$0xff] }
 0x8c0   : > { %v3043_v55 = vadd.f32 1e-05, %v3042_v54  ;;  %v8514_v54 = vpack.c.bf16 %v3289_v51, %v3288_v50  ;;  %v3337_v50 = vld [vmem:[#allocation8 + $0x3d8] sm:$0xff] }
 0x8c2   : > { %9115 = vrsqrt.f32 %v3043_v55  ;;  %v3305_v55 = vld [vmem:[#allocation8 + $0x2d8] sm:$0xff] }
 0x8cc   : > { %v9116_v58 = vpop.eup %9115 }
 0x8cd   : > { %v3045_v60 = vmul.f32 %v9116_v58, %v10319_v17  ;;  %v8538_v58 = vpack.c.bf16 %v3305_v55, %v3304_v53  ;;  %v3323_v55 = vld [vmem:[#allocation8 + $0x368] sm:$0xff] }
 0x8cf   : > { %v3052_v62 = vmul.f32 %v5975_v59, %v3045_v60  ;;  %v3290_v59 = vld [vmem:[#allocation8 + $0x260] sm:$0xff]  ;;  %v3291_v60 = vld [vmem:[#allocation8 + $0x268] sm:$0xff] }
 0x8d1   : > { %v3059_v63 = vadd.f32 %v5976_v61, %v3052_v62  ;;  %v3306_v61 = vld [vmem:[#allocation8 + $0x2e0] sm:$0xff]  ;;  %v8517_v62 = vpack.c.bf16 %v3291_v60, %v3290_v59  ;;  %v3339_v59 = vld [vmem:[#allocation8 + $0x3e8] sm:$0xff] }
 0x8d3   : > { %7324 = vmatmul.mubr.f32.vlgmr.msra.gmra.mrb[16].mxu0 %v3059_v63 }
 0x8d4   : > { %7393 = vmatprep.mubr.msk.f32.mxu0 %vm9525_vm1, %v9523_v2  ;;  %8500 = vmatpush3.bf16.msra.mxu0 %v8499_v52  ;;  %v5980_v52 = vld [vmem:[%s10843_s20] ss:$0 sm:$0xff] }
 0x8d5   : > { %8501 = vmatprep.subr.bf16.mxu0 %v9524_v9 }
 0x8d8   : > { %8503 = vmatpush3.bf16.msra.mxu0 %v8502_v26  ;;  %v3328_v26 = vld [vmem:[#allocation8 + $0x390] sm:$0xff] }
 0x8d9   : > { %8504 = vmatprep.subr.bf16.mxu0 %v9524_v9 }
 0x8dc   : > { %8506 = vmatpush3.bf16.msra.mxu0 %v8505_v32  ;;  %v3330_v32 = vld [vmem:[#allocation8 + $0x3a0] sm:$0xff] }
 0x8dd   : > { %8507 = vmatprep.subr.bf16.mxu0 %v9524_v9 }
 0x8e0   : > { %8509 = vmatpush3.bf16.msra.mxu0 %v8508_v41  ;;  %v3318_v41 = vld [vmem:[#allocation8 + $0x340] sm:$0xff] }
 0x8e1   : > { %8510 = vmatprep.subr.bf16.mxu0 %v9524_v9  ;;  %v8559_v45 = vpack.c.bf16 %v3319_v42, %v3318_v41  ;;  %v3664_v42 = vld [vmem:[#allocation10 + $0x260] sm:$0xff] }
 0x8e4   : > { %8512 = vmatpush3.bf16.msra.mxu0 %v8511_v47  ;;  %v3320_v47 = vld [vmem:[#allocation8 + $0x350] sm:$0xff] }
 0x8e5   : > { %8513 = vmatprep.subr.bf16.mxu0 %v9524_v9  ;;  %v8562_v51 = vpack.c.bf16 %v3321_v48, %v3320_v47  ;;  %v3666_v48 = vld [vmem:[#allocation10 + $0x270] sm:$0xff] }
 0x8e8   : > { %8515 = vmatpush3.bf16.msra.mxu0 %v8514_v54  ;;  %v3322_v54 = vld [vmem:[#allocation8 + $0x360] sm:$0xff] }
 0x8e9   : > { %8516 = vmatprep.subr.bf16.mxu0 %v9524_v9  ;;  %v8565_v60 = vpack.c.bf16 %v3323_v55, %v3322_v54  ;;  %v3684_v55 = vld [vmem:[#allocation10 + $0x300] sm:$0xff] }
 0x8ec   : > { %8518 = vmatpush3.bf16.msra.mxu0 %v8517_v62  ;;  %v3324_v62 = vld [vmem:[#allocation8 + $0x370] sm:$0xff] }
 0x8ed   : > { %8519 = vmatprep.subr.bf16.mxu0 %v9524_v9 }
 0x9a6   : > { %v3149_v10 = vpop.f32.mrb[16].mxu0 }
 0x9a7   : > { %v3150_v11 = vadd.f32 %v5977_v8, %v3149_v10  ;;  %v7325_v0 = vpop.f32.mrb[17].mxu0  ;;  %v3308_v8 = vld [vmem:[#allocation8 + $0x2f0] sm:$0xff]  ;;  %v8520_v10 = vpack.c.bf16 %v3293_v7, %v3292_v5  ;;  %v3341_v5 = vld [vmem:[#allocation8 + $0x3f8] sm:$0xff] }
 0x9a9   : > { %v3153_v12 = vmax.f32 %v3150_v11, 0.0  ;;  %v3309_v11 = vld [vmem:[#allocation8 + $0x2f8] sm:$0xff]  ;;  %8521 = vmatpush3.bf16.msra.mxu0 %v8520_v10  ;;  %v3652_v10 = vld [vmem:[#allocation10 + $0x200] sm:$0xff] }
 0x9aa   : > { %v8544_v0 = vpack.c.bf16 %v3309_v11, %v3308_v8  ;;  %8546 = vmatprep.subr.bf16.mxu0 %v9524_v9  ;;  %v3653_v11 = vld [vmem:[#allocation10 + $0x208] sm:$0xff] }
 0x9ab   : > { %7359 = vmatmul.mubr.f32.vlgmr.msra.gmra.mrb[32].mxu1 %v3153_v12 }
 0x9ac   : > { %7428 = vmatprep.mubr.msk.f32.mxu1 %vm9525_vm1, %v9523_v2  ;;  %8524 = vmatpush3.bf16.msra.mxu1 %v8523_v24  ;;  %v3312_v24 = vld [vmem:[#allocation8 + $0x310] sm:$0xff] }
 0x9ad   : > { %8525 = vmatprep.subr.bf16.mxu1 %v9524_v9  ;;  %v8550_v28 = vpack.c.bf16 %v3313_v25, %v3312_v24  ;;  %v3658_v25 = vld [vmem:[#allocation10 + $0x230] sm:$0xff] }
 0x9b0   : > { %8527 = vmatpush3.bf16.msra.mxu1 %v8526_v27  ;;  %v3329_v27 = vld [vmem:[#allocation8 + $0x398] sm:$0xff] }
 0x9b1   : > { %8528 = vmatprep.subr.bf16.mxu1 %v9524_v9  ;;  %v8574_v29 = vpack.c.bf16 %v3329_v27, %v3328_v26  ;;  %v3659_v26 = vld [vmem:[#allocation10 + $0x238] sm:$0xff]  ;;  %v3674_v27 = vld [vmem:[#allocation10 + $0x2b0] sm:$0xff] }
 0x9b4   : > { %8530 = vmatpush3.bf16.msra.mxu1 %v8529_v57  ;;  %v3331_v57 = vld [vmem:[#allocation8 + $0x3a8] sm:$0xff] }
 0x9b5   : > { %8531 = vmatprep.subr.bf16.mxu1 %v9524_v9 }
 0x9b8   : > { %8533 = vmatpush3.bf16.msra.mxu1 %v8532_v43  ;;  %v3334_v43 = vld [vmem:[#allocation8 + $0x3c0] sm:$0xff] }
 0x9b9   : > { %8534 = vmatprep.subr.bf16.mxu1 %v9524_v9  ;;  %v8583_v46 = vpack.c.bf16 %v3335_v44, %v3334_v43  ;;  %v3665_v43 = vld [vmem:[#allocation10 + $0x268] sm:$0xff]  ;;  %v3680_v44 = vld [vmem:[#allocation10 + $0x2e0] sm:$0xff] }
 0x9bc   : > { %8536 = vmatpush3.bf16.msra.mxu1 %v8535_v49  ;;  %v3336_v49 = vld [vmem:[#allocation8 + $0x3d0] sm:$0xff] }
 0x9bd   : > { %8537 = vmatprep.subr.bf16.mxu1 %v9524_v9  ;;  %v8586_v53 = vpack.c.bf16 %v3337_v50, %v3336_v49  ;;  %v3667_v49 = vld [vmem:[#allocation10 + $0x278] sm:$0xff]  ;;  %v3682_v50 = vld [vmem:[#allocation10 + $0x2f0] sm:$0xff] }
 0x9c0   : > { %8539 = vmatpush3.bf16.msra.mxu1 %v8538_v58  ;;  %v3338_v58 = vld [vmem:[#allocation8 + $0x3e0] sm:$0xff] }
 0x9c1   : > { %8540 = vmatprep.subr.bf16.mxu1 %v9524_v9 }
 0xa7e   : > { %v3243_v14 = vpop.f32.mrb[32].mxu1 }
 0xa7f   : > { %v3244_v16 = vadd.f32 %v5978_v13, %v3243_v14  ;;  %v7360_v1 = vpop.f32.mrb[33].mxu1 }
 0xa80   : > { %v5979_v1 = vld [vmem:[%s10842_s0] ss:$0 sm:$0xff] }
 0xa81   : > { %v3247_v15 = vadd.f32 %v3244_v16, %v3059_v63  ;;  %v3307_v63 = vld [vmem:[#allocation8 + $0x2e8] sm:$0xff] }
 0xa82   : > { %v8541_v4 = vpack.c.bf16 %v3307_v63, %v3306_v61  ;;  %v8589_v61 = vpack.c.bf16 %v3339_v59, %v3338_v58  ;;  %v3325_v63 = vld [vmem:[#allocation8 + $0x378] sm:$0xff]  ;;  %v3685_v58 = vld [vmem:[#allocation10 + $0x308] sm:$0xff]  ;;  %v3700_v59 = vld [vmem:[#allocation10 + $0x380] sm:$0xff] }
 0xa83   : > { %v3250_v17 = vmul.f32 %v10010_v3, %v3247_v15  ;;  %v8568_v7 = vpack.c.bf16 %v3325_v63, %v3324_v62  ;;  %v3686_v63 = vld [vmem:[#allocation10 + $0x310] sm:$0xff] }
 0xa84   : > { %8542 = vmatpush3.bf16.msra.mxu1 %v8541_v4  ;;  %v3340_v4 = vld [vmem:[#allocation8 + $0x3f0] sm:$0xff] }
 0xa85   : > { %3251 = vadd.xlane.f32.xlu0 %v3250_v17  ;;  %8543 = vmatprep.subr.bf16.mxu1 %v9524_v9  ;;  %v8592_v8 = vpack.c.bf16 %v3341_v5, %v3340_v4  ;;  %v3687_v4 = vld [vmem:[#allocation10 + $0x318] sm:$0xff]  ;;  %v3702_v5 = vld [vmem:[#allocation10 + $0x390] sm:$0xff] }
 0xa88   : > { %8545 = vmatpush3.bf16.msra.mxu1 %v8544_v0  ;;  %v3668_v0 = vld [vmem:[#allocation10 + $0x280] sm:$0xff] }
 0xa89   : > { %8570 = vmatprep.subr.bf16.mxu1 %v9524_v9 }
 0xb12   : > { %v3252_v33 = vpop.xlane.xlu0 %3251 }
 0xb13   : > { %v3253_v34 = vmul.f32 0.03125, %v3252_v33  ;;  %v8553_v33 = vpack.c.bf16 %v3315_v31, %v3314_v30  ;;  %v3660_v31 = vld [vmem:[#allocation10 + $0x240] sm:$0xff] }
 0xb15   : > { %v3254_v35 = vsub.f32 %v3247_v15, %v3253_v34  ;;  %v3310_v15 = vld [vmem:[#allocation8 + $0x300] sm:$0xff]  ;;  %v8577_v34 = vpack.c.bf16 %v3331_v57, %v3330_v32  ;;  %v3661_v32 = vld [vmem:[#allocation10 + $0x248] sm:$0xff] }
 0xb16   : > { %v8547_v22 = vpack.c.bf16 %v3311_v18, %v3310_v15  ;;  %v3670_v15 = vld [vmem:[#allocation10 + $0x290] sm:$0xff]  ;;  %v3676_v57 = vld [vmem:[#allocation10 + $0x2c0] sm:$0xff] }
 0xb17   : > { %v3255_v36 = vmul.f32 %v10010_v3, %v3254_v35  ;;  %v3316_v35 = vld [vmem:[#allocation8 + $0x330] sm:$0xff] }
 0xb19   : > { %v3256_v37 = vmul.f32 %v3255_v36, %v3255_v36 }
 0xb1b   : > { %3257 = vadd.xlane.f32.xlu1 %v3256_v37  ;;  %v3332_v37 = vld [vmem:[#allocation8 + $0x3b0] sm:$0xff] }
 0xb1c   : > { %v8580_v40 = vpack.c.bf16 %v3333_v38, %v3332_v37  ;;  %v3663_v37 = vld [vmem:[#allocation10 + $0x258] sm:$0xff]  ;;  %v3678_v38 = vld [vmem:[#allocation10 + $0x2d0] sm:$0xff] }
 0xba8   : > { %v3258_v12 = vpop.xlane.xlu1 %3257 }
 0xba9   : > { %v3259_v13 = vmul.f32 0.03125, %v3258_v12  ;;  %v3669_v12 = vld [vmem:[#allocation10 + $0x288] sm:$0xff] }
 0xbab   : > { %v3260_v14 = vadd.f32 1e-05, %v3259_v13  ;;  %v8595_v13 = vpack.c.bf16 %v3653_v11, %v3652_v10  ;;  %v3688_v11 = vld [vmem:[#allocation10 + $0x320] sm:$0xff] }
 0xbad   : > { %9117 = vrsqrt.f32 %v3260_v14  ;;  %v8619_v14 = vpack.c.bf16 %v3669_v12, %v3668_v0  ;;  %v3689_v0 = vld [vmem:[#allocation10 + $0x328] sm:$0xff]  ;;  %v3704_v12 = vld [vmem:[#allocation10 + $0x3a0] sm:$0xff] }
 0xbb7   : > { %v9118_v16 = vpop.eup %9117 }
 0xbb8   : > { %v3262_v17 = vmul.f32 %v9118_v16, %v3255_v36  ;;  %v3317_v36 = vld [vmem:[#allocation8 + $0x338] sm:$0xff]  ;;  %v3654_v16 = vld [vmem:[#allocation10 + $0x210] sm:$0xff] }
 0xbb9   : > { %v8556_v39 = vpack.c.bf16 %v3317_v36, %v3316_v35  ;;  %v3662_v36 = vld [vmem:[#allocation10 + $0x250] sm:$0xff] }
 0xbba   : > { %v3269_v21 = vmul.f32 %v5979_v1, %v3262_v17  ;;  %v3655_v1 = vld [vmem:[#allocation10 + $0x218] sm:$0xff] }
 0xbbb   : > { %v3671_v17 = vld [vmem:[#allocation10 + $0x298] sm:$0xff]  ;;  %v8598_v18 = vpack.c.bf16 %v3655_v1, %v3654_v16  ;;  %v3690_v1 = vld [vmem:[#allocation10 + $0x330] sm:$0xff] }
 0xbbc   : > { %v10377_v56 = vadd.f32 %v5980_v52, %v3269_v21  ;;  %v8622_v19 = vpack.c.bf16 %v3671_v17, %v3670_v15  ;;  %v3657_v52 = vld [vmem:[#allocation10 + $0x228] sm:$0xff]  ;;  %v3672_v21 = vld [vmem:[#allocation10 + $0x2a0] sm:$0xff]  ;;  %v3691_v15 = vld [vmem:[#allocation10 + $0x338] sm:$0xff] }
 0xbbd   : > { %v3706_v17 = vld [vmem:[#allocation10 + $0x3b0] sm:$0xff] }
 0xbbe   : > { %7394 = vmatmul.mubr.f32.vlgmr.msra.gmra.mrb[18].mxu0 %v10377_v56  ;;  %7429 = vmatmul.mubr.f32.vlgmr.msra.gmra.mrb[34].mxu1 %v10377_v56 }
 0xbbf   : > { %8548 = vmatpush3.bf16.msra.mxu0 %v8547_v22  ;;  %8572 = vmatpush3.bf16.msra.mxu1 %v8571_v23  ;;  %v3673_v22 = vld [vmem:[#allocation10 + $0x2a8] sm:$0xff]  ;;  %v8601_v23 = vpack.c.bf16 %v3657_v52, %v3656_v20  ;;  %v3692_v52 = vld [vmem:[#allocation10 + $0x340] sm:$0xff] }
 0xbc0   : > { %8549 = vmatprep.subr.bf16.mxu0 %v9524_v9  ;;  %8573 = vmatprep.subr.bf16.mxu1 %v9524_v9  ;;  %v8625_v24 = vpack.c.bf16 %v3673_v22, %v3672_v21  ;;  %v3693_v21 = vld [vmem:[#allocation10 + $0x348] sm:$0xff]  ;;  %v3708_v22 = vld [vmem:[#allocation10 + $0x3c0] sm:$0xff] }
 0xbc1   : > { %7463 = vmatprep.mubr.msk.f32.mxu0 %vm9525_vm1, %v9523_v2  ;;  %7498 = vmatprep.mubr.msk.f32.mxu1 %vm9525_vm1, %v9523_v2 }
 0xbc3   : > { %8551 = vmatpush3.bf16.msra.mxu0 %v8550_v28  ;;  %8575 = vmatpush3.bf16.msra.mxu1 %v8574_v29  ;;  %v3675_v28 = vld [vmem:[#allocation10 + $0x2b8] sm:$0xff]  ;;  %v8604_v29 = vpack.c.bf16 %v3659_v26, %v3658_v25  ;;  %v3694_v26 = vld [vmem:[#allocation10 + $0x350] sm:$0xff] }
 0xbc4   : > { %8552 = vmatprep.subr.bf16.mxu0 %v9524_v9  ;;  %8576 = vmatprep.subr.bf16.mxu1 %v9524_v9  ;;  %v8628_v30 = vpack.c.bf16 %v3675_v28, %v3674_v27  ;;  %v3695_v27 = vld [vmem:[#allocation10 + $0x358] sm:$0xff]  ;;  %v3710_v28 = vld [vmem:[#allocation10 + $0x3d0] sm:$0xff] }
 0xbc7   : > { %8554 = vmatpush3.bf16.msra.mxu0 %v8553_v33  ;;  %8578 = vmatpush3.bf16.msra.mxu1 %v8577_v34  ;;  %v3677_v33 = vld [vmem:[#allocation10 + $0x2c8] sm:$0xff]  ;;  %v8607_v34 = vpack.c.bf16 %v3661_v32, %v3660_v31  ;;  %v3696_v32 = vld [vmem:[#allocation10 + $0x360] sm:$0xff] }
 0xbc8   : > { %8555 = vmatprep.subr.bf16.mxu0 %v9524_v9  ;;  %8579 = vmatprep.subr.bf16.mxu1 %v9524_v9  ;;  %v8631_v35 = vpack.c.bf16 %v3677_v33, %v3676_v57  ;;  %v3697_v57 = vld [vmem:[#allocation10 + $0x368] sm:$0xff]  ;;  %v3712_v33 = vld [vmem:[#allocation10 + $0x3e0] sm:$0xff] }
 0xbcb   : > { %8557 = vmatpush3.bf16.msra.mxu0 %v8556_v39  ;;  %8581 = vmatpush3.bf16.msra.mxu1 %v8580_v40  ;;  %v3679_v39 = vld [vmem:[#allocation10 + $0x2d8] sm:$0xff]  ;;  %v8610_v40 = vpack.c.bf16 %v3663_v37, %v3662_v36  ;;  %v3698_v37 = vld [vmem:[#allocation10 + $0x370] sm:$0xff] }
 0xbcc   : > { %8558 = vmatprep.subr.bf16.mxu0 %v9524_v9  ;;  %8582 = vmatprep.subr.bf16.mxu1 %v9524_v9  ;;  %v8634_v41 = vpack.c.bf16 %v3679_v39, %v3678_v38  ;;  %v3699_v38 = vld [vmem:[#allocation10 + $0x378] sm:$0xff]  ;;  %v3714_v39 = vld [vmem:[#allocation10 + $0x3f0] sm:$0xff] }
 0xbcf   : > { %8560 = vmatpush3.bf16.msra.mxu0 %v8559_v45  ;;  %8584 = vmatpush3.bf16.msra.mxu1 %v8583_v46  ;;  %v3681_v45 = vld [vmem:[#allocation10 + $0x2e8] sm:$0xff]  ;;  %v8613_v46 = vpack.c.bf16 %v3665_v43, %v3664_v42  ;;  %v4026_v43 = vld [vmem:[#allocation11 + $0x200] sm:$0xff] }
 0xbd0   : > { %8561 = vmatprep.subr.bf16.mxu0 %v9524_v9  ;;  %8585 = vmatprep.subr.bf16.mxu1 %v9524_v9  ;;  %v8637_v47 = vpack.c.bf16 %v3681_v45, %v3680_v44  ;;  %v4027_v44 = vld [vmem:[#allocation11 + $0x208] sm:$0xff]  ;;  %v4042_v45 = vld [vmem:[#allocation11 + $0x280] sm:$0xff] }
 0xbd3   : > { %8563 = vmatpush3.bf16.msra.mxu0 %v8562_v51  ;;  %8587 = vmatpush3.bf16.msra.mxu1 %v8586_v53  ;;  %v3683_v51 = vld [vmem:[#allocation10 + $0x2f8] sm:$0xff]  ;;  %v8616_v53 = vpack.c.bf16 %v3667_v49, %v3666_v48  ;;  %v4028_v49 = vld [vmem:[#allocation11 + $0x210] sm:$0xff] }
 0xbd4   : > { %8564 = vmatprep.subr.bf16.mxu0 %v9524_v9  ;;  %8588 = vmatprep.subr.bf16.mxu1 %v9524_v9  ;;  %v8640_v54 = vpack.c.bf16 %v3683_v51, %v3682_v50  ;;  %v4029_v50 = vld [vmem:[#allocation11 + $0x218] sm:$0xff]  ;;  %v4044_v51 = vld [vmem:[#allocation11 + $0x290] sm:$0xff] }
 0xbd7   : > { %8566 = vmatpush3.bf16.msra.mxu0 %v8565_v60  ;;  %8590 = vmatpush3.bf16.msra.mxu1 %v8589_v61  ;;  %v3701_v60 = vld [vmem:[#allocation10 + $0x388] sm:$0xff]  ;;  %v8643_v61 = vpack.c.bf16 %v3685_v58, %v3684_v55  ;;  %v4030_v58 = vld [vmem:[#allocation11 + $0x220] sm:$0xff] }
 0xbd8   : > { %8567 = vmatprep.subr.bf16.mxu0 %v9524_v9  ;;  %8591 = vmatprep.subr.bf16.mxu1 %v9524_v9  ;;  %v8667_v62 = vpack.c.bf16 %v3701_v60, %v3700_v59  ;;  %v4031_v59 = vld [vmem:[#allocation11 + $0x228] sm:$0xff]  ;;  %v4046_v60 = vld [vmem:[#allocation11 + $0x2a0] sm:$0xff] }
 0xbdb   : > { %8569 = vmatpush3.bf16.msra.mxu0 %v8568_v7  ;;  %8593 = vmatpush3.bf16.msra.mxu1 %v8592_v8  ;;  %v3703_v7 = vld [vmem:[#allocation10 + $0x398] sm:$0xff]  ;;  %v8646_v8 = vpack.c.bf16 %v3687_v4, %v3686_v63  ;;  %v4032_v4 = vld [vmem:[#allocation11 + $0x230] sm:$0xff] }
 0xbdc   : > { %8594 = vmatprep.subr.bf16.mxu0 %v9524_v9  ;;  %8618 = vmatprep.subr.bf16.mxu1 %v9524_v9  ;;  %v8670_v10 = vpack.c.bf16 %v3703_v7, %v3702_v5  ;;  %v4033_v5 = vld [vmem:[#allocation11 + $0x238] sm:$0xff]  ;;  %v4048_v7 = vld [vmem:[#allocation11 + $0x2b0] sm:$0xff] }
 0xbde   : > { %7464 = vmatmul.mubr.f32.vlgmr.msra.gmra.mrb[20].mxu0 %v10377_v56  ;;  %7499 = vmatmul.mubr.f32.vlgmr.msra.gmra.mrb[36].mxu1 %v10377_v56 }
 0xbdf   : > { %8596 = vmatpush3.bf16.msra.mxu0 %v8595_v13  ;;  %8620 = vmatpush3.bf16.msra.mxu1 %v8619_v14  ;;  %v3705_v13 = vld [vmem:[#allocation10 + $0x3a8] sm:$0xff]  ;;  %v8649_v14 = vpack.c.bf16 %v3689_v0, %v3688_v11  ;;  %v4034_v0 = vld [vmem:[#allocation11 + $0x240] sm:$0xff] }
 0xbe0   : > { %8597 = vmatprep.subr.bf16.mxu0 %v9524_v9  ;;  %8621 = vmatprep.subr.bf16.mxu1 %v9524_v9  ;;  %v8673_v16 = vpack.c.bf16 %v3705_v13, %v3704_v12  ;;  %v4035_v12 = vld [vmem:[#allocation11 + $0x248] sm:$0xff]  ;;  %v4050_v13 = vld [vmem:[#allocation11 + $0x2c0] sm:$0xff] }
 0xbe1   : > { %7533 = vmatprep.mubr.msk.f32.mxu0 %vm9525_vm1, %v9523_v2  ;;  %7568 = vmatprep.mubr.msk.f32.mxu1 %vm9525_vm1, %v9523_v2 }
 0xbe3   : > { %8599 = vmatpush3.bf16.msra.mxu0 %v8598_v18  ;;  %8623 = vmatpush3.bf16.msra.mxu1 %v8622_v19  ;;  %v3707_v18 = vld [vmem:[#allocation10 + $0x3b8] sm:$0xff]  ;;  %v8652_v19 = vpack.c.bf16 %v3691_v15, %v3690_v1  ;;  %v4036_v15 = vld [vmem:[#allocation11 + $0x250] sm:$0xff] }
 0xbe4   : > { %8600 = vmatprep.subr.bf16.mxu0 %v9524_v9  ;;  %8624 = vmatprep.subr.bf16.mxu1 %v9524_v9  ;;  %v8676_v20 = vpack.c.bf16 %v3707_v18, %v3706_v17  ;;  %v4037_v17 = vld [vmem:[#allocation11 + $0x258] sm:$0xff]  ;;  %v4052_v18 = vld [vmem:[#allocation11 + $0x2d0] sm:$0xff] }
 0xbe7   : > { %8602 = vmatpush3.bf16.msra.mxu0 %v8601_v23  ;;  %8626 = vmatpush3.bf16.msra.mxu1 %v8625_v24  ;;  %v3709_v23 = vld [vmem:[#allocation10 + $0x3c8] sm:$0xff]  ;;  %v8655_v24 = vpack.c.bf16 %v3693_v21, %v3692_v52  ;;  %v4038_v21 = vld [vmem:[#allocation11 + $0x260] sm:$0xff] }
 0xbe8   : > { %8603 = vmatprep.subr.bf16.mxu0 %v9524_v9  ;;  %8627 = vmatprep.subr.bf16.mxu1 %v9524_v9  ;;  %v8679_v25 = vpack.c.bf16 %v3709_v23, %v3708_v22  ;;  %v4039_v22 = vld [vmem:[#allocation11 + $0x268] sm:$0xff]  ;;  %v4054_v23 = vld [vmem:[#allocation11 + $0x2e0] sm:$0xff] }
 0xbeb   : > { %8605 = vmatpush3.bf16.msra.mxu0 %v8604_v29  ;;  %8629 = vmatpush3.bf16.msra.mxu1 %v8628_v30  ;;  %v3711_v29 = vld [vmem:[#allocation10 + $0x3d8] sm:$0xff]  ;;  %v8658_v30 = vpack.c.bf16 %v3695_v27, %v3694_v26  ;;  %v4040_v27 = vld [vmem:[#allocation11 + $0x270] sm:$0xff] }
 0xbec   : > { %8606 = vmatprep.subr.bf16.mxu0 %v9524_v9  ;;  %8630 = vmatprep.subr.bf16.mxu1 %v9524_v9  ;;  %v8682_v31 = vpack.c.bf16 %v3711_v29, %v3710_v28  ;;  %v4041_v28 = vld [vmem:[#allocation11 + $0x278] sm:$0xff]  ;;  %v4056_v29 = vld [vmem:[#allocation11 + $0x2f0] sm:$0xff] }
 0xbef   : > { %8608 = vmatpush3.bf16.msra.mxu0 %v8607_v34  ;;  %8632 = vmatpush3.bf16.msra.mxu1 %v8631_v35  ;;  %v3713_v34 = vld [vmem:[#allocation10 + $0x3e8] sm:$0xff]  ;;  %v8661_v35 = vpack.c.bf16 %v3697_v57, %v3696_v32  ;;  %v4058_v57 = vld [vmem:[#allocation11 + $0x300] sm:$0xff] }
 0xbf0   : > { %8609 = vmatprep.subr.bf16.mxu0 %v9524_v9  ;;  %8633 = vmatprep.subr.bf16.mxu1 %v9524_v9  ;;  %v8685_v36 = vpack.c.bf16 %v3713_v34, %v3712_v33  ;;  %v4059_v33 = vld [vmem:[#allocation11 + $0x308] sm:$0xff]  ;;  %v4074_v34 = vld [vmem:[#allocation11 + $0x380] sm:$0xff] }
 0xbf3   : > { %8611 = vmatpush3.bf16.msra.mxu0 %v8610_v40  ;;  %8635 = vmatpush3.bf16.msra.mxu1 %v8634_v41  ;;  %v3715_v40 = vld [vmem:[#allocation10 + $0x3f8] sm:$0xff]  ;;  %v8664_v41 = vpack.c.bf16 %v3699_v38, %v3698_v37  ;;  %v4060_v38 = vld [vmem:[#allocation11 + $0x310] sm:$0xff] }
 0xbf4   : > { %8612 = vmatprep.subr.bf16.mxu0 %v9524_v9  ;;  %8636 = vmatprep.subr.bf16.mxu1 %v9524_v9  ;;  %v8688_v42 = vpack.c.bf16 %v3715_v40, %v3714_v39  ;;  %v4061_v39 = vld [vmem:[#allocation11 + $0x318] sm:$0xff]  ;;  %v4076_v40 = vld [vmem:[#allocation11 + $0x390] sm:$0xff] }
 0xbf7   : > { %8614 = vmatpush3.bf16.msra.mxu0 %v8613_v46  ;;  %8638 = vmatpush3.bf16.msra.mxu1 %v8637_v47  ;;  %v4043_v46 = vld [vmem:[#allocation11 + $0x288] sm:$0xff]  ;;  %v8691_v47 = vpack.c.bf16 %v4027_v44, %v4026_v43  ;;  %v4062_v44 = vld [vmem:[#allocation11 + $0x320] sm:$0xff] }
 0xbf8   : > { %8615 = vmatprep.subr.bf16.mxu0 %v9524_v9  ;;  %8639 = vmatprep.subr.bf16.mxu1 %v9524_v9  ;;  %v8715_v48 = vpack.c.bf16 %v4043_v46, %v4042_v45  ;;  %v4063_v45 = vld [vmem:[#allocation11 + $0x328] sm:$0xff]  ;;  %v4078_v46 = vld [vmem:[#allocation11 + $0x3a0] sm:$0xff] }
 0xbfb   : > { %8617 = vmatpush3.bf16.msra.mxu0 %v8616_v53  ;;  %8641 = vmatpush3.bf16.msra.mxu1 %v8640_v54  ;;  %v4045_v53 = vld [vmem:[#allocation11 + $0x298] sm:$0xff]  ;;  %v8694_v54 = vpack.c.bf16 %v4029_v50, %v4028_v49  ;;  %v4064_v50 = vld [vmem:[#allocation11 + $0x330] sm:$0xff] }
 0xbfc   : > { %8642 = vmatprep.subr.bf16.mxu0 %v9524_v9  ;;  %8666 = vmatprep.subr.bf16.mxu1 %v9524_v9  ;;  %v8718_v55 = vpack.c.bf16 %v4045_v53, %v4044_v51  ;;  %v4065_v51 = vld [vmem:[#allocation11 + $0x338] sm:$0xff]  ;;  %v4080_v53 = vld [vmem:[#allocation11 + $0x3b0] sm:$0xff] }
 0xbfe   : > { %7534 = vmatmul.mubr.f32.vlgmr.msra.gmra.mrb[22].mxu0 %v10377_v56  ;;  %7569 = vmatmul.mubr.f32.vlgmr.msra.gmra.mrb[38].mxu1 %v10377_v56 }
 0xbff   : > { %8644 = vmatpush3.bf16.msra.mxu0 %v8643_v61  ;;  %8668 = vmatpush3.bf16.msra.mxu1 %v8667_v62  ;;  %v4047_v61 = vld [vmem:[#allocation11 + $0x2a8] sm:$0xff]  ;;  %v8697_v62 = vpack.c.bf16 %v4031_v59, %v4030_v58  ;;  %v4066_v59 = vld [vmem:[#allocation11 + $0x340] sm:$0xff] }
 0xc00   : > { %8645 = vmatprep.subr.bf16.mxu0 %v9524_v9  ;;  %8669 = vmatprep.subr.bf16.mxu1 %v9524_v9  ;;  %v8721_v63 = vpack.c.bf16 %v4047_v61, %v4046_v60  ;;  %v4067_v60 = vld [vmem:[#allocation11 + $0x348] sm:$0xff]  ;;  %v4082_v61 = vld [vmem:[#allocation11 + $0x3c0] sm:$0xff] }
 0xc01   : > { %7603 = vmatprep.mubr.msk.f32.mxu0 %vm9525_vm1, %v9523_v2  ;;  %7638 = vmatprep.mubr.msk.f32.mxu1 %vm9525_vm1, %v9523_v2 }
 0xc03   : > { %8647 = vmatpush3.bf16.msra.mxu0 %v8646_v8  ;;  %8671 = vmatpush3.bf16.msra.mxu1 %v8670_v10  ;;  %v4049_v8 = vld [vmem:[#allocation11 + $0x2b8] sm:$0xff]  ;;  %v8700_v10 = vpack.c.bf16 %v4033_v5, %v4032_v4  ;;  %v4068_v5 = vld [vmem:[#allocation11 + $0x350] sm:$0xff] }
 0xc04   : > { %8648 = vmatprep.subr.bf16.mxu0 %v9524_v9  ;;  %8672 = vmatprep.subr.bf16.mxu1 %v9524_v9  ;;  %v8724_v11 = vpack.c.bf16 %v4049_v8, %v4048_v7  ;;  %v4069_v7 = vld [vmem:[#allocation11 + $0x358] sm:$0xff]  ;;  %v4084_v8 = vld [vmem:[#allocation11 + $0x3d0] sm:$0xff] }
 0xc07   : > { %8650 = vmatpush3.bf16.msra.mxu0 %v8649_v14  ;;  %8674 = vmatpush3.bf16.msra.mxu1 %v8673_v16  ;;  %v4051_v14 = vld [vmem:[#allocation11 + $0x2c8] sm:$0xff]  ;;  %v8703_v16 = vpack.c.bf16 %v4035_v12, %v4034_v0  ;;  %v4070_v12 = vld [vmem:[#allocation11 + $0x360] sm:$0xff] }
 0xc08   : > { %8651 = vmatprep.subr.bf16.mxu0 %v9524_v9  ;;  %8675 = vmatprep.subr.bf16.mxu1 %v9524_v9  ;;  %v8727_v1 = vpack.c.bf16 %v4051_v14, %v4050_v13  ;;  %v4071_v13 = vld [vmem:[#allocation11 + $0x368] sm:$0xff]  ;;  %v4086_v14 = vld [vmem:[#allocation11 + $0x3e0] sm:$0xff] }
 0xc0b   : > { %8653 = vmatpush3.bf16.msra.mxu0 %v8652_v19  ;;  %8677 = vmatpush3.bf16.msra.mxu1 %v8676_v20  ;;  %v4053_v19 = vld [vmem:[#allocation11 + $0x2d8] sm:$0xff]  ;;  %v8706_v20 = vpack.c.bf16 %v4037_v17, %v4036_v15  ;;  %v4072_v17 = vld [vmem:[#allocation11 + $0x370] sm:$0xff] }
 0xc0c   : > { %8654 = vmatprep.subr.bf16.mxu0 %v9524_v9  ;;  %8678 = vmatprep.subr.bf16.mxu1 %v9524_v9  ;;  %v8730_v52 = vpack.c.bf16 %v4053_v19, %v4052_v18  ;;  %v4073_v18 = vld [vmem:[#allocation11 + $0x378] sm:$0xff]  ;;  %v4088_v19 = vld [vmem:[#allocation11 + $0x3f0] sm:$0xff] }
 0xc0f   : > { %8656 = vmatpush3.bf16.msra.mxu0 %v8655_v24  ;;  %8680 = vmatpush3.bf16.msra.mxu1 %v8679_v25  ;;  %v4055_v24 = vld [vmem:[#allocation11 + $0x2e8] sm:$0xff]  ;;  %v8709_v25 = vpack.c.bf16 %v4039_v22, %v4038_v21 }
 0xc10   : > { %8657 = vmatprep.subr.bf16.mxu0 %v9524_v9  ;;  %8681 = vmatprep.subr.bf16.mxu1 %v9524_v9  ;;  %v8733_v26 = vpack.c.bf16 %v4055_v24, %v4054_v23 }
 0xc13   : > { %8659 = vmatpush3.bf16.msra.mxu0 %v8658_v30  ;;  %8683 = vmatpush3.bf16.msra.mxu1 %v8682_v31  ;;  %v4057_v30 = vld [vmem:[#allocation11 + $0x2f8] sm:$0xff]  ;;  %v8712_v31 = vpack.c.bf16 %v4041_v28, %v4040_v27 }
 0xc14   : > { %8660 = vmatprep.subr.bf16.mxu0 %v9524_v9  ;;  %8684 = vmatprep.subr.bf16.mxu1 %v9524_v9  ;;  %v8736_v32 = vpack.c.bf16 %v4057_v30, %v4056_v29  ;;  %v5993_v30 = vld [vmem:[%s10834_s19 + $0x4] ss:$0 sm:$0xff] }
 0xc17   : > { %8662 = vmatpush3.bf16.msra.mxu0 %v8661_v35  ;;  %8686 = vmatpush3.bf16.msra.mxu1 %v8685_v36  ;;  %v4075_v35 = vld [vmem:[#allocation11 + $0x388] sm:$0xff]  ;;  %v8739_v36 = vpack.c.bf16 %v4059_v33, %v4058_v57  ;;  %v5985_v33 = vld [vmem:[%s10835_s12 + $0x4] ss:$0 sm:$0xff] }
 0xc18   : > { %8663 = vmatprep.subr.bf16.mxu0 %v9524_v9  ;;  %8687 = vmatprep.subr.bf16.mxu1 %v9524_v9  ;;  %v8763_v37 = vpack.c.bf16 %v4075_v35, %v4074_v34  ;;  %v5986_v34 = vld [vmem:[%s10835_s12 + $0x5] ss:$0 sm:$0xff] }
 0xc1b   : > { %8665 = vmatpush3.bf16.msra.mxu0 %v8664_v41  ;;  %8689 = vmatpush3.bf16.msra.mxu1 %v8688_v42  ;;  %v4077_v41 = vld [vmem:[#allocation11 + $0x398] sm:$0xff]  ;;  %v8742_v42 = vpack.c.bf16 %v4061_v39, %v4060_v38 }
 0xc1c   : > { %8690 = vmatprep.subr.bf16.mxu0 %v9524_v9  ;;  %8714 = vmatprep.subr.bf16.mxu1 %v9524_v9  ;;  %v8766_v43 = vpack.c.bf16 %v4077_v41, %v4076_v40  ;;  %v5995_v41 = vld [vmem:[%s10834_s19 + $0x6] ss:$0 sm:$0xff] }
 0xc1e   : > { %7604 = vmatmul.mubr.f32.vlgmr.msra.gmra.mrb[24].mxu0 %v10377_v56  ;;  %7639 = vmatmul.mubr.f32.vlgmr.msra.gmra.mrb[40].mxu1 %v10377_v56 }
 0xc1f   : > { %8692 = vmatpush3.bf16.msra.mxu0 %v8691_v47  ;;  %8716 = vmatpush3.bf16.msra.mxu1 %v8715_v48  ;;  %v4079_v47 = vld [vmem:[#allocation11 + $0x3a8] sm:$0xff]  ;;  %v8745_v48 = vpack.c.bf16 %v4063_v45, %v4062_v44  ;;  %v5987_v45 = vld [vmem:[%s10835_s12 + $0x6] ss:$0 sm:$0xff] }
 0xc20   : > { %8693 = vmatprep.subr.bf16.mxu0 %v9524_v9  ;;  %8717 = vmatprep.subr.bf16.mxu1 %v9524_v9  ;;  %v8769_v49 = vpack.c.bf16 %v4079_v47, %v4078_v46  ;;  %v5988_v46 = vld [vmem:[%s10835_s12 + $0x7] ss:$0 sm:$0xff] }
 0xc21   : > { %7673 = vmatprep.mubr.msk.f32.mxu0 %vm9525_vm1, %v9523_v2  ;;  %7708 = vmatprep.mubr.msk.f32.mxu1 %vm9525_vm1, %v9523_v2 }
 0xc23   : > { %8695 = vmatpush3.bf16.msra.mxu0 %v8694_v54  ;;  %8719 = vmatpush3.bf16.msra.mxu1 %v8718_v55  ;;  %v4081_v54 = vld [vmem:[#allocation11 + $0x3b8] sm:$0xff]  ;;  %v8748_v55 = vpack.c.bf16 %v4065_v51, %v4064_v50 }
 0xc24   : > { %8696 = vmatprep.subr.bf16.mxu0 %v9524_v9  ;;  %8720 = vmatprep.subr.bf16.mxu1 %v9524_v9  ;;  %v8772_v58 = vpack.c.bf16 %v4081_v54, %v4080_v53  ;;  %v6001_v54 = vld [vmem:[%s10836_s9 + $0x4] ss:$0 sm:$0xff] }
 0xc27   : > { %8698 = vmatpush3.bf16.msra.mxu0 %v8697_v62  ;;  %8722 = vmatpush3.bf16.msra.mxu1 %v8721_v63  ;;  %v4083_v62 = vld [vmem:[#allocation11 + $0x3c8] sm:$0xff]  ;;  %v8751_v63 = vpack.c.bf16 %v4067_v60, %v4066_v59 }
 0xc28   : > { %8699 = vmatprep.subr.bf16.mxu0 %v9524_v9  ;;  %8723 = vmatprep.subr.bf16.mxu1 %v9524_v9  ;;  %v8775_v4 = vpack.c.bf16 %v4083_v62, %v4082_v61 }
 0xc2b   : > { %8701 = vmatpush3.bf16.msra.mxu0 %v8700_v10  ;;  %8725 = vmatpush3.bf16.msra.mxu1 %v8724_v11  ;;  %v4085_v10 = vld [vmem:[#allocation11 + $0x3d8] sm:$0xff]  ;;  %v8754_v11 = vpack.c.bf16 %v4069_v7, %v4068_v5 }
 0xc2c   : > { %8702 = vmatprep.subr.bf16.mxu0 %v9524_v9  ;;  %8726 = vmatprep.subr.bf16.mxu1 %v9524_v9  ;;  %v8778_v0 = vpack.c.bf16 %v4085_v10, %v4084_v8 }
 0xc2f   : > { %8704 = vmatpush3.bf16.msra.mxu0 %v8703_v16  ;;  %8728 = vmatpush3.bf16.msra.mxu1 %v8727_v1  ;;  %v4087_v16 = vld [vmem:[#allocation11 + $0x3e8] sm:$0xff]  ;;  %v8757_v1 = vpack.c.bf16 %v4071_v13, %v4070_v12 }
 0xc30   : > { %8705 = vmatprep.subr.bf16.mxu0 %v9524_v9  ;;  %8729 = vmatprep.subr.bf16.mxu1 %v9524_v9  ;;  %v8781_v15 = vpack.c.bf16 %v4087_v16, %v4086_v14 }
 0xc33   : > { %8707 = vmatpush3.bf16.msra.mxu0 %v8706_v20  ;;  %8731 = vmatpush3.bf16.msra.mxu1 %v8730_v52  ;;  %v4089_v20 = vld [vmem:[#allocation11 + $0x3f8] sm:$0xff]  ;;  %v8760_v52 = vpack.c.bf16 %v4073_v18, %v4072_v17 }
 0xc34   : > { %8708 = vmatprep.subr.bf16.mxu0 %v9524_v9  ;;  %8732 = vmatprep.subr.bf16.mxu1 %v9524_v9  ;;  %v8784_v21 = vpack.c.bf16 %v4089_v20, %v4088_v19 }
 0xc37   : > { %8710 = vmatpush3.bf16.msra.mxu0 %v8709_v25  ;;  %8734 = vmatpush3.bf16.msra.mxu1 %v8733_v26 }
 0xc38   : > { %8711 = vmatprep.subr.bf16.mxu0 %v9524_v9  ;;  %8735 = vmatprep.subr.bf16.mxu1 %v9524_v9 }
 0xc3b   : > { %8713 = vmatpush3.bf16.msra.mxu0 %v8712_v31  ;;  %8737 = vmatpush3.bf16.msra.mxu1 %v8736_v32  ;;  %v5994_v31 = vld [vmem:[%s10834_s19 + $0x5] ss:$0 sm:$0xff] }
 0xc3c   : > { %8738 = vmatprep.subr.bf16.mxu0 %v9524_v9  ;;  %8762 = vmatprep.subr.bf16.mxu1 %v9524_v9 }
 0xc3e   : > { %7674 = vmatmul.mubr.f32.vlgmr.msra.gmra.mrb[26].mxu0 %v10377_v56  ;;  %7709 = vmatmul.mubr.f32.vlgmr.msra.gmra.mrb[42].mxu1 %v10377_v56 }
 0xc3f   : > { %8740 = vmatpush3.bf16.msra.mxu0 %v8739_v36  ;;  %8764 = vmatpush3.bf16.msra.mxu1 %v8763_v37 }
 0xc40   : > { %8741 = vmatprep.subr.bf16.mxu0 %v9524_v9  ;;  %8765 = vmatprep.subr.bf16.mxu1 %v9524_v9 }
 0xc41   : > { %7743 = vmatprep.mubr.msk.f32.mxu0 %vm9525_vm1, %v9523_v2  ;;  %7778 = vmatprep.mubr.msk.f32.mxu1 %vm9525_vm1, %v9523_v2 }
 0xc43   : > { %8743 = vmatpush3.bf16.msra.mxu0 %v8742_v42  ;;  %8767 = vmatpush3.bf16.msra.mxu1 %v8766_v43  ;;  %v5996_v42 = vld [vmem:[%s10834_s19 + $0x7] ss:$0 sm:$0xff] }
 0xc44   : > { %8744 = vmatprep.subr.bf16.mxu0 %v9524_v9  ;;  %8768 = vmatprep.subr.bf16.mxu1 %v9524_v9 }
 0xc47   : > { %8746 = vmatpush3.bf16.msra.mxu0 %v8745_v48  ;;  %8770 = vmatpush3.bf16.msra.mxu1 %v8769_v49 }
 0xc48   : > { %8747 = vmatprep.subr.bf16.mxu0 %v9524_v9  ;;  %8771 = vmatprep.subr.bf16.mxu1 %v9524_v9 }
 0xc4b   : > { %8749 = vmatpush3.bf16.msra.mxu0 %v8748_v55  ;;  %8773 = vmatpush3.bf16.msra.mxu1 %v8772_v58  ;;  %v6002_v55 = vld [vmem:[%s10836_s9 + $0x5] ss:$0 sm:$0xff] }
 0xc4c   : > { %8750 = vmatprep.subr.bf16.mxu0 %v9524_v9  ;;  %8774 = vmatprep.subr.bf16.mxu1 %v9524_v9 }
 0xc4f   : > { %8752 = vmatpush3.bf16.msra.mxu0 %v8751_v63  ;;  %8776 = vmatpush3.bf16.msra.mxu1 %v8775_v4 }
 0xc50   : > { %8753 = vmatprep.subr.bf16.mxu0 %v9524_v9  ;;  %8777 = vmatprep.subr.bf16.mxu1 %v9524_v9 }
 0xc53   : > { %8755 = vmatpush3.bf16.msra.mxu0 %v8754_v11  ;;  %8779 = vmatpush3.bf16.msra.mxu1 %v8778_v0 }
 0xc54   : > { %8756 = vmatprep.subr.bf16.mxu0 %v9524_v9  ;;  %8780 = vmatprep.subr.bf16.mxu1 %v9524_v9 }
 0xc57   : > { %8758 = vmatpush3.bf16.msra.mxu0 %v8757_v1  ;;  %8782 = vmatpush3.bf16.msra.mxu1 %v8781_v15 }
 0xc58   : > { %8759 = vmatprep.subr.bf16.mxu0 %v9524_v9  ;;  %8783 = vmatprep.subr.bf16.mxu1 %v9524_v9 }
 0xc5b   : > { %8761 = vmatpush3.bf16.msra.mxu0 %v8760_v52  ;;  %8785 = vmatpush3.bf16.msra.mxu1 %v8784_v21 }
 0xc5c   : > { %7781 = vmatprep.subr.mxu0 %v9523_v2  ;;  %7786 = vmatprep.subr.mxu1 %v9523_v2 }
 0xc5e   : > { %7744 = vmatmul.mubr.f32.vlgmr.msra.gmra.mrb[28].mxu0 %v10377_v56  ;;  %7779 = vmatmul.mubr.f32.vlgmr.msra.gmra.mrb[44].mxu1 %v10377_v56 }
 0xc5f   : > { %7783 = vmatprep.mubr.msk.f32.mxu0 %vm9525_vm1, %v9523_v2  ;;  %7788 = vmatprep.mubr.msk.f32.mxu1 %vm9525_vm1, %v9523_v2 }
 0xc91   : > { %v3437_v22 = vpop.f32.mrb[18].mxu0  ;;  %v3507_v23 = vpop.f32.mrb[34].mxu1 }
 0xc92   : > { %v7395_v24 = vpop.f32.mrb[19].mxu0  ;;  %v7430_v25 = vpop.f32.mrb[35].mxu1  ;;  %v3438_v39 = vadd.f32 %v5985_v33, %v3437_v22  ;;  %v3508_v40 = vadd.f32 %v5986_v34, %v3507_v23 }
 0xcb1   : > { %v3577_v26 = vpop.f32.mrb[20].mxu0  ;;  %v3647_v27 = vpop.f32.mrb[36].mxu1 }
 0xcb2   : > { %v7465_v28 = vpop.f32.mrb[21].mxu0  ;;  %v7500_v29 = vpop.f32.mrb[37].mxu1  ;;  %v3578_v51 = vadd.f32 %v5987_v45, %v3577_v26  ;;  %v3648_v53 = vadd.f32 %v5988_v46, %v3647_v27  ;;  %v6004_v45 = vld [vmem:[%s10836_s9 + $0x7] ss:$0 sm:$0xff] }
 0xcd1   : > { %v3811_v32 = vpop.f32.mrb[22].mxu0  ;;  %v3881_v57 = vpop.f32.mrb[38].mxu1 }
 0xcd2   : > { %v3812_v35 = vadd.f32 %v5993_v30, %v3811_v32  ;;  %v3882_v36 = vadd.f32 %v5994_v31, %v3881_v57  ;;  %v7535_v37 = vpop.f32.mrb[23].mxu0  ;;  %v7570_v38 = vpop.f32.mrb[39].mxu1 }
 0xcd4   : > { %7782 = vmatpush3.xpose.msra.mxu0 %v3812_v35  ;;  %7787 = vmatpush3.xpose.msra.mxu1 %v3882_v36 }
 0xcd5   : > { %7791 = vmatprep.subr.mxu0 %v9523_v2  ;;  %7796 = vmatprep.subr.mxu1 %v9523_v2 }
 0xcd7   : > { %7784 = vmatmul.mubr.f32.vlgmr.msra.gmra.mrb[30].mxu0 %v3438_v39  ;;  %7789 = vmatmul.mubr.f32.vlgmr.msra.gmra.mrb[46].mxu1 %v3508_v40 }
 0xcd8   : > { %7793 = vmatprep.mubr.msk.f32.mxu0 %vm9525_vm1, %v9523_v2  ;;  %7798 = vmatprep.mubr.msk.f32.mxu1 %vm9525_vm1, %v9523_v2 }
 0xcf1   : > { %v3951_v43 = vpop.f32.mrb[24].mxu0  ;;  %v4021_v44 = vpop.f32.mrb[40].mxu1 }
 0xcf2   : > { %v3952_v47 = vadd.f32 %v5995_v41, %v3951_v43  ;;  %v4022_v48 = vadd.f32 %v5996_v42, %v4021_v44  ;;  %v7605_v49 = vpop.f32.mrb[25].mxu0  ;;  %v7640_v50 = vpop.f32.mrb[41].mxu1  ;;  %v6003_v43 = vld [vmem:[%s10836_s9 + $0x6] ss:$0 sm:$0xff]  ;;  %s10847_s9 = sshll.u32 %s9975_s1, 3 }
 0xcf4   : > { %7792 = vmatpush3.xpose.msra.mxu0 %v3952_v47  ;;  %7797 = vmatpush3.xpose.msra.mxu1 %v4022_v48 }
 0xcf5   : > { %7801 = vmatprep.subr.mxu0 %v9523_v2  ;;  %7806 = vmatprep.subr.mxu1 %v9523_v2 }
 0xcf7   : > { %7794 = vmatmul.mubr.f32.vlgmr.msra.gmra.mrb[32].mxu0 %v3578_v51  ;;  %7799 = vmatmul.mubr.f32.vlgmr.msra.gmra.mrb[48].mxu1 %v3648_v53 }
 0xcf8   : > { %7803 = vmatprep.mubr.msk.f32.mxu0 %vm9525_vm1, %v9523_v2  ;;  %7808 = vmatprep.mubr.msk.f32.mxu1 %vm9525_vm1, %v9523_v2 }
 0xd11   : > { %v4185_v58 = vpop.f32.mrb[26].mxu0  ;;  %v4255_v59 = vpop.f32.mrb[42].mxu1 }
 0xd12   : > { %v4186_v60 = vadd.f32 %v6001_v54, %v4185_v58  ;;  %v4256_v61 = vadd.f32 %v6002_v55, %v4255_v59  ;;  %v7675_v62 = vpop.f32.mrb[27].mxu0  ;;  %v7710_v63 = vpop.f32.mrb[43].mxu1  ;;  %v5016_v54 = vld [vmem:[#allocation13 + $0x200] sm:$0xff]  ;;  %v5017_v55 = vld [vmem:[#allocation13 + $0x208] sm:$0xff] }
 0xd13   : > { %v5032_v58 = vld [vmem:[#allocation13 + $0x280] sm:$0xff]  ;;  %v5033_v59 = vld [vmem:[#allocation13 + $0x288] sm:$0xff] }
 0xd14   : > { %7802 = vmatpush3.msra.mxu0 %v4186_v60  ;;  %7807 = vmatpush3.msra.mxu1 %v4256_v61  ;;  %v8787_v61 = vpack.c.bf16 %v5017_v55, %v5016_v54  ;;  %v5066_v55 = vld [vmem:[#allocation13 + $0x390] sm:$0xff] }
 0xd15   : > { %7811 = vmatprep.subr.mxu0 %v9523_v2  ;;  %7816 = vmatprep.subr.mxu1 %v9523_v2 }
 0xd31   : > { %v4325_v4 = vpop.f32.mrb[28].mxu0  ;;  %v4395_v5 = vpop.f32.mrb[44].mxu1 }
 0xd32   : > { %v7745_v7 = vpop.f32.mrb[29].mxu0  ;;  %v7780_v8 = vpop.f32.mrb[45].mxu1  ;;  %v4326_v48 = vadd.f32 %v6003_v43, %v4325_v4  ;;  %v4396_v50 = vadd.f32 %v6004_v45, %v4395_v5  ;;  %v8811_v4 = vpack.c.bf16 %v5033_v59, %v5032_v58  ;;  %v5018_v5 = vld [vmem:[#allocation13 + $0x210] sm:$0xff]  ;;  %v5048_v45 = vld [vmem:[#allocation13 + $0x300] sm:$0xff]  ;;  %v5067_v58 = vld [vmem:[#allocation13 + $0x398] sm:$0xff] }
 0xd33   : > { %v5019_v7 = vld [vmem:[#allocation13 + $0x218] sm:$0xff] }
 0xdaa   : > { %v4465_v10 = vpop.f32.mrb[30].mxu0  ;;  %v4535_v11 = vpop.f32.mrb[46].mxu1 }
 0xdab   : > { %v4466_v0 = vadd.f32 %v4465_v10, %v10213_v6  ;;  %v4536_v12 = vadd.f32 %v4535_v11, %v10213_v6  ;;  %v7785_v13 = vpop.f32.mrb[31].mxu0  ;;  %v7790_v14 = vpop.f32.mrb[47].mxu1  ;;  %v5034_v10 = vld [vmem:[#allocation13 + $0x290] sm:$0xff]  ;;  %v5035_v11 = vld [vmem:[#allocation13 + $0x298] sm:$0xff] }
 0xdac   : > { %v5020_v13 = vld [vmem:[#allocation13 + $0x220] sm:$0xff]  ;;  %v5021_v14 = vld [vmem:[#allocation13 + $0x228] sm:$0xff] }
 0xdad   : > { %v4679_v16 = vsel %vm2338_vm6, %v4466_v0, -inf  ;;  %v4682_v1 = vsel %vm2338_vm6, %v4536_v12, -inf }
 0xdae   : > { %4680 = vmax.xlane.f32.xlu0 %v4679_v16  ;;  %4683 = vmax.xlane.f32.xlu1 %v4682_v1  ;;  %v5036_v16 = vld [vmem:[#allocation13 + $0x2a0] sm:$0xff]  ;;  %v5037_v1 = vld [vmem:[#allocation13 + $0x2a8] sm:$0xff] }
 0xdca   : > { %v4605_v15 = vpop.f32.mrb[32].mxu0  ;;  %v4675_v17 = vpop.f32.mrb[48].mxu1 }
 0xdcb   : > { %v4606_v18 = vadd.f32 %v4605_v15, %v10213_v6  ;;  %v4676_v19 = vadd.f32 %v4675_v17, %v10213_v6  ;;  %v7795_v20 = vpop.f32.mrb[33].mxu0  ;;  %v7800_v52 = vpop.f32.mrb[49].mxu1  ;;  %v8793_v15 = vpack.c.bf16 %v5021_v14, %v5020_v13  ;;  %v8817_v17 = vpack.c.bf16 %v5037_v1, %v5036_v16  ;;  %v5070_v13 = vld [vmem:[#allocation13 + $0x3b0] sm:$0xff]  ;;  %v5071_v14 = vld [vmem:[#allocation13 + $0x3b8] sm:$0xff] }
 0xdcc   : > { %v5038_v20 = vld [vmem:[#allocation13 + $0x2b0] sm:$0xff]  ;;  %v5039_v52 = vld [vmem:[#allocation13 + $0x2b8] sm:$0xff]  ;;  %v8868_v1 = vpack.c.bf16 %v5071_v14, %v5070_v13 }
 0xdcd   : > { %v4685_v21 = vsel %vm2338_vm6, %v4606_v18, -inf  ;;  %v4688_v22 = vsel %vm2338_vm6, %v4676_v19, -inf  ;;  %v5411_v13 = vld [vmem:[#allocation14 + $0xb0] sm:$0xff]  ;;  %v5412_v14 = vld [vmem:[#allocation14 + $0xb8] sm:$0xff] }
 0xdce   : > { %4686 = vmax.xlane.f32.xlu0 %v4685_v21  ;;  %4689 = vmax.xlane.f32.xlu1 %v4688_v22  ;;  %v8820_v22 = vpack.c.bf16 %v5039_v52, %v5038_v20 }
 0xe3b   : > { %v4681_v23 = vpop.xlane.xlu0 %4680  ;;  %v4684_v24 = vpop.xlane.xlu1 %4683 }
 0xe3c   : > { %v4691_v25 = vsub.f32 %v4466_v0, %v4681_v23  ;;  %v4692_v26 = vsub.f32 %v4536_v12, %v4684_v24  ;;  %v8790_v0 = vpack.c.bf16 %v5019_v7, %v5018_v5  ;;  %v8814_v12 = vpack.c.bf16 %v5035_v11, %v5034_v10  ;;  %v5024_v23 = vld [vmem:[#allocation13 + $0x240] sm:$0xff]  ;;  %v5025_v24 = vld [vmem:[#allocation13 + $0x248] sm:$0xff] }
 0xe3d   : > { %v5053_v5 = vld [vmem:[#allocation13 + $0x328] sm:$0xff]  ;;  %v5068_v7 = vld [vmem:[#allocation13 + $0x3a0] sm:$0xff] }
 0xe3e   : > { %v4695_v27 = vmul.f32 1.442695, %v4691_v25  ;;  %v4697_v28 = vmul.f32 1.442695, %v4692_v26  ;;  %v5040_v25 = vld [vmem:[#allocation13 + $0x2c0] sm:$0xff]  ;;  %v5041_v26 = vld [vmem:[#allocation13 + $0x2c8] sm:$0xff] }
 0xe40   : > { %9119 = vpow2.f32 %v4695_v27  ;;  %v8799_v27 = vpack.c.bf16 %v5025_v24, %v5024_v23  ;;  %v5074_v23 = vld [vmem:[#allocation13 + $0x3d0] sm:$0xff]  ;;  %v5075_v24 = vld [vmem:[#allocation13 + $0x3d8] sm:$0xff] }
 0xe41   : > { %9121 = vpow2.f32 %v4697_v28  ;;  %v8823_v28 = vpack.c.bf16 %v5041_v26, %v5040_v25  ;;  %v8874_v26 = vpack.c.bf16 %v5075_v24, %v5074_v23  ;;  %v5419_v23 = vld [vmem:[#allocation14 + $0xf0] sm:$0xff]  ;;  %v5420_v24 = vld [vmem:[#allocation14 + $0xf8] sm:$0xff] }
 0xe4a   : > { %v9120_v29 = vpop.eup %9119 }
 0xe4b   : > { %v9122_v30 = vpop.eup %9121  ;;  %v4703_v6 = vsel %vm2338_vm6, %v9120_v29, 0.0 }
 0xe4c   : > { %4704 = vadd.xlane.f32.xlu0 %v4703_v6  ;;  %v4706_v31 = vsel %vm2338_vm6, %v9122_v30, 0.0  ;;  %v5042_v6 = vld [vmem:[#allocation13 + $0x2d0] sm:$0xff] }
 0xe4d   : > { %4707 = vadd.xlane.f32.xlu1 %v4706_v31  ;;  %v5043_v31 = vld [vmem:[#allocation13 + $0x2d8] sm:$0xff] }
 0xe5b   : > { %v4687_v32 = vpop.xlane.xlu0 %4686  ;;  %v4690_v57 = vpop.xlane.xlu1 %4689 }
 0xe5c   : > { %v4693_v33 = vsub.f32 %v4606_v18, %v4687_v32  ;;  %v4694_v34 = vsub.f32 %v4676_v19, %v4690_v57  ;;  %v5022_v18 = vld [vmem:[#allocation13 + $0x230] sm:$0xff]  ;;  %v5023_v19 = vld [vmem:[#allocation13 + $0x238] sm:$0xff]  ;;  %v8826_v57 = vpack.c.bf16 %v5043_v31, %v5042_v6 }
 0xe5d   : > { %v8796_v21 = vpack.c.bf16 %v5023_v19, %v5022_v18  ;;  %v5072_v18 = vld [vmem:[#allocation13 + $0x3c0] sm:$0xff]  ;;  %v5073_v19 = vld [vmem:[#allocation13 + $0x3c8] sm:$0xff] }
 0xe5e   : > { %v4699_v35 = vmul.f32 1.442695, %v4693_v33  ;;  %v4701_v36 = vmul.f32 1.442695, %v4694_v34  ;;  %v5028_v33 = vld [vmem:[#allocation13 + $0x260] sm:$0xff]  ;;  %v5029_v34 = vld [vmem:[#allocation13 + $0x268] sm:$0xff]  ;;  %v8871_v52 = vpack.c.bf16 %v5073_v19, %v5072_v18 }
 0xe5f   : > { %v5415_v18 = vld [vmem:[#allocation14 + $0xd0] sm:$0xff]  ;;  %v5416_v19 = vld [vmem:[#allocation14 + $0xd8] sm:$0xff] }
 0xe60   : > { %9123 = vpow2.f32 %v4699_v35  ;;  %v5044_v35 = vld [vmem:[#allocation13 + $0x2e0] sm:$0xff] }
 0xe61   : > { %9125 = vpow2.f32 %v4701_v36  ;;  %v5045_v36 = vld [vmem:[#allocation13 + $0x2e8] sm:$0xff] }
 0xe6a   : > { %v9124_v37 = vpop.eup %9123 }
 0xe6b   : > { %v9126_v38 = vpop.eup %9125  ;;  %v4709_v39 = vsel %vm2338_vm6, %v9124_v37, 0.0 }
 0xe6c   : > { %4710 = vadd.xlane.f32.xlu0 %v4709_v39  ;;  %v4712_v40 = vsel %vm2338_vm6, %v9126_v38, 0.0  ;;  %v5030_v39 = vld [vmem:[#allocation13 + $0x270] sm:$0xff] }
 0xe6d   : > { %4713 = vadd.xlane.f32.xlu1 %v4712_v40  ;;  %v5031_v40 = vld [vmem:[#allocation13 + $0x278] sm:$0xff] }
 0xe6e   : > { %v8808_v43 = vpack.c.bf16 %v5031_v40, %v5030_v39 }
 0xed9   : > { %v4705_v41 = vpop.xlane.xlu0 %4704 }
 0xeda   : > { %9127 = vrcp.f32 %v4705_v41  ;;  %v4708_v42 = vpop.xlane.xlu1 %4707  ;;  %v5046_v41 = vld [vmem:[#allocation13 + $0x2f0] sm:$0xff] }
 0xedb   : > { %9129 = vrcp.f32 %v4708_v42  ;;  %v5047_v42 = vld [vmem:[#allocation13 + $0x2f8] sm:$0xff] }
 0xee4   : > { %v9128_v44 = vpop.eup %9127 }
 0xee5   : > { %v9130_v46 = vpop.eup %9129  ;;  %v4719_v47 = vmul.f32 %v9128_v44, %v9120_v29  ;;  %v5026_v29 = vld [vmem:[#allocation13 + $0x250] sm:$0xff]  ;;  %v8832_v44 = vpack.c.bf16 %v5047_v42, %v5046_v41 }
 0xee6   : > { %v4720_v49 = vmul.f32 %v9130_v46, %v9122_v30  ;;  %v5027_v30 = vld [vmem:[#allocation13 + $0x258] sm:$0xff]  ;;  %v5049_v46 = vld [vmem:[#allocation13 + $0x308] sm:$0xff] }
 0xee7   : > { %7804 = vmatmul.mubr.msk.f32.vlgmr.msra.gmra.mrb[34].mxu0 %vm2338_vm6, %v4719_v47  ;;  %v8802_v32 = vpack.c.bf16 %v5027_v30, %v5026_v29  ;;  %v5064_v47 = vld [vmem:[#allocation13 + $0x380] sm:$0xff]  ;;  %v5077_v30 = vld [vmem:[#allocation13 + $0x3e8] sm:$0xff] }
 0xee8   : > { %7809 = vmatmul.mubr.msk.f32.vlgmr.msra.gmra.mrb[50].mxu1 %vm2338_vm6, %v4720_v49  ;;  %7812 = vmatpush3.msra.mxu0 %v4326_v48  ;;  %v5065_v48 = vld [vmem:[#allocation13 + $0x388] sm:$0xff]  ;;  %v8835_v49 = vpack.c.bf16 %v5049_v46, %v5048_v45  ;;  %v5076_v29 = vld [vmem:[#allocation13 + $0x3e0] sm:$0xff] }
 0xee9   : > { %7817 = vmatpush3.msra.mxu1 %v4396_v50  ;;  %7813 = vmatprep.mubr.msk.f32.mxu0 %vm9525_vm1, %v9523_v2  ;;  %v8859_v50 = vpack.c.bf16 %v5065_v48, %v5064_v47  ;;  %v8877_v31 = vpack.c.bf16 %v5077_v30, %v5076_v29  ;;  %v5504_v30 = vld [vmem:[#allocation16 + $0x98] sm:$0xff] }
 0xeea   : > { %7818 = vmatprep.mubr.msk.f32.mxu1 %vm9525_vm1, %v9523_v2  ;;  %8786 = vmatprep.subr.bf16.mxu0 %v9524_v9 }
 0xeeb   : > { %8810 = vmatprep.subr.bf16.mxu1 %v9524_v9 }
 0xef9   : > { %v4711_v51 = vpop.xlane.xlu0 %4710 }
 0xefa   : > { %9131 = vrcp.f32 %v4711_v51  ;;  %v4714_v53 = vpop.xlane.xlu1 %4713  ;;  %v5050_v51 = vld [vmem:[#allocation13 + $0x310] sm:$0xff] }
 0xefb   : > { %9133 = vrcp.f32 %v4714_v53  ;;  %v5051_v53 = vld [vmem:[#allocation13 + $0x318] sm:$0xff] }
 0xf04   : > { %v9132_v60 = vpop.eup %9131 }
 0xf05   : > { %v9134_v62 = vpop.eup %9133  ;;  %v4721_v63 = vmul.f32 %v9132_v60, %v9124_v37  ;;  %v8805_v37 = vpack.c.bf16 %v5029_v34, %v5028_v33  ;;  %v5078_v33 = vld [vmem:[#allocation13 + $0x3f0] sm:$0xff]  ;;  %v5079_v34 = vld [vmem:[#allocation13 + $0x3f8] sm:$0xff] }
 0xf06   : > { %v4722_v8 = vmul.f32 %v9134_v62, %v9126_v38  ;;  %v8829_v38 = vpack.c.bf16 %v5045_v36, %v5044_v35  ;;  %v8838_v62 = vpack.c.bf16 %v5051_v53, %v5050_v51  ;;  %v8880_v36 = vpack.c.bf16 %v5079_v34, %v5078_v33  ;;  %v5507_v33 = vld [vmem:[#allocation16 + $0xb0] sm:$0xff]  ;;  %v5508_v34 = vld [vmem:[#allocation16 + $0xb8] sm:$0xff] }
 0xf07   : > { %7814 = vmatmul.mubr.msk.f32.vlgmr.msra.gmra.mrb[36].mxu0 %vm2338_vm6, %v4721_v63  ;;  %v8862_v63 = vpack.c.bf16 %v5067_v58, %v5066_v55 }
 0xf08   : > { %7819 = vmatmul.mubr.msk.f32.vlgmr.msra.gmra.mrb[52].mxu1 %vm2338_vm6, %v4722_v8  ;;  %8788 = vmatpush3.bf16.msra.mxu0 %v8787_v61  ;;  %v5069_v8 = vld [vmem:[#allocation13 + $0x3a8] sm:$0xff] }
 0xf09   : > { %8812 = vmatpush3.bf16.msra.mxu1 %v8811_v4  ;;  %8789 = vmatprep.subr.bf16.mxu0 %v9524_v9  ;;  %v5052_v4 = vld [vmem:[#allocation13 + $0x320] sm:$0xff]  ;;  %v8865_v11 = vpack.c.bf16 %v5069_v8, %v5068_v7  ;;  %v5410_v7 = vld [vmem:[#allocation14 + $0xa8] sm:$0xff] }
 0xf0a   : > { %8813 = vmatprep.subr.bf16.mxu1 %v9524_v9  ;;  %7853 = vmatprep.mubr.msk.f32.mxu0 %vm9525_vm1, %v9523_v2  ;;  %v8841_v10 = vpack.c.bf16 %v5053_v5, %v5052_v4  ;;  %v5409_v5 = vld [vmem:[#allocation14 + $0xa0] sm:$0xff] }
 0xf0b   : > { %7888 = vmatprep.mubr.msk.f32.mxu1 %vm9525_vm1, %v9523_v2  ;;  %v8889_v8 = vpack.c.bf16 %v5410_v7, %v5409_v5  ;;  %v6018_v5 = vld [vmem:[%s10841_s30 + $0x1] ss:$0 sm:$0xff] }
 0xf0c   : > { %8791 = vmatpush3.bf16.msra.mxu0 %v8790_v0  ;;  %v5054_v0 = vld [vmem:[#allocation13 + $0x330] sm:$0xff] }
 0xf0d   : > { %8815 = vmatpush3.bf16.msra.mxu1 %v8814_v12  ;;  %8792 = vmatprep.subr.bf16.mxu0 %v9524_v9  ;;  %v5055_v12 = vld [vmem:[#allocation13 + $0x338] sm:$0xff] }
 0xf0e   : > { %8816 = vmatprep.subr.bf16.mxu1 %v9524_v9  ;;  %v8844_v16 = vpack.c.bf16 %v5055_v12, %v5054_v0 }
 0xf10   : > { %8794 = vmatpush3.bf16.msra.mxu0 %v8793_v15  ;;  %v5056_v15 = vld [vmem:[#allocation13 + $0x340] sm:$0xff] }
 0xf11   : > { %8818 = vmatpush3.bf16.msra.mxu1 %v8817_v17  ;;  %8795 = vmatprep.subr.bf16.mxu0 %v9524_v9  ;;  %v5057_v17 = vld [vmem:[#allocation13 + $0x348] sm:$0xff] }
 0xf12   : > { %8819 = vmatprep.subr.bf16.mxu1 %v9524_v9  ;;  %v8847_v20 = vpack.c.bf16 %v5057_v17, %v5056_v15  ;;  %v5414_v15 = vld [vmem:[#allocation14 + $0xc8] sm:$0xff] }
 0xf14   : > { %8797 = vmatpush3.bf16.msra.mxu0 %v8796_v21  ;;  %v5058_v21 = vld [vmem:[#allocation13 + $0x350] sm:$0xff] }
 0xf15   : > { %8821 = vmatpush3.bf16.msra.mxu1 %v8820_v22  ;;  %8798 = vmatprep.subr.bf16.mxu0 %v9524_v9  ;;  %v5059_v22 = vld [vmem:[#allocation13 + $0x358] sm:$0xff] }
 0xf16   : > { %8822 = vmatprep.subr.bf16.mxu1 %v9524_v9  ;;  %v8850_v25 = vpack.c.bf16 %v5059_v22, %v5058_v21  ;;  %v5418_v21 = vld [vmem:[#allocation14 + $0xe8] sm:$0xff] }
 0xf18   : > { %8800 = vmatpush3.bf16.msra.mxu0 %v8799_v27  ;;  %v5060_v27 = vld [vmem:[#allocation13 + $0x360] sm:$0xff] }
 0xf19   : > { %8824 = vmatpush3.bf16.msra.mxu1 %v8823_v28  ;;  %8801 = vmatprep.subr.bf16.mxu0 %v9524_v9  ;;  %v5061_v28 = vld [vmem:[#allocation13 + $0x368] sm:$0xff] }
 0xf1a   : > { %8825 = vmatprep.subr.bf16.mxu1 %v9524_v9  ;;  %v8853_v6 = vpack.c.bf16 %v5061_v28, %v5060_v27  ;;  %v5502_v27 = vld [vmem:[#allocation16 + $0x88] sm:$0xff]  ;;  %v5503_v28 = vld [vmem:[#allocation16 + $0x90] sm:$0xff] }
 0xf1c   : > { %8803 = vmatpush3.bf16.msra.mxu0 %v8802_v32  ;;  %v5062_v32 = vld [vmem:[#allocation13 + $0x370] sm:$0xff] }
 0xf1d   : > { %8827 = vmatpush3.bf16.msra.mxu1 %v8826_v57  ;;  %8804 = vmatprep.subr.bf16.mxu0 %v9524_v9  ;;  %v5063_v57 = vld [vmem:[#allocation13 + $0x378] sm:$0xff] }
 0xf1e   : > { %8828 = vmatprep.subr.bf16.mxu1 %v9524_v9  ;;  %v8856_v35 = vpack.c.bf16 %v5063_v57, %v5062_v32  ;;  %v5506_v32 = vld [vmem:[#allocation16 + $0xa8] sm:$0xff] }
 0xf20   : > { %8806 = vmatpush3.bf16.msra.mxu0 %v8805_v37 }
 0xf21   : > { %8830 = vmatpush3.bf16.msra.mxu1 %v8829_v38  ;;  %8807 = vmatprep.subr.bf16.mxu0 %v9524_v9 }
 0xf22   : > { %8831 = vmatprep.subr.bf16.mxu1 %v9524_v9 }
 0xf24   : > { %8809 = vmatpush3.bf16.msra.mxu0 %v8808_v43 }
 0xf25   : > { %8833 = vmatpush3.bf16.msra.mxu1 %v8832_v44  ;;  %8834 = vmatprep.subr.bf16.mxu0 %v9524_v9 }
 0xf26   : > { %8858 = vmatprep.subr.bf16.mxu1 %v9524_v9 }
 0xfba   : > { %v4792_v54 = vpop.f32.mrb[34].mxu0 }
 0xfbb   : > { %v4865_v59 = vpop.f32.mrb[50].mxu1  ;;  %v7805_v60 = vpop.f32.mrb[35].mxu0  ;;  %7854 = vmatmul.mubr.f32.vlgmr.msra.gmra.mrb[38].mxu0 %v4792_v54 }
 0xfbc   : > { %v7810_v61 = vpop.f32.mrb[51].mxu1  ;;  %7889 = vmatmul.mubr.f32.vlgmr.msra.gmra.mrb[54].mxu1 %v4865_v59  ;;  %8836 = vmatpush3.bf16.msra.mxu0 %v8835_v49  ;;  %v5405_v59 = vld [vmem:[#allocation14 + $0x80] sm:$0xff]  ;;  %v5406_v60 = vld [vmem:[#allocation14 + $0x88] sm:$0xff] }
 0xfbd   : > { %8860 = vmatpush3.bf16.msra.mxu1 %v8859_v50  ;;  %8837 = vmatprep.subr.bf16.mxu0 %v9524_v9  ;;  %v6010_v50 = vld [vmem:[%s10838_s11 + $0x1] ss:$0 sm:$0xff]  ;;  %v5407_v61 = vld [vmem:[#allocation14 + $0x90] sm:$0xff]  ;;  %s890_s11 = scalar_lea.vmem [#allocation19], %s10847_s9  ;;  %s9527_s9 = smov [#allocation19]  }
 0xfbe   : > { %8861 = vmatprep.subr.bf16.mxu1 %v9524_v9  ;;  %7923 = vmatprep.mubr.msk.f32.mxu0 %vm9525_vm1, %v9523_v2  ;;  %s5764_s12 = sshll.u32 %s890_s11, 4  ;;  %s10685_s12 = int_to_ptr.vmem [resolvable:$true] %s5764_s12 }
 0xfbf   : > { %7958 = vmatprep.mubr.msk.f32.mxu1 %vm9525_vm1, %v9523_v2 }
 0xfc0   : > { %8839 = vmatpush3.bf16.msra.mxu0 %v8838_v62  ;;  %v8883_v62 = vpack.c.bf16 %v5406_v60, %v5405_v59  ;;  %v6016_v60 = vld [vmem:[%s10840_s23 + $0x1] ss:$0 sm:$0xff] }
 0xfc1   : > { %8863 = vmatpush3.bf16.msra.mxu1 %v8862_v63  ;;  %8840 = vmatprep.subr.bf16.mxu0 %v9524_v9  ;;  %v5408_v63 = vld [vmem:[#allocation14 + $0x98] sm:$0xff] }
 0xfc2   : > { %8864 = vmatprep.subr.bf16.mxu1 %v9524_v9  ;;  %v8886_v4 = vpack.c.bf16 %v5408_v63, %v5407_v61 }
 0xfc4   : > { %8842 = vmatpush3.bf16.msra.mxu0 %v8841_v10 }
 0xfc5   : > { %8866 = vmatpush3.bf16.msra.mxu1 %v8865_v11  ;;  %8843 = vmatprep.subr.bf16.mxu0 %v9524_v9 }
 0xfc6   : > { %8867 = vmatprep.subr.bf16.mxu1 %v9524_v9 }
 0xfc8   : > { %8845 = vmatpush3.bf16.msra.mxu0 %v8844_v16  ;;  %v8892_v16 = vpack.c.bf16 %v5412_v14, %v5411_v13 }
 0xfc9   : > { %8869 = vmatpush3.bf16.msra.mxu1 %v8868_v1  ;;  %8846 = vmatprep.subr.bf16.mxu0 %v9524_v9  ;;  %v5413_v1 = vld [vmem:[#allocation14 + $0xc0] sm:$0xff] }
 0xfca   : > { %8870 = vmatprep.subr.bf16.mxu1 %v9524_v9  ;;  %v8895_v17 = vpack.c.bf16 %v5414_v15, %v5413_v1 }
 0xfcc   : > { %8848 = vmatpush3.bf16.msra.mxu0 %v8847_v20  ;;  %v8898_v20 = vpack.c.bf16 %v5416_v19, %v5415_v18  ;;  %v6021_v18 = vld [vmem:[%s10842_s0 + $0x1] ss:$0 sm:$0xff]  ;;  %s10846_s0 = sld [smem:[#allocation48_spill]] }
 0xfcd   : > { %8872 = vmatpush3.bf16.msra.mxu1 %v8871_v52  ;;  %8849 = vmatprep.subr.bf16.mxu0 %v9524_v9  ;;  %v5417_v52 = vld [vmem:[#allocation14 + $0xe0] sm:$0xff] }
 0xfce   : > { %8873 = vmatprep.subr.bf16.mxu1 %v9524_v9  ;;  %v8901_v22 = vpack.c.bf16 %v5418_v21, %v5417_v52 }
 0xfd0   : > { %8851 = vmatpush3.bf16.msra.mxu0 %v8850_v25  ;;  %v8904_v25 = vpack.c.bf16 %v5420_v24, %v5419_v23  ;;  %v5656_v23 = vld [vmem:[#allocation17] sm:$0xff]  ;;  %v5657_v24 = vld [vmem:[#allocation17 + $0x8] sm:$0xff] }
 0xfd1   : > { %8875 = vmatpush3.bf16.msra.mxu1 %v8874_v26  ;;  %8852 = vmatprep.subr.bf16.mxu0 %v9524_v9  ;;  %v5501_v26 = vld [vmem:[#allocation16 + $0x80] sm:$0xff] }
 0xfd2   : > { %8876 = vmatprep.subr.bf16.mxu1 %v9524_v9  ;;  %v8907_v29 = vpack.c.bf16 %v5502_v27, %v5501_v26  ;;  %v8931_v26 = vpack.c.bf16 %v5657_v24, %v5656_v23  ;;  %v5659_v27 = vld [vmem:[#allocation17 + $0x18] sm:$0xff] }
 0xfd4   : > { %8854 = vmatpush3.bf16.msra.mxu0 %v8853_v6  ;;  %v8910_v6 = vpack.c.bf16 %v5504_v30, %v5503_v28  ;;  %v5661_v30 = vld [vmem:[#allocation17 + $0x28] sm:$0xff] }
 0xfd5   : > { %8878 = vmatpush3.bf16.msra.mxu1 %v8877_v31  ;;  %8855 = vmatprep.subr.bf16.mxu0 %v9524_v9  ;;  %v5505_v31 = vld [vmem:[#allocation16 + $0xa0] sm:$0xff] }
 0xfd6   : > { %8879 = vmatprep.subr.bf16.mxu1 %v9524_v9  ;;  %v8913_v57 = vpack.c.bf16 %v5506_v32, %v5505_v31 }
 0xfd8   : > { %8857 = vmatpush3.bf16.msra.mxu0 %v8856_v35  ;;  %v8916_v35 = vpack.c.bf16 %v5508_v34, %v5507_v33 }
 0xfd9   : > { %8881 = vmatpush3.bf16.msra.mxu1 %v8880_v36  ;;  %8882 = vmatprep.subr.bf16.mxu0 %v9524_v9  ;;  %v5509_v36 = vld [vmem:[#allocation16 + $0xc0] sm:$0xff] }
 0xfda   : > { %v4938_v37 = vpop.f32.mrb[36].mxu0  ;;  %8906 = vmatprep.subr.bf16.mxu1 %v9524_v9 }
 0xfdb   : > { %v5011_v38 = vpop.f32.mrb[52].mxu1  ;;  %v7815_v39 = vpop.f32.mrb[37].mxu0  ;;  %7924 = vmatmul.mubr.f32.vlgmr.msra.gmra.mrb[40].mxu0 %v4938_v37  ;;  %v5510_v37 = vld [vmem:[#allocation16 + $0xc8] sm:$0xff] }
 0xfdc   : > { %v7820_v40 = vpop.f32.mrb[53].mxu1  ;;  %7959 = vmatmul.mubr.f32.vlgmr.msra.gmra.mrb[56].mxu1 %v5011_v38  ;;  %7993 = vmatprep.mubr.msk.f32.mxu0 %vm9525_vm1, %v9523_v2  ;;  %v8919_v38 = vpack.c.bf16 %v5510_v37, %v5509_v36  ;;  %v5511_v39 = vld [vmem:[#allocation16 + $0xd0] sm:$0xff]  ;;  %v5663_v36 = vld [vmem:[#allocation17 + $0x38] sm:$0xff] }
 0xfdd   : > { %8028 = vmatprep.mubr.msk.f32.mxu1 %vm9525_vm1, %v9523_v2  ;;  %8884 = vmatpush3.bf16.msra.mxu0 %v8883_v62  ;;  %v5512_v40 = vld [vmem:[#allocation16 + $0xd8] sm:$0xff] }
 0xfde   : > { %8885 = vmatprep.subr.bf16.mxu0 %v9524_v9  ;;  %8908 = vmatpush3.bf16.msra.mxu1 %v8907_v29  ;;  %v5660_v29 = vld [vmem:[#allocation17 + $0x20] sm:$0xff] }
 0xfdf   : > { %8909 = vmatprep.subr.bf16.mxu1 %v9524_v9 }
 0xfe1   : > { %8887 = vmatpush3.bf16.msra.mxu0 %v8886_v4 }
 0xfe2   : > { %8888 = vmatprep.subr.bf16.mxu0 %v9524_v9  ;;  %8911 = vmatpush3.bf16.msra.mxu1 %v8910_v6  ;;  %v8937_v6 = vpack.c.bf16 %v5661_v30, %v5660_v29 }
 0xfe3   : > { %8912 = vmatprep.subr.bf16.mxu1 %v9524_v9 }
 0xfe5   : > { %8890 = vmatpush3.bf16.msra.mxu0 %v8889_v8 }
 0xfe6   : > { %8891 = vmatprep.subr.bf16.mxu0 %v9524_v9  ;;  %8914 = vmatpush3.bf16.msra.mxu1 %v8913_v57 }
 0xfe7   : > { %8915 = vmatprep.subr.bf16.mxu1 %v9524_v9 }
 0xfe9   : > { %8893 = vmatpush3.bf16.msra.mxu0 %v8892_v16 }
 0xfea   : > { %8894 = vmatprep.subr.bf16.mxu0 %v9524_v9  ;;  %8917 = vmatpush3.bf16.msra.mxu1 %v8916_v35  ;;  %v5662_v35 = vld [vmem:[#allocation17 + $0x30] sm:$0xff] }
 0xfeb   : > { %8918 = vmatprep.subr.bf16.mxu1 %v9524_v9  ;;  %v8940_v37 = vpack.c.bf16 %v5663_v36, %v5662_v35 }
 0xfed   : > { %8896 = vmatpush3.bf16.msra.mxu0 %v8895_v17 }
 0xfee   : > { %8897 = vmatprep.subr.bf16.mxu0 %v9524_v9  ;;  %8920 = vmatpush3.bf16.msra.mxu1 %v8919_v38  ;;  %v5664_v38 = vld [vmem:[#allocation17 + $0x40] sm:$0xff] }
 0xfef   : > { %8921 = vmatprep.subr.bf16.mxu1 %v9524_v9 }
 0xff1   : > { %8899 = vmatpush3.bf16.msra.mxu0 %v8898_v20  ;;  %v6022_v20 = vld [vmem:[%s10843_s20 + $0x1] ss:$0 sm:$0xff] }
 0xff2   : > { %8900 = vmatprep.subr.bf16.mxu0 %v9524_v9 }
 0xff5   : > { %8902 = vmatpush3.bf16.msra.mxu0 %v8901_v22 }
 0xff6   : > { %8903 = vmatprep.subr.bf16.mxu0 %v9524_v9 }
 0xff9   : > { %8905 = vmatpush3.bf16.msra.mxu0 %v8904_v25  ;;  %v5658_v25 = vld [vmem:[#allocation17 + $0x10] sm:$0xff] }
 0xffa   : > { %8930 = vmatprep.subr.bf16.mxu0 %v9524_v9  ;;  %v8934_v28 = vpack.c.bf16 %v5659_v27, %v5658_v25 }
0x108e   : > { %v5146_v41 = vpop.f32.mrb[38].mxu0 }
0x108f   : > { %v5216_v42 = vpop.f32.mrb[54].mxu1  ;;  %v7855_v43 = vpop.f32.mrb[39].mxu0 }
0x1090   : > { %v5360_v44 = vadd.f32 %v5216_v42, %v5146_v41  ;;  %v7890_v45 = vpop.f32.mrb[55].mxu1  ;;  %v8922_v41 = vpack.c.bf16 %v5512_v40, %v5511_v39  ;;  %v5513_v42 = vld [vmem:[#allocation16 + $0xe0] sm:$0xff]  ;;  %v5514_v43 = vld [vmem:[#allocation16 + $0xe8] sm:$0xff] }
0x1091   : > { %v5665_v39 = vld [vmem:[#allocation17 + $0x48] sm:$0xff] }
0x1092   : > { %8923 = vmatpush3.bf16.msra.mxu1 %v8922_v41  ;;  %v8943_v40 = vpack.c.bf16 %v5665_v39, %v5664_v38  ;;  %v5666_v41 = vld [vmem:[#allocation17 + $0x50] sm:$0xff] }
0x1093   : > { %8924 = vmatprep.subr.bf16.mxu1 %v9524_v9 }
0x10ae   : > { %v5286_v46 = vpop.f32.mrb[40].mxu0 }
0x10af   : > { %v5361_v47 = vadd.f32 %v5360_v44, %v5286_v46  ;;  %v5356_v48 = vpop.f32.mrb[56].mxu1  ;;  %v7925_v49 = vpop.f32.mrb[41].mxu0  ;;  %v8925_v44 = vpack.c.bf16 %v5514_v43, %v5513_v42  ;;  %v5667_v42 = vld [vmem:[#allocation17 + $0x58] sm:$0xff] }
0x10b0   : > { %v7960_v51 = vpop.f32.mrb[57].mxu1  ;;  %v6013_v49 = vld [vmem:[%s10743_s16 + $0x1] ss:$0 sm:$0xff]  ;;  %v8946_v43 = vpack.c.bf16 %v5667_v42, %v5666_v41 }
0x10b1   : > { %v5362_v53 = vadd.f32 %v5361_v47, %v5356_v48  ;;  %8926 = vmatpush3.bf16.msra.mxu1 %v8925_v44  ;;  %v6014_v51 = vld [vmem:[%s10839_s6 + $0x1] ss:$0 sm:$0xff]  ;;  %v5668_v44 = vld [vmem:[#allocation17 + $0x60] sm:$0xff]  ;;  %s6027_s6 = sshll.u32 %s9674_s29, 7  ;;  %s9427_s29 = sshll.u32 %s9527_s9, 4  ;;  %s9428_s29 = int_to_ptr.vmem [resolvable:$false] %s9427_s29 }
0x10b2   : > { %8927 = vmatprep.subr.bf16.mxu1 %v9524_v9  ;;  %p9430_p11 = scmp.lt.s32.totalorder %s10685_s12, %s9428_s29 }
0x10b3   : > { %v5371_v54 = vadd.f32 %v6010_v50, %v5362_v53 }
0x10b5   : > { %v5372_v55 = vadd.f32 %v5371_v54, %v10377_v56 }
0x10b7   : > { %v5377_v58 = vmul.f32 %v10010_v3, %v5372_v55 }
0x10b9   : > { %5378 = vadd.xlane.f32.xlu0 %v5377_v58  ;;  %v5516_v58 = vld [vmem:[#allocation16 + $0xf8] sm:$0xff] }
0x1146   : > { %v5379_v56 = vpop.xlane.xlu0 %5378 }
0x1147   : > { %v5380_v10 = vmul.f32 0.03125, %v5379_v56 }
0x1149   : > { %v5381_v11 = vsub.f32 %v5372_v55, %v5380_v10  ;;  %v5515_v55 = vld [vmem:[#allocation16 + $0xf0] sm:$0xff] }
0x114a   : > { %v8928_v59 = vpack.c.bf16 %v5516_v58, %v5515_v55  ;;  %v6024_v58 = vld [vmem:[%s10845_s17] ss:$0 sm:$0xff]  ;;  %s9429_s17 = scalar_lea.vmem %s9428_s29, 256 }
0x114b   : > { %v10620_v0 = vmul.f32 %v10010_v3, %v5381_v11 }
0x114c   : > { %8929 = vmatpush3.bf16.msra.mxu1 %v8928_v59 }
0x114d   : > { %v5383_v12 = vmul.f32 %v10620_v0, %v10620_v0 }
0x114f   : > { %5384 = vadd.xlane.f32.xlu1 %v5383_v12 }
0x11dc   : > { %v5385_v45 = vpop.xlane.xlu1 %5384 }
0x11dd   : > { %v5386_v46 = vmul.f32 0.03125, %v5385_v45  ;;  %v5669_v45 = vld [vmem:[#allocation17 + $0x68] sm:$0xff] }
0x11df   : > { %v5387_v47 = vadd.f32 1e-05, %v5386_v46  ;;  %v5670_v46 = vld [vmem:[#allocation17 + $0x70] sm:$0xff] }
0x11e1   : > { %9135 = vrsqrt.f32 %v5387_v47  ;;  %v5671_v47 = vld [vmem:[#allocation17 + $0x78] sm:$0xff] }
0x11eb   : > { %v9136_v48 = vpop.eup %9135 }
0x11ec   : > { %v5389_v50 = vmul.f32 %v9136_v48, %v10620_v0  ;;  %v8952_v48 = vpack.c.bf16 %v5671_v47, %v5670_v46 }
0x11ee   : > { %v5396_v53 = vmul.f32 %v6013_v49, %v5389_v50 }
0x11f0   : > { %v5403_v54 = vadd.f32 %v6014_v51, %v5396_v53 }
0x11f2   : > { %7994 = vmatmul.mubr.f32.vlgmr.msra.gmra.mrb[42].mxu0 %v5403_v54 }
0x11f3   : > { %8063 = vmatprep.mubr.msk.f32.mxu0 %vm9525_vm1, %v9523_v2  ;;  %8932 = vmatpush3.bf16.msra.mxu0 %v8931_v26 }
0x11f4   : > { %8933 = vmatprep.subr.bf16.mxu0 %v9524_v9 }
0x11f7   : > { %8935 = vmatpush3.bf16.msra.mxu0 %v8934_v28 }
0x11f8   : > { %8936 = vmatprep.subr.bf16.mxu0 %v9524_v9 }
0x11fb   : > { %8938 = vmatpush3.bf16.msra.mxu0 %v8937_v6 }
0x11fc   : > { %8939 = vmatprep.subr.bf16.mxu0 %v9524_v9 }
0x11ff   : > { %8941 = vmatpush3.bf16.msra.mxu0 %v8940_v37 }
0x1200   : > { %8942 = vmatprep.subr.bf16.mxu0 %v9524_v9 }
0x1203   : > { %8944 = vmatpush3.bf16.msra.mxu0 %v8943_v40 }
0x1204   : > { %8945 = vmatprep.subr.bf16.mxu0 %v9524_v9 }
0x1207   : > { %8947 = vmatpush3.bf16.msra.mxu0 %v8946_v43 }
0x1208   : > { %8948 = vmatprep.subr.bf16.mxu0 %v9524_v9 }
0x12c5   : > { %v5495_v61 = vpop.f32.mrb[42].mxu0 }
0x12c6   : > { %v5496_v62 = vadd.f32 %v6016_v60, %v5495_v61  ;;  %v7995_v63 = vpop.f32.mrb[43].mxu0 }
0x12c8   : > { %v5499_v4 = vmax.f32 %v5496_v62, 0.0 }
0x12ca   : > { %8029 = vmatmul.mubr.f32.vlgmr.msra.gmra.mrb[58].mxu1 %v5499_v4 }
0x139d   : > { %v5591_v7 = vpop.f32.mrb[58].mxu1 }
0x139e   : > { %v5592_v8 = vadd.f32 %v6018_v5, %v5591_v7  ;;  %v8030_v2 = vpop.f32.mrb[59].mxu1 }
0x13a0   : > { %v5595_v56 = vadd.f32 %v5592_v8, %v5403_v54  ;;  %v6023_v54 = vld [vmem:[%s10844_s10] ss:$0 sm:$0xff]  ;;  %s10848_s10 = sld [smem:[#allocation49_spill]] }
0x13a2   : > { %v5600_v10 = vmul.f32 %v10010_v3, %v5595_v56 }
0x13a4   : > { %5601 = vadd.xlane.f32.xlu0 %v5600_v10 }
0x13a6   : > { %s10683_s14 = scalar_lea.hbm %s10848_s10, %s6027_s6 }
0x1431   : > { %v5602_v11 = vpop.xlane.xlu0 %5601 }
0x1432   : > { %v5603_v0 = vmul.f32 0.03125, %v5602_v11 }
0x1434   : > { %v5604_v12 = vsub.f32 %v5595_v56, %v5603_v0 }
0x1436   : > { %v5605_v13 = vmul.f32 %v10010_v3, %v5604_v12 }
0x1438   : > { %v5606_v14 = vmul.f32 %v5605_v13, %v5605_v13 }
0x143a   : > { %5607 = vadd.xlane.f32.xlu1 %v5606_v14 }
0x14c7   : > { %v5608_v16 = vpop.xlane.xlu1 %5607 }
0x14c8   : > { %v5609_v1 = vmul.f32 0.03125, %v5608_v16 }
0x14ca   : > { %v5610_v15 = vadd.f32 1e-05, %v5609_v1 }
0x14cc   : > { %9137 = vrsqrt.f32 %v5610_v15 }
0x14d6   : > { %v9138_v17 = vpop.eup %9137 }
0x14d7   : > { %v5612_v19 = vmul.f32 %v9138_v17, %v5605_v13 }
0x14d9   : > { %v5619_v52 = vmul.f32 %v6021_v18, %v5612_v19 }
0x14db   : > { %v5626_v21 = vadd.f32 %v6022_v20, %v5619_v52 }
0x14dd   : > { %v5629_v22 = vmul.f32 %v10010_v3, %v5626_v21 }
0x14df   : > { %5630 = vadd.xlane.f32.xlu0 %v5629_v22 }
0x156c   : > { %v5631_v31 = vpop.xlane.xlu0 %5630 }
0x156d   : > { %v5632_v32 = vmul.f32 0.03125, %v5631_v31 }
0x156f   : > { %v5633_v57 = vsub.f32 %v5626_v21, %v5632_v32 }
0x1571   : > { %v5634_v33 = vmul.f32 %v10010_v3, %v5633_v57  ;;  %v8949_v3 = vpack.c.bf16 %v5669_v45, %v5668_v44 }
0x1573   : > { %v5635_v34 = vmul.f32 %v5634_v33, %v5634_v33  ;;  %8950 = vmatpush3.bf16.msra.mxu0 %v8949_v3 }
0x1574   : > { %8951 = vmatprep.subr.bf16.mxu0 %v9524_v9  ;;  %v6025_v9 = vld [vmem:[%s10846_s0] ss:$0 sm:$0xff]  ;;  %s9423_s0 = scalar_lea.vmem %s10685_s12, 128 }
0x1575   : > { %5636 = vadd.xlane.f32.xlu1 %v5635_v34  ;;  %p9424_p0 = scmp.ne.s32.totalorder %s10685_s12, %s9423_s0  ;;  %p9431_p12 = scmp.lt.s32.totalorder %s9429_s17, %s9423_s0 }
0x1577   : > { %8953 = vmatpush3.bf16.msra.mxu0 %v8952_v48  ;;  %p9425_p3 = pnand %p9424_p0, %p10849_p2  ;;  %p9432_p8 = por %p9431_p12, %p9430_p11 }
0x1579   : > { %p9426_p6 = pneg %p9425_p3 }
0x157b   : > { %p9433_p5 = pnand %p9432_p8, %p9426_p6 }
0x1602   : > { %v5637_v49 = vpop.xlane.xlu1 %5636 }
0x1603   : > { %v5638_v50 = vmul.f32 0.03125, %v5637_v49 }
0x1605   : > { %v5639_v51 = vadd.f32 1e-05, %v5638_v50 }
0x1607   : > { %9139 = vrsqrt.f32 %v5639_v51 }
0x1611   : > { %v9140_v53 = vpop.eup %9139 }
0x1612   : > { %v5641_v55 = vmul.f32 %v9140_v53, %v5634_v33 }
0x1614   : > { %v5648_v59 = vmul.f32 %v6023_v54, %v5641_v55 }
0x1616   : > { %v5655_v60 = vadd.f32 %v6024_v58, %v5648_v59 }
0x1618   : > { %8064 = vmatmul.mubr.f32.vlgmr.msra.gmra.mrb[44].mxu0 %v5655_v60 }
0x16eb   : > { %v5745_v61 = vpop.f32.mrb[44].mxu0 }
0x16ec   : > { %v5746_v62 = vadd.f32 %v6025_v9, %v5745_v61  ;;  %v8065_v63 = vpop.f32.mrb[45].mxu0 }
0x16ee   : > { %5749 = vst [vmem:[%s890_s11] sm:$0xff] %v5746_v62 }
0x16ef   : > { %9436 = shalt.err (!%p9433_p5)
}
0x16f0   : > { %s9437_s11 = scalar_lea.hbm %s10683_s14, 128  ;;  %s9441_s4 = scalar_lea.hbm %s10848_s10, 256 }
0x16f1   : > { %p9438_p9 = scmp.ne.s32.totalorder %s10683_s14, %s9437_s11  ;;  %p9442_p4 = scmp.lt.u32.totalorder %s10683_s14, %s10848_s10 }
0x16f2   : > { %p9443_p1 = scmp.lt.u32.totalorder %s9441_s4, %s9437_s11  ;;  %p9445_p0 = scmp.lt.u32.totalorder %s9437_s11, %s10683_s14 }
0x16f3   : > { %p9439_p7 = pnand %p9438_p9, %p10849_p2 }
0x16f4   : > { %p9444_p13 = por %p9443_p1, %p9442_p4 }
0x16f5   : > { %p9440_p10 = pneg %p9439_p7 }
0x16f6   : > { %p9446_p3 = por %p9445_p0, %p9444_p13 }
0x16f8   : > { %p9447_p6 = pnand %p9446_p3, %p9440_p10 }
0x16fa   : > { %9450 = shalt.err (!%p9447_p6)
}
0x16fb   : > { %8992 = dma.vmem_to_hbm [thread:$0]  (%p10849_p2), %s10685_s12, 128, %s10683_s14, %s5751_s13  }
0x16fc PF: > { %s5776_s3 = sand.u32 1, %s9497_s5   ;;  %p10850_p11 = scmp.ne.s32.totalorder %s10820_s8, 0 }
0x16fd   : > { %p10851_p12 = scmp.ge.s32.totalorder %s9509_s28, 2  ;;  %s5777_s0 = scalar_lea.sflag [#allocation4], %s5776_s3 }
0x16ff   : > { %p9027_p8 = pnand %p10851_p12, %p10850_p11 }
0x1701   : > { %9492 = dma.done.wait (!%p9027_p8), %s5777_s0, 128  }
0x1702   : > { %9494 = vsyncadd (!%p9027_p8), %s5777_s0, 4294967168  ;;  %p42_p5 = scmp.ge.s32.totalorder %s9905_s7, 4   ;;  %s10852_s5 = smov %s9501_s26 }
0x1703   : > { %s10853_s26 = smov %s9505_s27  ;;  %s10854_s27 = smov %s9917_s15 }
0x1704   : > { %s10855_s28 = smov %s9905_s7  ;;  %44 = sbr.rel (!%p42_p5) target bundleno = 34 (0x22), region = 216 }
0x170b   :  { %5782 = vsyncpa [#allocation3], 1 }
0x170c   :  { %5784 = vsyncpa [#allocation3 + $0x1], 1 }
0x170d   :  { %5785 = vsyncpa [#allocation6], 1 }
0x170e   :  { %5786 = vsyncpa [#allocation9], 1 }
0x170f   :  { %5787 = vsyncpa [#allocation12], 1 }
0x1710   :  { %5788 = vsyncpa [#allocation15], 1 }
0x1711   :  { %5789 = vsyncpa [#allocation18], 1 }
0x1712   :  { %5790 = vsyncpa [#allocation4], 1 }
0x1713   :  { %5792 = vsyncpa [#allocation4 + $0x1], 1 }

</bundles_post_ra>
